<compile_context>
chip_gen: v7x
topology: tpu7x:2x2x1
jax: 0.10.0
libtpu: 0.0.40
codegen_flags: <defaults>
</compile_context>

<pallas_src>
import functools
import numpy as np
import jax
import jax.numpy as jnp
from jax.experimental import pallas as pl
from jax.experimental.pallas import tpu as pltpu

LEAK = 0.2
EPS = 1e-5


def _lrelu(v):
    return jnp.maximum(v, LEAK * v)


def _round_up(x, m):
    return (x + m - 1) // m * m


# -----------------------------------------------------------------------------
# Kernel A: fused ResConvBlock, one sample per grid step.
#   conv1(1x1)+LReLU -> conv2(1x1)+LReLU -> conv3(3x3, pad1)+LReLU -> + skip(1x1 or add)
#
# The sample arrives as the zero-padded image flattened row-major to (Lp, Cin), with
# padded width Wp = W+2. For output flat index r = i*Wp + j, tap (kh, kw) of the 3x3
# conv is row r + kh*Wp + kw of the padded h buffer, i.e. every tap is a contiguous
# shifted row-window -- no im2col and no HBM round trip of h.
# -----------------------------------------------------------------------------
def _resblock_kernel(xp_ref, hmask_ref, w1_ref, b1_ref, w2_ref, b2_ref,
                     w3_ref, b3_ref, wskip_ref, bskip_ref, o_ref,
                     *, Wp, R, use_skip_conv):
    xp = xp_ref[...]                                                   # (Lp, Cin) f32
    # Pointwise chain computed at every padded position (the 1x1 convs are nearly free);
    # the pad ring is then zeroed with hmask because the true conv3 padding is zeros on
    # h itself, not conv1/conv2 applied to zero-padded x.
    h = _lrelu(jnp.dot(xp, w1_ref[...], preferred_element_type=jnp.float32) + b1_ref[...])
    h = _lrelu(jnp.dot(h, w2_ref[...], preferred_element_type=jnp.float32) + b2_ref[...])
    hp = h * hmask_ref[...]                                            # zero pad ring

    # 3x3 conv: 9 shifted row-windows, statically unrolled, single accumulator
    # (first tap initializes it -- no explicit zero init). With Cm=8 a lane-concat to
    # deep-K would cost more in relayouts than it saves; the deep-K collapse is applied
    # in kernel B where K=512 actually matters.
    acc = None
    for k in range(9):
        kh, kw = divmod(k, 3)
        s = kh * Wp + kw
        t = jnp.dot(hp[s:s + R, :], w3_ref[k], preferred_element_type=jnp.float32)
        acc = t if acc is None else acc + t
    res = _lrelu(acc + b3_ref[...])

    x_in = xp[Wp + 1:Wp + 1 + R, :]                                    # interior x, aligned with output rows
    if use_skip_conv:
        skip = jnp.dot(x_in, wskip_ref[...], preferred_element_type=jnp.float32) + bskip_ref[...]
    else:
        skip = x_in                                                    # channels match: plain residual add
    o_ref[...] = skip + res


# -----------------------------------------------------------------------------
# Kernel B: 4x4 / stride-2 / pad-1 conv + GroupNorm(32, C) + LReLU, one sample per step.
#
# Input z is space-to-depth(2) of (zero-padded) x_skip, flattened row-major with padded
# width Wz = Wo+2 and 4*Cout channels. In that representation the 4x4/s2 conv is a
# 3x3/s1 conv; the 9 taps (each 4*Cout deep) are gathered into a single (Rz, 9*4*Cout)
# bf16 operand in a VMEM scratch (lane offsets are multiples of 128 => tile-aligned
# stores) and pushed through the MXU as ONE deep-K matmul.
# -----------------------------------------------------------------------------
def _down_kernel(z_ref, w_ref, bd_ref, gam_ref, bet_ref, mask_ref, *rest,
                 Wz, Rz, S, g, C4):
    if g > 1:
        A_ref, o_ref, tcat_ref = rest
    else:
        o_ref, tcat_ref = rest

    zv = z_ref[...].astype(jnp.float32)                                # (Lz, 4C)
    for k in range(9):                                                 # gather taps (static, unrolled)
        u, v = divmod(k, 3)
        s = u * Wz + v
        tcat_ref[:, k * C4:(k + 1) * C4] = zv[s:s + Rz, :].astype(jnp.bfloat16)

    # one deep-K MXU push: (Rz, 9*4*Cout) x (9*4*Cout, Cout), bf16 operands, f32 accum.
    y = jnp.dot(tcat_ref[...], w_ref[...], preferred_element_type=jnp.float32) + bd_ref[...]

    # GroupNorm over valid spatial positions only (mask kills the garbage columns of the
    # flat layout). Mean-subtracted variance -> no E[x^2]-E[x]^2 cancellation.
    mask = mask_ref[...]                                               # (Rz, 1)
    s1 = jnp.sum(y * mask, axis=0, keepdims=True)                      # (1, C)
    if g == 1:
        mean = s1 * (1.0 / S)
    else:
        mean = jnp.dot(s1, A_ref[...], preferred_element_type=jnp.float32) * (1.0 / (S * g))
    d = y - mean
    s2 = jnp.sum(d * d * mask, axis=0, keepdims=True)
    if g == 1:
        var = s2 * (1.0 / S)
    else:
        var = jnp.dot(s2, A_ref[...], preferred_element_type=jnp.float32) * (1.0 / (S * g))
    out = d * jax.lax.rsqrt(var + EPS) * gam_ref[...] + bet_ref[...]
    o_ref[...] = _lrelu(out)


# -----------------------------------------------------------------------------
# Wrapper
# -----------------------------------------------------------------------------
def down_forward(x_nchw, p):
    N, Cin, H, W = x_nchw.shape
    assert H % 2 == 0 and W % 2 == 0, "even spatial dims expected for the 4x4/s2 down conv"
    Cm = p['w1'].shape[1]
    Cout = p['w3'].shape[3]
    G = 32
    assert Cout % G == 0
    g = Cout // G

    const2 = lambda n: (0, 0)
    const3 = lambda n: (0, 0, 0)

    # ---------------- stage 1: fused ResConvBlock ----------------
    Wp = W + 2
    R = H * Wp                                   # flat output rows per sample (cols >= W are garbage)
    Lp0 = (H + 3) * Wp                           # pad-1 ring + 1 extra bottom row for tap-slice overrun
    Lp = _round_up(Lp0, 8)

    x = jnp.transpose(x_nchw, (0, 2, 3, 1)).astype(jnp.float32)        # NHWC
    xpad = jnp.pad(x, ((0, 0), (1, 2), (1, 1), (0, 0)))                # (N, H+3, Wp, Cin)
    xpf = xpad.reshape(N, Lp0, Cin)
    xpf = jnp.pad(xpf, ((0, 0), (0, Lp - Lp0), (0, 0)))                # sublane-align rows

    rr = jnp.arange(Lp)
    ra, rb = rr // Wp, rr % Wp
    hmask = ((ra >= 1) & (ra <= H) & (rb >= 1) & (rb <= W)).astype(jnp.float32).reshape(Lp, 1)

    w3r = p['w3'].reshape(9, Cm, Cout)
    use_skip_conv = (Cin != Cout)
    wskip = p['wskip'] if use_skip_conv else jnp.zeros((Cin, Cout), jnp.float32)
    bskip = p['bskip'] if use_skip_conv else jnp.zeros((1, Cout), jnp.float32)

    xs_flat = pl.pallas_call(
        functools.partial(_resblock_kernel, Wp=Wp, R=R, use_skip_conv=use_skip_conv),
        grid=(N,),
        out_shape=jax.ShapeDtypeStruct((N, R, Cout), jnp.float32),
        in_specs=[
            pl.BlockSpec((None, Lp, Cin), lambda n: (n, 0, 0)),
            pl.BlockSpec((Lp, 1), const2),
            pl.BlockSpec((Cin, Cm), const2),
            pl.BlockSpec((1, Cm), const2),
            pl.BlockSpec((Cm, Cm), const2),
            pl.BlockSpec((1, Cm), const2),
            pl.BlockSpec((9, Cm, Cout), const3),
            pl.BlockSpec((1, Cout), const2),
            pl.BlockSpec((Cin, Cout), const2),
            pl.BlockSpec((1, Cout), const2),
        ],
        out_specs=pl.BlockSpec((None, R, Cout), lambda n: (n, 0, 0)),
        compiler_params=pltpu.CompilerParams(dimension_semantics=("parallel",)),
    )(xpf, hmask, p['w1'], p['b1'], p['w2'], p['b2'], w3r, p['b3'], wskip, bskip)

    xs = xs_flat.reshape(N, H, Wp, Cout)[:, :, :W, :]                  # (N, H, W, Cout)

    # -------- stage 2: 4x4/stride-2 conv + GroupNorm(32) + LReLU (per sample) --------
    Ho, Wo = H // 2, W // 2
    Wz = Wo + 2
    Rz = Ho * Wz
    S = Ho * Wo
    C4 = 4 * Cout
    Lz0 = (Ho + 3) * Wz
    Lz = _round_up(Lz0, 16)

    # space-to-depth(2) of zero-padded x_skip: ~1x data traffic (not 16x im2col).
    xs2 = jnp.pad(xs, ((0, 0), (2, 4), (2, 2), (0, 0)))
    z = xs2.reshape(N, Ho + 3, 2, Wz, 2, Cout)
    z = z.transpose(0, 1, 3, 2, 4, 5).reshape(N, Lz0, C4)
    z = jnp.pad(z, ((0, 0), (0, Lz - Lz0), (0, 0))).astype(jnp.bfloat16)

    # Rearrange the 4x4 weight into the equivalent 3x3-over-space-to-depth weight,
    # flattened to a single (9*4*Cout, Cout) deep-K matrix (trace-time glue, tiny).
    w4 = p['wd']                                                        # (4, 4, Cout, Cout)
    weq = jnp.zeros((3, 3, 2, 2, Cout, Cout), jnp.float32)
    for u in range(3):
        for di in range(2):
            kh = 2 * u + di - 1
            if not 0 <= kh < 4:
                continue
            for v in range(3):
                for dj in range(2):
                    kw = 2 * v + dj - 1
                    if not 0 <= kw < 4:
                        continue
                    weq = weq.at[u, v, di, dj].set(w4[kh, kw])
    weq = weq.reshape(9 * C4, Cout).astype(jnp.bfloat16)

    dmask = ((jnp.arange(Rz) % Wz) < Wo).astype(jnp.float32).reshape(Rz, 1)

    extra_in, extra_specs = [], []
    if g > 1:                                                           # group-membership matrix only if needed
        grp = jnp.arange(Cout) // g
        A = (grp[:, None] == grp[None, :]).astype(jnp.float32)
        extra_in, extra_specs = [A], [pl.BlockSpec((Cout, Cout), const2)]

    yd_flat = pl.pallas_call(
        functools.partial(_down_kernel, Wz=Wz, Rz=Rz, S=S, g=g, C4=C4),
        grid=(N,),
        out_shape=jax.ShapeDtypeStruct((N, Rz, Cout), jnp.float32),
        in_specs=[
            pl.BlockSpec((None, Lz, C4), lambda n: (n, 0, 0)),
            pl.BlockSpec((9 * C4, Cout), const2),
            pl.BlockSpec((1, Cout), const2),
            pl.BlockSpec((1, Cout), const2),
            pl.BlockSpec((1, Cout), const2),
            pl.BlockSpec((Rz, 1), const2),
        ] + extra_specs,
        out_specs=pl.BlockSpec((None, Rz, Cout), lambda n: (n, 0, 0)),
        scratch_shapes=[pltpu.VMEM((Rz, 9 * C4), jnp.bfloat16)],
        compiler_params=pltpu.CompilerParams(dimension_semantics=("parallel",)),
    )(z, weq, p['bd'], p['gamma'], p['beta'], dmask, *extra_in)

    x_down = yd_flat.reshape(N, Ho, Wz, Cout)[:, :, :Wo, :]

    return (jnp.transpose(xs, (0, 3, 1, 2)),
            jnp.transpose(x_down, (0, 3, 1, 2)))


# -----------------------------------------------------------------------------
# Params + pure-JAX reference (matches the PyTorch forward)
# -----------------------------------------------------------------------------
def init_params(key, in_ch, m_ch, out_ch):
    ks = jax.random.split(key, 10)

    def w(k, shape, scale=0.1):
        return (scale * jax.random.normal(k, shape)).astype(jnp.float32)

    return dict(
        w1=w(ks[0], (in_ch, m_ch), 0.3), b1=w(ks[1], (1, m_ch)),
        w2=w(ks[2], (m_ch, m_ch), 0.3), b2=w(ks[3], (1, m_ch)),
        w3=w(ks[4], (3, 3, m_ch, out_ch), 0.1), b3=w(ks[5], (1, out_ch)),
        wskip=w(ks[6], (in_ch, out_ch), 0.3), bskip=w(ks[7], (1, out_ch)),
        wd=w(ks[8], (4, 4, out_ch, out_ch), 0.05), bd=w(ks[9], (1, out_ch)),
        gamma=jnp.ones((1, out_ch), jnp.float32),   # GroupNorm affine defaults
        beta=jnp.zeros((1, out_ch), jnp.float32),
    )


def ref_forward(x_nchw, p):
    dn = ('NHWC', 'HWIO', 'NHWC')

    def conv(x, w, b, stride=1, pad=0):
        y = jax.lax.conv_general_dilated(
            x, w, (stride, stride), [(pad, pad), (pad, pad)],
            dimension_numbers=dn, precision=jax.lax.Precision.HIGHEST)
        return y + b.reshape(1, 1, 1, -1)

    lr = lambda v: jnp.maximum(v, LEAK * v)
    x = jnp.transpose(x_nchw, (0, 2, 3, 1))
    in_ch = x.shape[-1]
    m_ch = p['w1'].shape[1]
    out_ch = p['w3'].shape[3]
    h = lr(conv(x, p['w1'].reshape(1, 1, in_ch, m_ch), p['b1']))
    h = lr(conv(h, p['w2'].reshape(1, 1, m_ch, m_ch), p['b2']))
    res = lr(conv(h, p['w3'], p['b3'], pad=1))
    if in_ch != out_ch:
        xs = conv(x, p['wskip'].reshape(1, 1, in_ch, out_ch), p['bskip']) + res
    else:
        xs = x + res
    yd = conv(xs, p['wd'], p['bd'], stride=2, pad=1)
    N, Ho, Wo, C = yd.shape
    G = 32
    g = C // G
    yg = yd.reshape(N, Ho, Wo, G, g)
    mean = jnp.mean(yg, axis=(1, 2, 4), keepdims=True)
    msq = jnp.mean(yg * yg, axis=(1, 2, 4), keepdims=True)
    var = msq - mean * mean
    yn = ((yg - mean) * jax.lax.rsqrt(var + EPS)).reshape(N, Ho, Wo, C)
    yd = lr(yn * p['gamma'].reshape(1, 1, 1, -1) + p['beta'].reshape(1, 1, 1, -1))
    return jnp.transpose(xs, (0, 3, 1, 2)), jnp.transpose(yd, (0, 3, 1, 2))


if __name__ == "__main__":
    # down(in_ch=4, m_ch=8, out_ch=32, ConvBlock='ResConvBlock')
    N, in_ch, m_ch, out_ch, H, W = 2, 4, 8, 32, 16, 16
    key = jax.random.PRNGKey(0)
    kx, kp = jax.random.split(key)
    x = jax.random.normal(kx, (N, in_ch, H, W), jnp.float32)
    params = init_params(kp, in_ch, m_ch, out_ch)

    fwd = jax.jit(down_forward)
    x_skip, x_down = jax.block_until_ready(fwd(x, params))

    assert x_skip.shape == (N, out_ch, H, W)
    assert x_down.shape == (N, out_ch, H // 2, W // 2)

    r_skip, r_down = ref_forward(x, params)
    np.testing.assert_allclose(np.asarray(x_skip), np.asarray(r_skip), rtol=1e-2, atol=1e-2)
    # x_down uses bf16 MXU operands (f32 accumulation) per the perf review -> slightly looser.
    np.testing.assert_allclose(np.asarray(x_down), np.asarray(r_down), rtol=2e-2, atol=2e-2)

    print("KERNEL_OK")
</pallas_src>

<mosaic_0001>
module attributes {stable_mosaic.version = 11 : i64} {
  func.func @_resblock_kernel(%arg0: i32, %arg1: memref<1x344x4xf32, #tpu.memory_space<vmem>>, %arg2: memref<344x1xf32, #tpu.memory_space<vmem>>, %arg3: memref<4x8xf32, #tpu.memory_space<vmem>>, %arg4: memref<1x8xf32, #tpu.memory_space<vmem>>, %arg5: memref<8x8xf32, #tpu.memory_space<vmem>>, %arg6: memref<1x8xf32, #tpu.memory_space<vmem>>, %arg7: memref<9x8x32xf32, #tpu.memory_space<vmem>>, %arg8: memref<1x32xf32, #tpu.memory_space<vmem>>, %arg9: memref<4x32xf32, #tpu.memory_space<vmem>>, %arg10: memref<1x32xf32, #tpu.memory_space<vmem>>, %arg11: memref<1x288x32xf32, #tpu.memory_space<vmem>>) attributes {dimension_semantics = [#tpu.dimension_semantics<parallel>], iteration_bounds = array<i64: 2>, scalar_prefetch = 0 : i64, scratch_operands = 0 : i64, tpu.core_type = #tpu.core_type<tc>, window_params = [{transform_indices = @transform_0, window_bounds = array<i64: 1, 344, 4>}, {pipeline_mode = #tpu.pipeline_mode<synchronous>, transform_indices = @transform_1, window_bounds = array<i64: 344, 1>}, {pipeline_mode = #tpu.pipeline_mode<synchronous>, transform_indices = @transform_2, window_bounds = array<i64: 4, 8>}, {pipeline_mode = #tpu.pipeline_mode<synchronous>, transform_indices = @transform_3, window_bounds = array<i64: 1, 8>}, {pipeline_mode = #tpu.pipeline_mode<synchronous>, transform_indices = @transform_4, window_bounds = array<i64: 8, 8>}, {pipeline_mode = #tpu.pipeline_mode<synchronous>, transform_indices = @transform_5, window_bounds = array<i64: 1, 8>}, {pipeline_mode = #tpu.pipeline_mode<synchronous>, transform_indices = @transform_6, window_bounds = array<i64: 9, 8, 32>}, {pipeline_mode = #tpu.pipeline_mode<synchronous>, transform_indices = @transform_7, window_bounds = array<i64: 1, 32>}, {pipeline_mode = #tpu.pipeline_mode<synchronous>, transform_indices = @transform_8, window_bounds = array<i64: 4, 32>}, {pipeline_mode = #tpu.pipeline_mode<synchronous>, transform_indices = @transform_9, window_bounds = array<i64: 1, 32>}, {transform_indices = @transform_10, window_bounds = array<i64: 1, 288, 32>}]} {
    %c0 = arith.constant 0 : index
    %c0_0 = arith.constant 0 : index
    %c0_1 = arith.constant 0 : index
    %0 = vector.load %arg1[%c0, %c0_0, %c0_1] : memref<1x344x4xf32, #tpu.memory_space<vmem>>, vector<1x344x4xf32>
    %1 = vector.shape_cast %0 : vector<1x344x4xf32> to vector<344x4xf32>
    %c0_2 = arith.constant 0 : index
    %c0_3 = arith.constant 0 : index
    %2 = vector.load %arg3[%c0_2, %c0_3] : memref<4x8xf32, #tpu.memory_space<vmem>>, vector<4x8xf32>
    %cst = arith.constant dense<0.000000e+00> : vector<344x8xf32>
    %3 = tpu.matmul %1, %2, %cst {dimension_numbers = #tpu.dot_dimension_numbers<[1], [0], [0], [1], [0, 0, 1, 1], [], []>} : vector<344x4xf32>, vector<4x8xf32>, vector<344x8xf32> -> vector<344x8xf32>
    %c0_4 = arith.constant 0 : index
    %c0_5 = arith.constant 0 : index
    %4 = vector.load %arg4[%c0_4, %c0_5] : memref<1x8xf32, #tpu.memory_space<vmem>>, vector<1x8xf32>
    %5 = vector.broadcast %4 : vector<1x8xf32> to vector<344x8xf32>
    %6 = arith.addf %3, %5 : vector<344x8xf32>
    %cst_6 = arith.constant 2.000000e-01 : f32
    %7 = vector.broadcast %cst_6 : f32 to vector<344x8xf32>
    %8 = arith.mulf %7, %6 : vector<344x8xf32>
    %9 = arith.maximumf %6, %8 : vector<344x8xf32>
    %c0_7 = arith.constant 0 : index
    %c0_8 = arith.constant 0 : index
    %10 = vector.load %arg5[%c0_7, %c0_8] : memref<8x8xf32, #tpu.memory_space<vmem>>, vector<8x8xf32>
    %cst_9 = arith.constant dense<0.000000e+00> : vector<344x8xf32>
    %11 = tpu.matmul %9, %10, %cst_9 {dimension_numbers = #tpu.dot_dimension_numbers<[1], [0], [0], [1], [0, 0, 1, 1], [], []>} : vector<344x8xf32>, vector<8x8xf32>, vector<344x8xf32> -> vector<344x8xf32>
    %c0_10 = arith.constant 0 : index
    %c0_11 = arith.constant 0 : index
    %12 = vector.load %arg6[%c0_10, %c0_11] : memref<1x8xf32, #tpu.memory_space<vmem>>, vector<1x8xf32>
    %13 = vector.broadcast %12 : vector<1x8xf32> to vector<344x8xf32>
    %14 = arith.addf %11, %13 : vector<344x8xf32>
    %cst_12 = arith.constant 2.000000e-01 : f32
    %15 = vector.broadcast %cst_12 : f32 to vector<344x8xf32>
    %16 = arith.mulf %15, %14 : vector<344x8xf32>
    %17 = arith.maximumf %14, %16 : vector<344x8xf32>
    %c0_13 = arith.constant 0 : index
    %c0_14 = arith.constant 0 : index
    %18 = vector.load %arg2[%c0_13, %c0_14] : memref<344x1xf32, #tpu.memory_space<vmem>>, vector<344x1xf32>
    %19 = vector.broadcast %18 : vector<344x1xf32> to vector<344x8xf32>
    %20 = arith.mulf %17, %19 : vector<344x8xf32>
    %21 = vector.extract_strided_slice %20 {offsets = [0, 0], sizes = [288, 8], strides = [1, 1]} : vector<344x8xf32> to vector<288x8xf32>
    %c0_15 = arith.constant 0 : index
    %c0_16 = arith.constant 0 : index
    %c0_17 = arith.constant 0 : index
    %22 = vector.load %arg7[%c0_15, %c0_16, %c0_17] : memref<9x8x32xf32, #tpu.memory_space<vmem>>, vector<1x8x32xf32>
    %23 = vector.shape_cast %22 : vector<1x8x32xf32> to vector<8x32xf32>
    %cst_18 = arith.constant dense<0.000000e+00> : vector<288x32xf32>
    %24 = tpu.matmul %21, %23, %cst_18 {dimension_numbers = #tpu.dot_dimension_numbers<[1], [0], [0], [1], [0, 0, 1, 1], [], []>} : vector<288x8xf32>, vector<8x32xf32>, vector<288x32xf32> -> vector<288x32xf32>
    %25 = vector.extract_strided_slice %20 {offsets = [1, 0], sizes = [288, 8], strides = [1, 1]} : vector<344x8xf32> to vector<288x8xf32>
    %c1 = arith.constant 1 : index
    %c0_19 = arith.constant 0 : index
    %c0_20 = arith.constant 0 : index
    %26 = vector.load %arg7[%c1, %c0_19, %c0_20] : memref<9x8x32xf32, #tpu.memory_space<vmem>>, vector<1x8x32xf32>
    %27 = vector.shape_cast %26 : vector<1x8x32xf32> to vector<8x32xf32>
    %cst_21 = arith.constant dense<0.000000e+00> : vector<288x32xf32>
    %28 = tpu.matmul %25, %27, %cst_21 {dimension_numbers = #tpu.dot_dimension_numbers<[1], [0], [0], [1], [0, 0, 1, 1], [], []>} : vector<288x8xf32>, vector<8x32xf32>, vector<288x32xf32> -> vector<288x32xf32>
    %29 = arith.addf %24, %28 : vector<288x32xf32>
    %30 = vector.extract_strided_slice %20 {offsets = [2, 0], sizes = [288, 8], strides = [1, 1]} : vector<344x8xf32> to vector<288x8xf32>
    %c2 = arith.constant 2 : index
    %c0_22 = arith.constant 0 : index
    %c0_23 = arith.constant 0 : index
    %31 = vector.load %arg7[%c2, %c0_22, %c0_23] : memref<9x8x32xf32, #tpu.memory_space<vmem>>, vector<1x8x32xf32>
    %32 = vector.shape_cast %31 : vector<1x8x32xf32> to vector<8x32xf32>
    %cst_24 = arith.constant dense<0.000000e+00> : vector<288x32xf32>
    %33 = tpu.matmul %30, %32, %cst_24 {dimension_numbers = #tpu.dot_dimension_numbers<[1], [0], [0], [1], [0, 0, 1, 1], [], []>} : vector<288x8xf32>, vector<8x32xf32>, vector<288x32xf32> -> vector<288x32xf32>
    %34 = arith.addf %29, %33 : vector<288x32xf32>
    %35 = vector.extract_strided_slice %20 {offsets = [18, 0], sizes = [288, 8], strides = [1, 1]} : vector<344x8xf32> to vector<288x8xf32>
    %c3 = arith.constant 3 : index
    %c0_25 = arith.constant 0 : index
    %c0_26 = arith.constant 0 : index
    %36 = vector.load %arg7[%c3, %c0_25, %c0_26] : memref<9x8x32xf32, #tpu.memory_space<vmem>>, vector<1x8x32xf32>
    %37 = vector.shape_cast %36 : vector<1x8x32xf32> to vector<8x32xf32>
    %cst_27 = arith.constant dense<0.000000e+00> : vector<288x32xf32>
    %38 = tpu.matmul %35, %37, %cst_27 {dimension_numbers = #tpu.dot_dimension_numbers<[1], [0], [0], [1], [0, 0, 1, 1], [], []>} : vector<288x8xf32>, vector<8x32xf32>, vector<288x32xf32> -> vector<288x32xf32>
    %39 = arith.addf %34, %38 : vector<288x32xf32>
    %40 = vector.extract_strided_slice %20 {offsets = [19, 0], sizes = [288, 8], strides = [1, 1]} : vector<344x8xf32> to vector<288x8xf32>
    %c4 = arith.constant 4 : index
    %c0_28 = arith.constant 0 : index
    %c0_29 = arith.constant 0 : index
    %41 = vector.load %arg7[%c4, %c0_28, %c0_29] : memref<9x8x32xf32, #tpu.memory_space<vmem>>, vector<1x8x32xf32>
    %42 = vector.shape_cast %41 : vector<1x8x32xf32> to vector<8x32xf32>
    %cst_30 = arith.constant dense<0.000000e+00> : vector<288x32xf32>
    %43 = tpu.matmul %40, %42, %cst_30 {dimension_numbers = #tpu.dot_dimension_numbers<[1], [0], [0], [1], [0, 0, 1, 1], [], []>} : vector<288x8xf32>, vector<8x32xf32>, vector<288x32xf32> -> vector<288x32xf32>
    %44 = arith.addf %39, %43 : vector<288x32xf32>
    %45 = vector.extract_strided_slice %20 {offsets = [20, 0], sizes = [288, 8], strides = [1, 1]} : vector<344x8xf32> to vector<288x8xf32>
    %c5 = arith.constant 5 : index
    %c0_31 = arith.constant 0 : index
    %c0_32 = arith.constant 0 : index
    %46 = vector.load %arg7[%c5, %c0_31, %c0_32] : memref<9x8x32xf32, #tpu.memory_space<vmem>>, vector<1x8x32xf32>
    %47 = vector.shape_cast %46 : vector<1x8x32xf32> to vector<8x32xf32>
    %cst_33 = arith.constant dense<0.000000e+00> : vector<288x32xf32>
    %48 = tpu.matmul %45, %47, %cst_33 {dimension_numbers = #tpu.dot_dimension_numbers<[1], [0], [0], [1], [0, 0, 1, 1], [], []>} : vector<288x8xf32>, vector<8x32xf32>, vector<288x32xf32> -> vector<288x32xf32>
    %49 = arith.addf %44, %48 : vector<288x32xf32>
    %50 = vector.extract_strided_slice %20 {offsets = [36, 0], sizes = [288, 8], strides = [1, 1]} : vector<344x8xf32> to vector<288x8xf32>
    %c6 = arith.constant 6 : index
    %c0_34 = arith.constant 0 : index
    %c0_35 = arith.constant 0 : index
    %51 = vector.load %arg7[%c6, %c0_34, %c0_35] : memref<9x8x32xf32, #tpu.memory_space<vmem>>, vector<1x8x32xf32>
    %52 = vector.shape_cast %51 : vector<1x8x32xf32> to vector<8x32xf32>
    %cst_36 = arith.constant dense<0.000000e+00> : vector<288x32xf32>
    %53 = tpu.matmul %50, %52, %cst_36 {dimension_numbers = #tpu.dot_dimension_numbers<[1], [0], [0], [1], [0, 0, 1, 1], [], []>} : vector<288x8xf32>, vector<8x32xf32>, vector<288x32xf32> -> vector<288x32xf32>
    %54 = arith.addf %49, %53 : vector<288x32xf32>
    %55 = vector.extract_strided_slice %20 {offsets = [37, 0], sizes = [288, 8], strides = [1, 1]} : vector<344x8xf32> to vector<288x8xf32>
    %c7 = arith.constant 7 : index
    %c0_37 = arith.constant 0 : index
    %c0_38 = arith.constant 0 : index
    %56 = vector.load %arg7[%c7, %c0_37, %c0_38] : memref<9x8x32xf32, #tpu.memory_space<vmem>>, vector<1x8x32xf32>
    %57 = vector.shape_cast %56 : vector<1x8x32xf32> to vector<8x32xf32>
    %cst_39 = arith.constant dense<0.000000e+00> : vector<288x32xf32>
    %58 = tpu.matmul %55, %57, %cst_39 {dimension_numbers = #tpu.dot_dimension_numbers<[1], [0], [0], [1], [0, 0, 1, 1], [], []>} : vector<288x8xf32>, vector<8x32xf32>, vector<288x32xf32> -> vector<288x32xf32>
    %59 = arith.addf %54, %58 : vector<288x32xf32>
    %60 = vector.extract_strided_slice %20 {offsets = [38, 0], sizes = [288, 8], strides = [1, 1]} : vector<344x8xf32> to vector<288x8xf32>
    %c8 = arith.constant 8 : index
    %c0_40 = arith.constant 0 : index
    %c0_41 = arith.constant 0 : index
    %61 = vector.load %arg7[%c8, %c0_40, %c0_41] : memref<9x8x32xf32, #tpu.memory_space<vmem>>, vector<1x8x32xf32>
    %62 = vector.shape_cast %61 : vector<1x8x32xf32> to vector<8x32xf32>
    %cst_42 = arith.constant dense<0.000000e+00> : vector<288x32xf32>
    %63 = tpu.matmul %60, %62, %cst_42 {dimension_numbers = #tpu.dot_dimension_numbers<[1], [0], [0], [1], [0, 0, 1, 1], [], []>} : vector<288x8xf32>, vector<8x32xf32>, vector<288x32xf32> -> vector<288x32xf32>
    %64 = arith.addf %59, %63 : vector<288x32xf32>
    %c0_43 = arith.constant 0 : index
    %c0_44 = arith.constant 0 : index
    %65 = vector.load %arg8[%c0_43, %c0_44] : memref<1x32xf32, #tpu.memory_space<vmem>>, vector<1x32xf32>
    %66 = vector.broadcast %65 : vector<1x32xf32> to vector<288x32xf32>
    %67 = arith.addf %64, %66 : vector<288x32xf32>
    %cst_45 = arith.constant 2.000000e-01 : f32
    %68 = vector.broadcast %cst_45 : f32 to vector<288x32xf32>
    %69 = arith.mulf %68, %67 : vector<288x32xf32>
    %70 = arith.maximumf %67, %69 : vector<288x32xf32>
    %71 = vector.extract_strided_slice %1 {offsets = [19, 0], sizes = [288, 4], strides = [1, 1]} : vector<344x4xf32> to vector<288x4xf32>
    %c0_46 = arith.constant 0 : index
    %c0_47 = arith.constant 0 : index
    %72 = vector.load %arg9[%c0_46, %c0_47] : memref<4x32xf32, #tpu.memory_space<vmem>>, vector<4x32xf32>
    %cst_48 = arith.constant dense<0.000000e+00> : vector<288x32xf32>
    %73 = tpu.matmul %71, %72, %cst_48 {dimension_numbers = #tpu.dot_dimension_numbers<[1], [0], [0], [1], [0, 0, 1, 1], [], []>} : vector<288x4xf32>, vector<4x32xf32>, vector<288x32xf32> -> vector<288x32xf32>
    %c0_49 = arith.constant 0 : index
    %c0_50 = arith.constant 0 : index
    %74 = vector.load %arg10[%c0_49, %c0_50] : memref<1x32xf32, #tpu.memory_space<vmem>>, vector<1x32xf32>
    %75 = vector.broadcast %74 : vector<1x32xf32> to vector<288x32xf32>
    %76 = arith.addf %73, %75 : vector<288x32xf32>
    %77 = arith.addf %76, %70 : vector<288x32xf32>
    %c0_51 = arith.constant 0 : index
    %c0_52 = arith.constant 0 : index
    %c0_53 = arith.constant 0 : index
    %78 = vector.load %arg11[%c0_51, %c0_52, %c0_53] : memref<1x288x32xf32, #tpu.memory_space<vmem>>, vector<1x288x32xf32>
    %79 = vector.shape_cast %78 : vector<1x288x32xf32> to vector<288x32xf32>
    %80 = vector.shape_cast %77 : vector<288x32xf32> to vector<1x288x32xf32>
    tpu.vector_store %arg11[%c0_51, %c0_52, %c0_53], %80 {strides = array<i32>} : memref<1x288x32xf32, #tpu.memory_space<vmem>>, vector<1x288x32xf32>,
    return
  }
  func.func @transform_0(%arg0: i32) -> (i32, i32, i32) {
    %c0_i32 = arith.constant 0 : i32
    %c0_i32_0 = arith.constant 0 : i32
    %c0_i32_1 = arith.constant 0 : i32
    return %arg0, %c0_i32, %c0_i32_0 : i32, i32, i32
  }
  func.func @transform_1(%arg0: i32) -> (i32, i32) {
    %c0_i32 = arith.constant 0 : i32
    %c0_i32_0 = arith.constant 0 : i32
    %c0_i32_1 = arith.constant 0 : i32
    return %c0_i32, %c0_i32_0 : i32, i32
  }
  func.func @transform_2(%arg0: i32) -> (i32, i32) {
    %c0_i32 = arith.constant 0 : i32
    %c0_i32_0 = arith.constant 0 : i32
    %c0_i32_1 = arith.constant 0 : i32
    return %c0_i32, %c0_i32_0 : i32, i32
  }
  func.func @transform_3(%arg0: i32) -> (i32, i32) {
    %c0_i32 = arith.constant 0 : i32
    %c0_i32_0 = arith.constant 0 : i32
    %c0_i32_1 = arith.constant 0 : i32
    return %c0_i32, %c0_i32_0 : i32, i32
  }
  func.func @transform_4(%arg0: i32) -> (i32, i32) {
    %c0_i32 = arith.constant 0 : i32
    %c0_i32_0 = arith.constant 0 : i32
    %c0_i32_1 = arith.constant 0 : i32
    return %c0_i32, %c0_i32_0 : i32, i32
  }
  func.func @transform_5(%arg0: i32) -> (i32, i32) {
    %c0_i32 = arith.constant 0 : i32
    %c0_i32_0 = arith.constant 0 : i32
    %c0_i32_1 = arith.constant 0 : i32
    return %c0_i32, %c0_i32_0 : i32, i32
  }
  func.func @transform_6(%arg0: i32) -> (i32, i32, i32) {
    %c0_i32 = arith.constant 0 : i32
    %c0_i32_0 = arith.constant 0 : i32
    %c0_i32_1 = arith.constant 0 : i32
    %c0_i32_2 = arith.constant 0 : i32
    return %c0_i32, %c0_i32_0, %c0_i32_1 : i32, i32, i32
  }
  func.func @transform_7(%arg0: i32) -> (i32, i32) {
    %c0_i32 = arith.constant 0 : i32
    %c0_i32_0 = arith.constant 0 : i32
    %c0_i32_1 = arith.constant 0 : i32
    return %c0_i32, %c0_i32_0 : i32, i32
  }
  func.func @transform_8(%arg0: i32) -> (i32, i32) {
    %c0_i32 = arith.constant 0 : i32
    %c0_i32_0 = arith.constant 0 : i32
    %c0_i32_1 = arith.constant 0 : i32
    return %c0_i32, %c0_i32_0 : i32, i32
  }
  func.func @transform_9(%arg0: i32) -> (i32, i32) {
    %c0_i32 = arith.constant 0 : i32
    %c0_i32_0 = arith.constant 0 : i32
    %c0_i32_1 = arith.constant 0 : i32
    return %c0_i32, %c0_i32_0 : i32, i32
  }
  func.func @transform_10(%arg0: i32) -> (i32, i32, i32) {
    %c0_i32 = arith.constant 0 : i32
    %c0_i32_0 = arith.constant 0 : i32
    %c0_i32_1 = arith.constant 0 : i32
    return %arg0, %c0_i32, %c0_i32_0 : i32, i32, i32
  }
}

module attributes {stable_mosaic.version = 11 : i64} {
  func.func @_down_kernel(%arg0: i32, %arg1: memref<1x112x128xbf16, #tpu.memory_space<vmem>>, %arg2: memref<1152x32xbf16, #tpu.memory_space<vmem>>, %arg3: memref<1x32xf32, #tpu.memory_space<vmem>>, %arg4: memref<1x32xf32, #tpu.memory_space<vmem>>, %arg5: memref<1x32xf32, #tpu.memory_space<vmem>>, %arg6: memref<80x1xf32, #tpu.memory_space<vmem>>, %arg7: memref<1x80x32xf32, #tpu.memory_space<vmem>>, %arg8: memref<80x1152xbf16, #tpu.memory_space<vmem>>) attributes {dimension_semantics = [#tpu.dimension_semantics<parallel>], iteration_bounds = array<i64: 2>, scalar_prefetch = 0 : i64, scratch_operands = 1 : i64, tpu.core_type = #tpu.core_type<tc>, window_params = [{transform_indices = @transform_0, window_bounds = array<i64: 1, 112, 128>}, {pipeline_mode = #tpu.pipeline_mode<synchronous>, transform_indices = @transform_1, window_bounds = array<i64: 1152, 32>}, {pipeline_mode = #tpu.pipeline_mode<synchronous>, transform_indices = @transform_2, window_bounds = array<i64: 1, 32>}, {pipeline_mode = #tpu.pipeline_mode<synchronous>, transform_indices = @transform_3, window_bounds = array<i64: 1, 32>}, {pipeline_mode = #tpu.pipeline_mode<synchronous>, transform_indices = @transform_4, window_bounds = array<i64: 1, 32>}, {pipeline_mode = #tpu.pipeline_mode<synchronous>, transform_indices = @transform_5, window_bounds = array<i64: 80, 1>}, {transform_indices = @transform_6, window_bounds = array<i64: 1, 80, 32>}]} {
    %c0 = arith.constant 0 : index
    %c0_0 = arith.constant 0 : index
    %c0_1 = arith.constant 0 : index
    %0 = vector.load %arg1[%c0, %c0_0, %c0_1] : memref<1x112x128xbf16, #tpu.memory_space<vmem>>, vector<1x112x128xbf16>
    %1 = vector.shape_cast %0 : vector<1x112x128xbf16> to vector<112x128xbf16>
    %2 = arith.extf %1 : vector<112x128xbf16> to vector<112x128xf32>
    %3 = vector.extract_strided_slice %2 {offsets = [0, 0], sizes = [80, 128], strides = [1, 1]} : vector<112x128xf32> to vector<80x128xf32>
    %4 = arith.truncf %3 : vector<80x128xf32> to vector<80x128xbf16>
    %c0_2 = arith.constant 0 : index
    %c0_3 = arith.constant 0 : index
    %5 = vector.load %arg8[%c0_2, %c0_3] : memref<80x1152xbf16, #tpu.memory_space<vmem>>, vector<80x128xbf16>
    tpu.vector_store %arg8[%c0_2, %c0_3], %4 {strides = array<i32>} : memref<80x1152xbf16, #tpu.memory_space<vmem>>, vector<80x128xbf16>,
    %6 = vector.extract_strided_slice %2 {offsets = [1, 0], sizes = [80, 128], strides = [1, 1]} : vector<112x128xf32> to vector<80x128xf32>
    %7 = arith.truncf %6 : vector<80x128xf32> to vector<80x128xbf16>
    %c0_4 = arith.constant 0 : index
    %c128 = arith.constant 128 : index
    %8 = vector.load %arg8[%c0_4, %c128] : memref<80x1152xbf16, #tpu.memory_space<vmem>>, vector<80x128xbf16>
    tpu.vector_store %arg8[%c0_4, %c128], %7 {strides = array<i32>} : memref<80x1152xbf16, #tpu.memory_space<vmem>>, vector<80x128xbf16>,
    %9 = vector.extract_strided_slice %2 {offsets = [2, 0], sizes = [80, 128], strides = [1, 1]} : vector<112x128xf32> to vector<80x128xf32>
    %10 = arith.truncf %9 : vector<80x128xf32> to vector<80x128xbf16>
    %c0_5 = arith.constant 0 : index
    %c256 = arith.constant 256 : index
    %11 = vector.load %arg8[%c0_5, %c256] : memref<80x1152xbf16, #tpu.memory_space<vmem>>, vector<80x128xbf16>
    tpu.vector_store %arg8[%c0_5, %c256], %10 {strides = array<i32>} : memref<80x1152xbf16, #tpu.memory_space<vmem>>, vector<80x128xbf16>,
    %12 = vector.extract_strided_slice %2 {offsets = [10, 0], sizes = [80, 128], strides = [1, 1]} : vector<112x128xf32> to vector<80x128xf32>
    %13 = arith.truncf %12 : vector<80x128xf32> to vector<80x128xbf16>
    %c0_6 = arith.constant 0 : index
    %c384 = arith.constant 384 : index
    %14 = vector.load %arg8[%c0_6, %c384] : memref<80x1152xbf16, #tpu.memory_space<vmem>>, vector<80x128xbf16>
    tpu.vector_store %arg8[%c0_6, %c384], %13 {strides = array<i32>} : memref<80x1152xbf16, #tpu.memory_space<vmem>>, vector<80x128xbf16>,
    %15 = vector.extract_strided_slice %2 {offsets = [11, 0], sizes = [80, 128], strides = [1, 1]} : vector<112x128xf32> to vector<80x128xf32>
    %16 = arith.truncf %15 : vector<80x128xf32> to vector<80x128xbf16>
    %c0_7 = arith.constant 0 : index
    %c512 = arith.constant 512 : index
    %17 = vector.load %arg8[%c0_7, %c512] : memref<80x1152xbf16, #tpu.memory_space<vmem>>, vector<80x128xbf16>
    tpu.vector_store %arg8[%c0_7, %c512], %16 {strides = array<i32>} : memref<80x1152xbf16, #tpu.memory_space<vmem>>, vector<80x128xbf16>,
    %18 = vector.extract_strided_slice %2 {offsets = [12, 0], sizes = [80, 128], strides = [1, 1]} : vector<112x128xf32> to vector<80x128xf32>
    %19 = arith.truncf %18 : vector<80x128xf32> to vector<80x128xbf16>
    %c0_8 = arith.constant 0 : index
    %c640 = arith.constant 640 : index
    %20 = vector.load %arg8[%c0_8, %c640] : memref<80x1152xbf16, #tpu.memory_space<vmem>>, vector<80x128xbf16>
    tpu.vector_store %arg8[%c0_8, %c640], %19 {strides = array<i32>} : memref<80x1152xbf16, #tpu.memory_space<vmem>>, vector<80x128xbf16>,
    %21 = vector.extract_strided_slice %2 {offsets = [20, 0], sizes = [80, 128], strides = [1, 1]} : vector<112x128xf32> to vector<80x128xf32>
    %22 = arith.truncf %21 : vector<80x128xf32> to vector<80x128xbf16>
    %c0_9 = arith.constant 0 : index
    %c768 = arith.constant 768 : index
    %23 = vector.load %arg8[%c0_9, %c768] : memref<80x1152xbf16, #tpu.memory_space<vmem>>, vector<80x128xbf16>
    tpu.vector_store %arg8[%c0_9, %c768], %22 {strides = array<i32>} : memref<80x1152xbf16, #tpu.memory_space<vmem>>, vector<80x128xbf16>,
    %24 = vector.extract_strided_slice %2 {offsets = [21, 0], sizes = [80, 128], strides = [1, 1]} : vector<112x128xf32> to vector<80x128xf32>
    %25 = arith.truncf %24 : vector<80x128xf32> to vector<80x128xbf16>
    %c0_10 = arith.constant 0 : index
    %c896 = arith.constant 896 : index
    %26 = vector.load %arg8[%c0_10, %c896] : memref<80x1152xbf16, #tpu.memory_space<vmem>>, vector<80x128xbf16>
    tpu.vector_store %arg8[%c0_10, %c896], %25 {strides = array<i32>} : memref<80x1152xbf16, #tpu.memory_space<vmem>>, vector<80x128xbf16>,
    %27 = vector.extract_strided_slice %2 {offsets = [22, 0], sizes = [80, 128], strides = [1, 1]} : vector<112x128xf32> to vector<80x128xf32>
    %28 = arith.truncf %27 : vector<80x128xf32> to vector<80x128xbf16>
    %c0_11 = arith.constant 0 : index
    %c1024 = arith.constant 1024 : index
    %29 = vector.load %arg8[%c0_11, %c1024] : memref<80x1152xbf16, #tpu.memory_space<vmem>>, vector<80x128xbf16>
    tpu.vector_store %arg8[%c0_11, %c1024], %28 {strides = array<i32>} : memref<80x1152xbf16, #tpu.memory_space<vmem>>, vector<80x128xbf16>,
    %c0_12 = arith.constant 0 : index
    %c0_13 = arith.constant 0 : index
    %30 = vector.load %arg8[%c0_12, %c0_13] : memref<80x1152xbf16, #tpu.memory_space<vmem>>, vector<80x1152xbf16>
    %c0_14 = arith.constant 0 : index
    %c0_15 = arith.constant 0 : index
    %31 = vector.load %arg2[%c0_14, %c0_15] : memref<1152x32xbf16, #tpu.memory_space<vmem>>, vector<1152x32xbf16>
    %cst = arith.constant dense<0.000000e+00> : vector<80x32xf32>
    %32 = tpu.matmul %30, %31, %cst {dimension_numbers = #tpu.dot_dimension_numbers<[1], [0], [0], [1], [0, 0, 1, 1], [], []>} : vector<80x1152xbf16>, vector<1152x32xbf16>, vector<80x32xf32> -> vector<80x32xf32>
    %c0_16 = arith.constant 0 : index
    %c0_17 = arith.constant 0 : index
    %33 = vector.load %arg3[%c0_16, %c0_17] : memref<1x32xf32, #tpu.memory_space<vmem>>, vector<1x32xf32>
    %34 = vector.broadcast %33 : vector<1x32xf32> to vector<80x32xf32>
    %35 = arith.addf %32, %34 : vector<80x32xf32>
    %c0_18 = arith.constant 0 : index
    %c0_19 = arith.constant 0 : index
    %36 = vector.load %arg6[%c0_18, %c0_19] : memref<80x1xf32, #tpu.memory_space<vmem>>, vector<80x1xf32>
    %37 = vector.broadcast %36 : vector<80x1xf32> to vector<80x32xf32>
    %38 = arith.mulf %35, %37 : vector<80x32xf32>
    %cst_20 = arith.constant dense<0.000000e+00> : vector<32xf32>
    %39 = vector.multi_reduction <add>, %38, %cst_20 [0] : vector<80x32xf32> to vector<32xf32>
    %40 = vector.shape_cast %39 : vector<32xf32> to vector<1x32xf32>
    %cst_21 = arith.constant 1.562500e-02 : f32
    %41 = vector.broadcast %cst_21 : f32 to vector<1x32xf32>
    %42 = arith.mulf %40, %41 : vector<1x32xf32>
    %43 = vector.broadcast %42 : vector<1x32xf32> to vector<80x32xf32>
    %44 = arith.subf %35, %43 : vector<80x32xf32>
    %45 = arith.mulf %44, %44 : vector<80x32xf32>
    %46 = vector.broadcast %36 : vector<80x1xf32> to vector<80x32xf32>
    %47 = arith.mulf %45, %46 : vector<80x32xf32>
    %cst_22 = arith.constant dense<0.000000e+00> : vector<32xf32>
    %48 = vector.multi_reduction <add>, %47, %cst_22 [0] : vector<80x32xf32> to vector<32xf32>
    %49 = vector.shape_cast %48 : vector<32xf32> to vector<1x32xf32>
    %cst_23 = arith.constant 1.562500e-02 : f32
    %50 = vector.broadcast %cst_23 : f32 to vector<1x32xf32>
    %51 = arith.mulf %49, %50 : vector<1x32xf32>
    %cst_24 = arith.constant 9.99999974E-6 : f32
    %52 = vector.broadcast %cst_24 : f32 to vector<1x32xf32>
    %53 = arith.addf %51, %52 : vector<1x32xf32>
    %54 = math.rsqrt %53 : vector<1x32xf32>
    %55 = vector.broadcast %54 : vector<1x32xf32> to vector<80x32xf32>
    %56 = arith.mulf %44, %55 : vector<80x32xf32>
    %c0_25 = arith.constant 0 : index
    %c0_26 = arith.constant 0 : index
    %57 = vector.load %arg4[%c0_25, %c0_26] : memref<1x32xf32, #tpu.memory_space<vmem>>, vector<1x32xf32>
    %58 = vector.broadcast %57 : vector<1x32xf32> to vector<80x32xf32>
    %59 = arith.mulf %56, %58 : vector<80x32xf32>
    %c0_27 = arith.constant 0 : index
    %c0_28 = arith.constant 0 : index
    %60 = vector.load %arg5[%c0_27, %c0_28] : memref<1x32xf32, #tpu.memory_space<vmem>>, vector<1x32xf32>
    %61 = vector.broadcast %60 : vector<1x32xf32> to vector<80x32xf32>
    %62 = arith.addf %59, %61 : vector<80x32xf32>
    %cst_29 = arith.constant 2.000000e-01 : f32
    %63 = vector.broadcast %cst_29 : f32 to vector<80x32xf32>
    %64 = arith.mulf %63, %62 : vector<80x32xf32>
    %65 = arith.maximumf %62, %64 : vector<80x32xf32>
    %c0_30 = arith.constant 0 : index
    %c0_31 = arith.constant 0 : index
    %c0_32 = arith.constant 0 : index
    %66 = vector.load %arg7[%c0_30, %c0_31, %c0_32] : memref<1x80x32xf32, #tpu.memory_space<vmem>>, vector<1x80x32xf32>
    %67 = vector.shape_cast %66 : vector<1x80x32xf32> to vector<80x32xf32>
    %68 = vector.shape_cast %65 : vector<80x32xf32> to vector<1x80x32xf32>
    tpu.vector_store %arg7[%c0_30, %c0_31, %c0_32], %68 {strides = array<i32>} : memref<1x80x32xf32, #tpu.memory_space<vmem>>, vector<1x80x32xf32>,
    return
  }
  func.func @transform_0(%arg0: i32) -> (i32, i32, i32) {
    %c0_i32 = arith.constant 0 : i32
    %c0_i32_0 = arith.constant 0 : i32
    %c0_i32_1 = arith.constant 0 : i32
    return %arg0, %c0_i32, %c0_i32_0 : i32, i32, i32
  }
  func.func @transform_1(%arg0: i32) -> (i32, i32) {
    %c0_i32 = arith.constant 0 : i32
    %c0_i32_0 = arith.constant 0 : i32
    %c0_i32_1 = arith.constant 0 : i32
    return %c0_i32, %c0_i32_0 : i32, i32
  }
  func.func @transform_2(%arg0: i32) -> (i32, i32) {
    %c0_i32 = arith.constant 0 : i32
    %c0_i32_0 = arith.constant 0 : i32
    %c0_i32_1 = arith.constant 0 : i32
    return %c0_i32, %c0_i32_0 : i32, i32
  }
  func.func @transform_3(%arg0: i32) -> (i32, i32) {
    %c0_i32 = arith.constant 0 : i32
    %c0_i32_0 = arith.constant 0 : i32
    %c0_i32_1 = arith.constant 0 : i32
    return %c0_i32, %c0_i32_0 : i32, i32
  }
  func.func @transform_4(%arg0: i32) -> (i32, i32) {
    %c0_i32 = arith.constant 0 : i32
    %c0_i32_0 = arith.constant 0 : i32
    %c0_i32_1 = arith.constant 0 : i32
    return %c0_i32, %c0_i32_0 : i32, i32
  }
  func.func @transform_5(%arg0: i32) -> (i32, i32) {
    %c0_i32 = arith.constant 0 : i32
    %c0_i32_0 = arith.constant 0 : i32
    %c0_i32_1 = arith.constant 0 : i32
    return %c0_i32, %c0_i32_0 : i32, i32
  }
  func.func @transform_6(%arg0: i32) -> (i32, i32, i32) {
    %c0_i32 = arith.constant 0 : i32
    %c0_i32_0 = arith.constant 0 : i32
    %c0_i32_1 = arith.constant 0 : i32
    return %arg0, %c0_i32, %c0_i32_0 : i32, i32, i32
  }
}

</mosaic_0001>

<bundles_post_ra>
// kernel: down_forward.2
= control target key start
LH: loop header
LB: loop body
LE: loop exit
PB: predicated region body
PF: predicated region fallthrough
CT: control target
= control target key end

     0   :  { %s7976_s13 = smov 0   ;;  %s10341_s0 = inlined_call_operand.vmem [shape: f32[2,344,4], index: 0, kind: input, shape index: {}]   ;;  %s10342_s1 = inlined_call_operand.vmem [shape: f32[344,1], index: 1, kind: input, shape index: {}]   ;;  %s10343_s2 = inlined_call_operand.vmem [shape: f32[4,8], index: 2, kind: input, shape index: {}]   ;;  %s10344_s3 = inlined_call_operand.vmem [shape: f32[1,8], index: 3, kind: input, shape index: {}]   ;;  %s10345_s4 = inlined_call_operand.vmem [shape: f32[8,8], index: 4, kind: input, shape index: {}]   ;;  %s10346_s5 = inlined_call_operand.vmem [shape: f32[1,8], index: 5, kind: input, shape index: {}]   ;;  %s10347_s6 = inlined_call_operand.vmem [shape: f32[9,8,32], index: 6, kind: input, shape index: {}]   ;;  %s10348_s7 = inlined_call_operand.vmem [shape: f32[1,32], index: 7, kind: input, shape index: {}]   ;;  %s10349_s8 = inlined_call_operand.vmem [shape: f32[4,32], index: 8, kind: input, shape index: {}]   ;;  %s10350_s9 = inlined_call_operand.vmem [shape: f32[1,32], index: 9, kind: input, shape index: {}]   ;;  %s10351_s10 = inlined_call_operand.vmem [shape: f32[2,288,32], index: 10, kind: output, shape index: {}]  }
   0x1 LB: > { %s5818_s14 = sadd.s32 4294967295, %s7916_s13   ;;  %p5822_p0 = scmp.ge.s32.totalorder %s7916_s13, 1  ;;  %s7916_s13 = sphi %s7976_s13, %s20_s13  }
   0x2   : > { %p312_p1 = scmp.lt.s32.totalorder %s7916_s13, 3 }
   0x4   : > { %p313_p2 = pnand %p5822_p0, %p312_p1 }
   0x6   : > { %316 = sbr.rel (%p313_p2) target bundleno = 1264 (0x4f0), region = 60 }
   0xd   : > { %v403_v0 = vld [vmem:[%s10343_s2] sm:$0xf]  ;;  %vm541_vm0 = vcmask 1043456   ;;  %p350_p3 = scmp.lt.s32.totalorder %s5818_s14, 1  ;;  %v7918_v1 = vmov 0.0   ;;  %vm7919_vm1 = vmmov 0  }
   0xe   : > { %6745 = vmatprep.subr.mxu1 %v7918_v1  ;;  %6747 = vmatprep.mubr.msk.f32.mxu1 %vm7919_vm1, %v7918_v1  ;;  %vm411_vm2 = vcmask 31744   ;;  %v911_v2 = vld [vmem:[%s10345_s4] sm:$0xff]  ;;  %v7920_v41 = vmov 0   ;;  %v1410_v44 = vld [vmem:[%s10342_s1 + $0x8] sm:$0xff]  ;;  %v1411_v46 = vld [vmem:[%s10342_s1 + $0x10] sm:$0xff]  ;;  %vm919_vm3 = vcmask 64512  }
   0xf   : > { %6746 = vmatpush3.msk.msra.mxu1 %vm541_vm0, %v403_v0  ;;  %s10648_s14 = smov (!%p350_p3, %s5818_s14), 1  ;;  %7870 = vset.pattern.permute.xlu0 %v7920_v41  ;;  %v1409_v42 = vld [vmem:[%s10342_s1] sm:$0xff]  ;;  %v1412_v49 = vld [vmem:[%s10342_s1 + $0x18] sm:$0xff]  ;;  %v1415_v50 = vld [vmem:[%s10342_s1 + $0x30] sm:$0xff]  ;;  %vm1736_vm4 = vcmask 1046528   ;;  %vm2446_vm5 = vcmask 1045504  }
  0x10   : > { %6876 = vmatprep.subr.mxu1 %v7918_v1  ;;  %s7857_s17 = smul.u32 344, %s10648_s14  ;;  %7871 = vset.pattern.permute.xlu1 %v7920_v41  ;;  %v1413_v47 = vld [vmem:[%s10342_s1 + $0x20] sm:$0xff]  ;;  %v1414_v52 = vld [vmem:[%s10342_s1 + $0x28] sm:$0xff]  ;;  %v1416_v55 = vld [vmem:[%s10342_s1 + $0x38] sm:$0xff]  ;;  %vm3168_vm6 = vcmask 1044480   ;;  %vm4318_vm7 = vcmask 1042432  }
  0x11   : > { %1452 = vperm.xlu0 %7870, %v1409_v42   ;;  %1462 = vperm.xlu1 %7871, %v1411_v46   ;;  %v1417_v53 = vld [vmem:[%s10342_s1 + $0x40] sm:$0xff]  ;;  %v1419_v56 = vld [vmem:[%s10342_s1 + $0x50] sm:$0xff]  ;;  %v1418_v57 = vld [vmem:[%s10342_s1 + $0x48] sm:$0xff]  ;;  %vm4747_vm8 = vcmask 1041408   ;;  %s7858_s12 = smul.u32 288, %s10648_s14  ;;  %vm5726_vm9 = vcmask 261120  }
  0x12   : > { %s7998_s20 = scalar_lea.vmem %s10341_s0, %s7857_s17  ;;  %v1421_v58 = vld [vmem:[%s10342_s1 + $0x60] sm:$0xff]  ;;  %v1420_v59 = vld [vmem:[%s10342_s1 + $0x58] sm:$0xff]  ;;  %v1423_v60 = vld [vmem:[%s10342_s1 + $0x70] sm:$0xff] }
  0x13   : > { %v360_v3 = vld [vmem:[%s7998_s20] sm:$0xff]  ;;  %v361_v4 = vld [vmem:[%s7998_s20 + $0x8] sm:$0xff]  ;;  %v362_v5 = vld [vmem:[%s7998_s20 + $0x10] sm:$0xff]  ;;  %s10133_s14 = scalar_lea.vmem %s10351_s10, %s7858_s12 }
  0x14   : > { %6748 = vmatmul.mubr.msk.f32.vlgmr.msra.gmra.mrb[0].mxu1 %vm411_vm2, %v360_v3  ;;  %v363_v6 = vld [vmem:[%s7998_s20 + $0x18] sm:$0xff]  ;;  %v364_v7 = vld [vmem:[%s7998_s20 + $0x20] sm:$0xff]  ;;  %v365_v8 = vld [vmem:[%s7998_s20 + $0x28] sm:$0xff] }
  0x15   : > { %6750 = vmatprep.mubr.msk.f32.mxu1 %vm7919_vm1, %v7918_v1  ;;  %6877 = vmatpush3.msra.mxu1 %v911_v2  ;;  %v366_v9 = vld [vmem:[%s7998_s20 + $0x30] sm:$0xff]  ;;  %v367_v10 = vld [vmem:[%s7998_s20 + $0x38] sm:$0xff]  ;;  %v368_v11 = vld [vmem:[%s7998_s20 + $0x40] sm:$0xff] }
  0x16   : > { %v369_v12 = vld [vmem:[%s7998_s20 + $0x48] sm:$0xff]  ;;  %v370_v13 = vld [vmem:[%s7998_s20 + $0x50] sm:$0xff]  ;;  %v371_v14 = vld [vmem:[%s7998_s20 + $0x58] sm:$0xff]  ;;  %1457 = vperm.xlu0 %7870, %v1410_v44   ;;  %1467 = vperm.xlu1 %7871, %v1412_v49  }
  0x17   : > { %v372_v15 = vld [vmem:[%s7998_s20 + $0x60] sm:$0xff]  ;;  %v373_v16 = vld [vmem:[%s7998_s20 + $0x68] sm:$0xff]  ;;  %v374_v17 = vld [vmem:[%s7998_s20 + $0x70] sm:$0xff] }
  0x18   : > { %6751 = vmatmul.mubr.msk.f32.gmra.mrb[2].mxu1 %vm411_vm2, %v361_v4  ;;  %v375_v18 = vld [vmem:[%s7998_s20 + $0x78] sm:$0xff]  ;;  %v376_v19 = vld [vmem:[%s7998_s20 + $0x80] sm:$0xff]  ;;  %v377_v20 = vld [vmem:[%s7998_s20 + $0x88] sm:$0xff] }
  0x19   : > { %6753 = vmatprep.mubr.msk.f32.mxu1 %vm7919_vm1, %v7918_v1  ;;  %v378_v21 = vld [vmem:[%s7998_s20 + $0x90] sm:$0xff]  ;;  %v379_v22 = vld [vmem:[%s7998_s20 + $0x98] sm:$0xff]  ;;  %v380_v23 = vld [vmem:[%s7998_s20 + $0xa0] sm:$0xff] }
  0x1a   : > { %v381_v24 = vld [vmem:[%s7998_s20 + $0xa8] sm:$0xff]  ;;  %v382_v25 = vld [vmem:[%s7998_s20 + $0xb0] sm:$0xff]  ;;  %v383_v26 = vld [vmem:[%s7998_s20 + $0xb8] sm:$0xff]  ;;  %1472 = vperm.xlu0 %7870, %v1413_v47   ;;  %1477 = vperm.xlu1 %7871, %v1414_v52  }
  0x1b   : > { %v384_v27 = vld [vmem:[%s7998_s20 + $0xc0] sm:$0xff]  ;;  %v385_v28 = vld [vmem:[%s7998_s20 + $0xc8] sm:$0xff]  ;;  %v386_v29 = vld [vmem:[%s7998_s20 + $0xd0] sm:$0xff] }
  0x1c   : > { %6754 = vmatmul.mubr.msk.f32.gmra.mrb[4].mxu1 %vm411_vm2, %v362_v5  ;;  %v387_v30 = vld [vmem:[%s7998_s20 + $0xd8] sm:$0xff]  ;;  %v388_v31 = vld [vmem:[%s7998_s20 + $0xe0] sm:$0xff]  ;;  %v389_v32 = vld [vmem:[%s7998_s20 + $0xe8] sm:$0xff] }
  0x1d   : > { %6756 = vmatprep.mubr.msk.f32.mxu1 %vm7919_vm1, %v7918_v1  ;;  %v390_v33 = vld [vmem:[%s7998_s20 + $0xf0] sm:$0xff]  ;;  %v391_v34 = vld [vmem:[%s7998_s20 + $0xf8] sm:$0xff]  ;;  %v392_v35 = vld [vmem:[%s7998_s20 + $0x100] sm:$0xff] }
  0x1e   : > { %v393_v36 = vld [vmem:[%s7998_s20 + $0x108] sm:$0xff]  ;;  %v394_v37 = vld [vmem:[%s7998_s20 + $0x110] sm:$0xff]  ;;  %v395_v38 = vld [vmem:[%s7998_s20 + $0x118] sm:$0xff]  ;;  %1482 = vperm.xlu0 %7870, %v1415_v50   ;;  %1487 = vperm.xlu1 %7871, %v1416_v55  }
  0x1f   : > { %v396_v39 = vld [vmem:[%s7998_s20 + $0x120] sm:$0xff]  ;;  %v397_v40 = vld [vmem:[%s7998_s20 + $0x128] sm:$0xff]  ;;  %v398_v43 = vld [vmem:[%s7998_s20 + $0x130] sm:$0xff] }
  0x20   : > { %6757 = vmatmul.mubr.msk.f32.gmra.mrb[6].mxu1 %vm411_vm2, %v363_v6  ;;  %v399_v45 = vld [vmem:[%s7998_s20 + $0x138] sm:$0xff]  ;;  %v400_v48 = vld [vmem:[%s7998_s20 + $0x140] sm:$0xff]  ;;  %v401_v51 = vld [vmem:[%s7998_s20 + $0x148] sm:$0xff] }
  0x21   : > { %6759 = vmatprep.mubr.msk.f32.mxu1 %vm7919_vm1, %v7918_v1  ;;  %v402_v54 = vld [vmem:[%s7998_s20 + $0x150] sm:$0xff]  ;;  %v1422_v61 = vld [vmem:[%s10342_s1 + $0x68] sm:$0xff]  ;;  %v1425_v62 = vld [vmem:[%s10342_s1 + $0x80] sm:$0xff] }
  0x22   : > { %1492 = vperm.xlu0 %7870, %v1417_v53   ;;  %1497 = vperm.xlu1 %7871, %v1418_v57   ;;  %v1424_v63 = vld [vmem:[%s10342_s1 + $0x78] sm:$0xff]  ;;  %v1427_v0 = vld [vmem:[%s10342_s1 + $0x90] sm:$0xff]  ;;  %v1426_v2 = vld [vmem:[%s10342_s1 + $0x88] sm:$0xff] }
  0x23   : > { %v1429_v3 = vld [vmem:[%s10342_s1 + $0xa0] sm:$0xff]  ;;  %v1428_v4 = vld [vmem:[%s10342_s1 + $0x98] sm:$0xff]  ;;  %v1431_v5 = vld [vmem:[%s10342_s1 + $0xb0] sm:$0xff] }
  0x24   : > { %6760 = vmatmul.mubr.msk.f32.gmra.mrb[8].mxu1 %vm411_vm2, %v364_v7  ;;  %v1430_v6 = vld [vmem:[%s10342_s1 + $0xa8] sm:$0xff]  ;;  %v1433_v7 = vld [vmem:[%s10342_s1 + $0xc0] sm:$0xff]  ;;  %v1448_v49 = vld [vmem:[%s10342_s1 + $0x138] sm:$0xff] }
  0x25   : > { %6762 = vmatprep.mubr.msk.f32.mxu1 %vm7919_vm1, %v7918_v1  ;;  %v1446_v42 = vld [vmem:[%s10342_s1 + $0x128] sm:$0xff] }
  0x26   : > { %1502 = vperm.xlu0 %7870, %v1419_v56   ;;  %1507 = vperm.xlu1 %7871, %v1420_v59  }
  0x28   : > { %6763 = vmatmul.mubr.msk.f32.gmra.mrb[10].mxu1 %vm411_vm2, %v365_v8  ;;  %v1432_v8 = vld [vmem:[%s10342_s1 + $0xb8] sm:$0xff] }
  0x29   : > { %6765 = vmatprep.mubr.msk.f32.mxu1 %vm7919_vm1, %v7918_v1 }
  0x2a   : > { %1512 = vperm.xlu0 %7870, %v1421_v58   ;;  %1517 = vperm.xlu1 %7871, %v1422_v61  }
  0x2c   : > { %6766 = vmatmul.mubr.msk.f32.gmra.mrb[12].mxu1 %vm411_vm2, %v366_v9  ;;  %v1435_v9 = vld [vmem:[%s10342_s1 + $0xd0] sm:$0xff] }
  0x2d   : > { %6768 = vmatprep.mubr.msk.f32.mxu1 %vm7919_vm1, %v7918_v1 }
  0x2e   : > { %1522 = vperm.xlu0 %7870, %v1423_v60   ;;  %1527 = vperm.xlu1 %7871, %v1424_v63  }
  0x30   : > { %6769 = vmatmul.mubr.msk.f32.gmra.mrb[14].mxu1 %vm411_vm2, %v367_v10  ;;  %v1434_v10 = vld [vmem:[%s10342_s1 + $0xc8] sm:$0xff] }
  0x31   : > { %6771 = vmatprep.mubr.msk.f32.mxu1 %vm7919_vm1, %v7918_v1 }
  0x32   : > { %1532 = vperm.xlu0 %7870, %v1425_v62   ;;  %1537 = vperm.xlu1 %7871, %v1426_v2  }
  0x34   : > { %6772 = vmatmul.mubr.msk.f32.gmra.mrb[16].mxu1 %vm411_vm2, %v368_v11  ;;  %v1437_v11 = vld [vmem:[%s10342_s1 + $0xe0] sm:$0xff] }
  0x35   : > { %6774 = vmatprep.mubr.msk.f32.mxu1 %vm7919_vm1, %v7918_v1 }
  0x36   : > { %1542 = vperm.xlu0 %7870, %v1427_v0   ;;  %1547 = vperm.xlu1 %7871, %v1428_v4  }
  0x38   : > { %6775 = vmatmul.mubr.msk.f32.gmra.mrb[18].mxu1 %vm411_vm2, %v369_v12  ;;  %v1436_v12 = vld [vmem:[%s10342_s1 + $0xd8] sm:$0xff] }
  0x39   : > { %6777 = vmatprep.mubr.msk.f32.mxu1 %vm7919_vm1, %v7918_v1 }
  0x3a   : > { %1552 = vperm.xlu0 %7870, %v1429_v3   ;;  %1557 = vperm.xlu1 %7871, %v1430_v6  }
  0x3c   : > { %6778 = vmatmul.mubr.msk.f32.gmra.mrb[20].mxu1 %vm411_vm2, %v370_v13  ;;  %v1439_v13 = vld [vmem:[%s10342_s1 + $0xf0] sm:$0xff] }
  0x3d   : > { %6780 = vmatprep.mubr.msk.f32.mxu1 %vm7919_vm1, %v7918_v1 }
  0x3e   : > { %1562 = vperm.xlu0 %7870, %v1431_v5   ;;  %1567 = vperm.xlu1 %7871, %v1432_v8  }
  0x40   : > { %6781 = vmatmul.mubr.msk.f32.gmra.mrb[22].mxu1 %vm411_vm2, %v371_v14  ;;  %v8268_v14 = vld [vmem:[%s10344_s3] ss:$0 sm:$0xff] }
  0x41   : > { %6783 = vmatprep.mubr.msk.f32.mxu1 %vm7919_vm1, %v7918_v1 }
  0x42   : > { %1572 = vperm.xlu0 %7870, %v1433_v7   ;;  %1577 = vperm.xlu1 %7871, %v1434_v10  }
  0x44   : > { %6784 = vmatmul.mubr.msk.f32.gmra.mrb[24].mxu1 %vm411_vm2, %v372_v15  ;;  %v1438_v15 = vld [vmem:[%s10342_s1 + $0xe8] sm:$0xff] }
  0x45   : > { %6786 = vmatprep.mubr.msk.f32.mxu1 %vm7919_vm1, %v7918_v1 }
  0x46   : > { %1582 = vperm.xlu0 %7870, %v1435_v9   ;;  %1587 = vperm.xlu1 %7871, %v1436_v12  }
  0x48   : > { %6787 = vmatmul.mubr.msk.f32.gmra.mrb[26].mxu1 %vm411_vm2, %v373_v16  ;;  %v1441_v16 = vld [vmem:[%s10342_s1 + $0x100] sm:$0xff] }
  0x49   : > { %6789 = vmatprep.mubr.msk.f32.mxu1 %vm7919_vm1, %v7918_v1 }
  0x4a   : > { %1592 = vperm.xlu0 %7870, %v1437_v11   ;;  %1597 = vperm.xlu1 %7871, %v1438_v15  }
  0x4c   : > { %6790 = vmatmul.mubr.msk.f32.gmra.mrb[28].mxu1 %vm411_vm2, %v374_v17 }
  0x4d   : > { %6792 = vmatprep.mubr.msk.f32.mxu1 %vm7919_vm1, %v7918_v1 }
  0x4e   : > { %1602 = vperm.xlu0 %7870, %v1439_v13  }
  0x50   : > { %6793 = vmatmul.mubr.msk.f32.gmra.mrb[30].mxu1 %vm411_vm2, %v375_v18 }
  0x51   : > { %6795 = vmatprep.mubr.msk.f32.mxu1 %vm7919_vm1, %v7918_v1 }
  0x52   : > { %1612 = vperm.xlu0 %7870, %v1441_v16  }
  0x54   : > { %6796 = vmatmul.mubr.msk.f32.gmra.mrb[32].mxu1 %vm411_vm2, %v376_v19 }
  0x55   : > { %6798 = vmatprep.mubr.msk.f32.mxu1 %vm7919_vm1, %v7918_v1 }
  0x58   : > { %6799 = vmatmul.mubr.msk.f32.gmra.mrb[34].mxu1 %vm411_vm2, %v377_v20 }
  0x59   : > { %6801 = vmatprep.mubr.msk.f32.mxu1 %vm7919_vm1, %v7918_v1 }
  0x5c   : > { %6802 = vmatmul.mubr.msk.f32.gmra.mrb[36].mxu1 %vm411_vm2, %v378_v21  ;;  %v1440_v21 = vld [vmem:[%s10342_s1 + $0xf8] sm:$0xff] }
  0x5d   : > { %6804 = vmatprep.mubr.msk.f32.mxu1 %vm7919_vm1, %v7918_v1  ;;  %1607 = vperm.xlu1 %7871, %v1440_v21  }
  0x60   : > { %6805 = vmatmul.mubr.msk.f32.gmra.mrb[38].mxu1 %vm411_vm2, %v379_v22  ;;  %v1443_v22 = vld [vmem:[%s10342_s1 + $0x110] sm:$0xff] }
  0x61   : > { %6807 = vmatprep.mubr.msk.f32.mxu1 %vm7919_vm1, %v7918_v1  ;;  %1622 = vperm.xlu0 %7870, %v1443_v22  }
  0x64   : > { %6808 = vmatmul.mubr.msk.f32.gmra.mrb[40].mxu1 %vm411_vm2, %v380_v23 }
  0x65   : > { %6810 = vmatprep.mubr.msk.f32.mxu1 %vm7919_vm1, %v7918_v1 }
  0x68   : > { %6811 = vmatmul.mubr.msk.f32.gmra.mrb[42].mxu1 %vm411_vm2, %v381_v24 }
  0x69   : > { %6813 = vmatprep.mubr.msk.f32.mxu1 %vm7919_vm1, %v7918_v1 }
  0x6c   : > { %6814 = vmatmul.mubr.msk.f32.gmra.mrb[44].mxu1 %vm411_vm2, %v382_v25 }
  0x6d   : > { %6816 = vmatprep.mubr.msk.f32.mxu1 %vm7919_vm1, %v7918_v1 }
  0x70   : > { %6817 = vmatmul.mubr.msk.f32.gmra.mrb[46].mxu1 %vm411_vm2, %v383_v26 }
  0x71   : > { %6819 = vmatprep.mubr.msk.f32.mxu1 %vm7919_vm1, %v7918_v1 }
  0x74   : > { %6820 = vmatmul.mubr.msk.f32.gmra.mrb[48].mxu1 %vm411_vm2, %v384_v27 }
  0x75   : > { %6822 = vmatprep.mubr.msk.f32.mxu1 %vm7919_vm1, %v7918_v1 }
  0x78   : > { %6823 = vmatmul.mubr.msk.f32.gmra.mrb[50].mxu1 %vm411_vm2, %v385_v28  ;;  %v1442_v28 = vld [vmem:[%s10342_s1 + $0x108] sm:$0xff] }
  0x79   : > { %6825 = vmatprep.mubr.msk.f32.mxu1 %vm7919_vm1, %v7918_v1  ;;  %1617 = vperm.xlu1 %7871, %v1442_v28  }
  0x7c   : > { %6826 = vmatmul.mubr.msk.f32.gmra.mrb[52].mxu1 %vm411_vm2, %v386_v29  ;;  %v1445_v29 = vld [vmem:[%s10342_s1 + $0x120] sm:$0xff] }
  0x7d   : > { %6828 = vmatprep.mubr.msk.f32.mxu1 %vm7919_vm1, %v7918_v1  ;;  %1632 = vperm.xlu0 %7870, %v1445_v29  }
  0x80   : > { %6829 = vmatmul.mubr.msk.f32.gmra.mrb[54].mxu1 %vm411_vm2, %v387_v30 }
  0x81   : > { %6831 = vmatprep.mubr.msk.f32.mxu1 %vm7919_vm1, %v7918_v1 }
  0x84   : > { %6832 = vmatmul.mubr.msk.f32.gmra.mrb[56].mxu1 %vm411_vm2, %v388_v31 }
  0x85   : > { %6834 = vmatprep.mubr.msk.f32.mxu1 %vm7919_vm1, %v7918_v1 }
  0x88   : > { %6835 = vmatmul.mubr.msk.f32.gmra.mrb[58].mxu1 %vm411_vm2, %v389_v32 }
  0x89   : > { %6837 = vmatprep.mubr.msk.f32.mxu1 %vm7919_vm1, %v7918_v1 }
  0x8c   : > { %6838 = vmatmul.mubr.msk.f32.gmra.mrb[60].mxu1 %vm411_vm2, %v390_v33 }
  0x8d   : > { %6840 = vmatprep.mubr.msk.f32.mxu1 %vm7919_vm1, %v7918_v1 }
  0x90   : > { %6841 = vmatmul.mubr.msk.f32.gmra.mrb[62].mxu1 %vm411_vm2, %v391_v34 }
  0x91   : > { %6843 = vmatprep.mubr.msk.f32.mxu1 %vm7919_vm1, %v7918_v1 }
  0x94   : > { %6844 = vmatmul.mubr.msk.f32.gmra.mrb[64].mxu1 %vm411_vm2, %v392_v35  ;;  %v1444_v35 = vld [vmem:[%s10342_s1 + $0x118] sm:$0xff] }
  0x95   : > { %6846 = vmatprep.mubr.msk.f32.mxu1 %vm7919_vm1, %v7918_v1  ;;  %1627 = vperm.xlu1 %7871, %v1444_v35  }
  0x98   : > { %6847 = vmatmul.mubr.msk.f32.gmra.mrb[66].mxu1 %vm411_vm2, %v393_v36  ;;  %v1447_v36 = vld [vmem:[%s10342_s1 + $0x130] sm:$0xff] }
  0x99   : > { %6849 = vmatprep.mubr.msk.f32.mxu1 %vm7919_vm1, %v7918_v1  ;;  %1642 = vperm.xlu0 %7870, %v1447_v36  }
  0x9a   : > { %1637 = vperm.xlu1 %7871, %v1446_v42  }
  0x9c   : > { %6850 = vmatmul.mubr.msk.f32.gmra.mrb[68].mxu1 %vm411_vm2, %v394_v37 }
  0x9d   : > { %6852 = vmatprep.mubr.msk.f32.mxu1 %vm7919_vm1, %v7918_v1 }
  0x9e   : > { %1647 = vperm.xlu1 %7871, %v1448_v49  }
  0xa0   : > { %6853 = vmatmul.mubr.msk.f32.gmra.mrb[70].mxu1 %vm411_vm2, %v395_v38 }
  0xa1   : > { %6855 = vmatprep.mubr.msk.f32.mxu1 %vm7919_vm1, %v7918_v1 }
  0xa4   : > { %6856 = vmatmul.mubr.msk.f32.gmra.mrb[72].mxu1 %vm411_vm2, %v396_v39 }
  0xa5   : > { %6858 = vmatprep.mubr.msk.f32.mxu1 %vm7919_vm1, %v7918_v1 }
  0xa8   : > { %6859 = vmatmul.mubr.msk.f32.gmra.mrb[74].mxu1 %vm411_vm2, %v397_v40 }
  0xa9   : > { %6861 = vmatprep.mubr.msk.f32.mxu1 %vm7919_vm1, %v7918_v1 }
  0xac   : > { %6862 = vmatmul.mubr.msk.f32.gmra.mrb[76].mxu1 %vm411_vm2, %v398_v43  ;;  %v1449_v43 = vld [vmem:[%s10342_s1 + $0x140] sm:$0xff] }
  0xad   : > { %6864 = vmatprep.mubr.msk.f32.mxu1 %vm7919_vm1, %v7918_v1  ;;  %1652 = vperm.xlu0 %7870, %v1449_v43  }
  0xb0   : > { %6865 = vmatmul.mubr.msk.f32.gmra.mrb[78].mxu1 %vm411_vm2, %v399_v45 }
  0xb1   : > { %6867 = vmatprep.mubr.msk.f32.mxu1 %vm7919_vm1, %v7918_v1 }
  0xb4   : > { %6868 = vmatmul.mubr.msk.f32.gmra.mrb[80].mxu1 %vm411_vm2, %v400_v48 }
  0xb5   : > { %6870 = vmatprep.mubr.msk.f32.mxu1 %vm7919_vm1, %v7918_v1 }
  0xb8   : > { %6871 = vmatmul.mubr.msk.f32.gmra.mrb[82].mxu1 %vm411_vm2, %v401_v51 }
  0xb9   : > { %6873 = vmatprep.mubr.msk.f32.mxu1 %vm7919_vm1, %v7918_v1 }
  0xbc   : > { %6874 = vmatmul.mubr.msk.f32.gmra.mrb[84].mxu1 %vm411_vm2, %v402_v54 }
  0xbd   : > { %6878 = vmatprep.mubr.msk.f32.mxu1 %vm7919_vm1, %v7918_v1 }
  0xe7   : > { %v611_v17 = vpop.f32.mrb[0].mxu1 }
  0xe8   : > { %v612_v18 = vadd.f32 %v8268_v14, %v611_v17  ;;  %v6749_v19 = vpop.f32.mrb[1].mxu1 }
  0xea   : > { %v825_v20 = vmul.f32 0.2, %v612_v18 }
  0xeb   : > { %v616_v23 = vpop.f32.mrb[2].mxu1 }
  0xec   : > { %v868_v24 = vmax.f32 %v612_v18, %v825_v20  ;;  %v617_v25 = vadd.f32 %v8268_v14, %v616_v23  ;;  %v6752_v26 = vpop.f32.mrb[3].mxu1 }
  0xee   : > { %v826_v27 = vmul.f32 0.2, %v617_v25  ;;  %6879 = vmatmul.mubr.msk.f32.vlgmr.msra.gmra.mrb[86].mxu1 %vm919_vm3, %v868_v24 }
  0xef   : > { %v621_v30 = vpop.f32.mrb[4].mxu1  ;;  %6881 = vmatprep.mubr.msk.f32.mxu1 %vm7919_vm1, %v7918_v1 }
  0xf0   : > { %v869_v31 = vmax.f32 %v617_v25, %v826_v27  ;;  %v622_v32 = vadd.f32 %v8268_v14, %v621_v30  ;;  %v6755_v33 = vpop.f32.mrb[5].mxu1 }
  0xf2   : > { %v827_v34 = vmul.f32 0.2, %v622_v32  ;;  %6882 = vmatmul.mubr.msk.f32.gmra.mrb[88].mxu1 %vm919_vm3, %v869_v31 }
  0xf3   : > { %v626_v37 = vpop.f32.mrb[6].mxu1  ;;  %6884 = vmatprep.mubr.msk.f32.mxu1 %vm7919_vm1, %v7918_v1 }
  0xf4   : > { %v870_v38 = vmax.f32 %v622_v32, %v827_v34  ;;  %v627_v39 = vadd.f32 %v8268_v14, %v626_v37  ;;  %v6758_v40 = vpop.f32.mrb[7].mxu1 }
  0xf6   : > { %v828_v41 = vmul.f32 0.2, %v627_v39  ;;  %6885 = vmatmul.mubr.msk.f32.gmra.mrb[90].mxu1 %vm919_vm3, %v870_v38 }
  0xf7   : > { %v631_v44 = vpop.f32.mrb[8].mxu1  ;;  %6887 = vmatprep.mubr.msk.f32.mxu1 %vm7919_vm1, %v7918_v1 }
  0xf8   : > { %v871_v45 = vmax.f32 %v627_v39, %v828_v41  ;;  %v632_v46 = vadd.f32 %v8268_v14, %v631_v44  ;;  %v6761_v47 = vpop.f32.mrb[9].mxu1 }
  0xfa   : > { %v829_v48 = vmul.f32 0.2, %v632_v46  ;;  %6888 = vmatmul.mubr.msk.f32.gmra.mrb[92].mxu1 %vm919_vm3, %v871_v45 }
  0xfb   : > { %v636_v50 = vpop.f32.mrb[10].mxu1  ;;  %6890 = vmatprep.mubr.msk.f32.mxu1 %vm7919_vm1, %v7918_v1 }
  0xfc   : > { %v872_v51 = vmax.f32 %v632_v46, %v829_v48  ;;  %v637_v52 = vadd.f32 %v8268_v14, %v636_v50  ;;  %v6764_v53 = vpop.f32.mrb[11].mxu1 }
  0xfe   : > { %v830_v54 = vmul.f32 0.2, %v637_v52  ;;  %6891 = vmatmul.mubr.msk.f32.gmra.mrb[94].mxu1 %vm919_vm3, %v872_v51 }
  0xff   : > { %v641_v55 = vpop.f32.mrb[12].mxu1  ;;  %6893 = vmatprep.mubr.msk.f32.mxu1 %vm7919_vm1, %v7918_v1 }
 0x100   : > { %v873_v56 = vmax.f32 %v637_v52, %v830_v54  ;;  %v642_v57 = vadd.f32 %v8268_v14, %v641_v55  ;;  %v6767_v58 = vpop.f32.mrb[13].mxu1 }
 0x102   : > { %v831_v59 = vmul.f32 0.2, %v642_v57  ;;  %6894 = vmatmul.mubr.msk.f32.gmra.mrb[96].mxu1 %vm919_vm3, %v873_v56 }
 0x103   : > { %v646_v60 = vpop.f32.mrb[14].mxu1  ;;  %6896 = vmatprep.mubr.msk.f32.mxu1 %vm7919_vm1, %v7918_v1 }
 0x104   : > { %v874_v61 = vmax.f32 %v642_v57, %v831_v59  ;;  %v647_v62 = vadd.f32 %v8268_v14, %v646_v60  ;;  %v6770_v63 = vpop.f32.mrb[15].mxu1 }
 0x106   : > { %v832_v0 = vmul.f32 0.2, %v647_v62  ;;  %6897 = vmatmul.mubr.msk.f32.gmra.mrb[98].mxu1 %vm919_vm3, %v874_v61 }
 0x107   : > { %v651_v2 = vpop.f32.mrb[16].mxu1  ;;  %6899 = vmatprep.mubr.msk.f32.mxu1 %vm7919_vm1, %v7918_v1 }
 0x108   : > { %v875_v3 = vmax.f32 %v647_v62, %v832_v0  ;;  %v652_v4 = vadd.f32 %v8268_v14, %v651_v2  ;;  %v6773_v5 = vpop.f32.mrb[17].mxu1 }
 0x10a   : > { %v833_v6 = vmul.f32 0.2, %v652_v4  ;;  %6900 = vmatmul.mubr.msk.f32.gmra.mrb[100].mxu1 %vm919_vm3, %v875_v3 }
 0x10b   : > { %v656_v7 = vpop.f32.mrb[18].mxu1  ;;  %6902 = vmatprep.mubr.msk.f32.mxu1 %vm7919_vm1, %v7918_v1 }
 0x10c   : > { %v876_v8 = vmax.f32 %v652_v4, %v833_v6  ;;  %v657_v9 = vadd.f32 %v8268_v14, %v656_v7  ;;  %v6776_v10 = vpop.f32.mrb[19].mxu1 }
 0x10e   : > { %v834_v11 = vmul.f32 0.2, %v657_v9  ;;  %6903 = vmatmul.mubr.msk.f32.gmra.mrb[102].mxu1 %vm919_vm3, %v876_v8 }
 0x10f   : > { %v661_v12 = vpop.f32.mrb[20].mxu1  ;;  %6905 = vmatprep.mubr.msk.f32.mxu1 %vm7919_vm1, %v7918_v1 }
 0x110   : > { %v877_v13 = vmax.f32 %v657_v9, %v834_v11  ;;  %v662_v15 = vadd.f32 %v8268_v14, %v661_v12  ;;  %v6779_v16 = vpop.f32.mrb[21].mxu1 }
 0x112   : > { %v835_v17 = vmul.f32 0.2, %v662_v15  ;;  %6906 = vmatmul.mubr.msk.f32.gmra.mrb[104].mxu1 %vm919_vm3, %v877_v13 }
 0x113   : > { %v666_v18 = vpop.f32.mrb[22].mxu1  ;;  %6908 = vmatprep.mubr.msk.f32.mxu1 %vm7919_vm1, %v7918_v1 }
 0x114   : > { %v878_v19 = vmax.f32 %v662_v15, %v835_v17  ;;  %v667_v20 = vadd.f32 %v8268_v14, %v666_v18  ;;  %v6782_v21 = vpop.f32.mrb[23].mxu1 }
 0x116   : > { %v836_v22 = vmul.f32 0.2, %v667_v20  ;;  %6909 = vmatmul.mubr.msk.f32.gmra.mrb[106].mxu1 %vm919_vm3, %v878_v19 }
 0x117   : > { %v671_v23 = vpop.f32.mrb[24].mxu1  ;;  %6911 = vmatprep.mubr.msk.f32.mxu1 %vm7919_vm1, %v7918_v1 }
 0x118   : > { %v879_v24 = vmax.f32 %v667_v20, %v836_v22  ;;  %v672_v25 = vadd.f32 %v8268_v14, %v671_v23  ;;  %v6785_v26 = vpop.f32.mrb[25].mxu1 }
 0x11a   : > { %v837_v27 = vmul.f32 0.2, %v672_v25  ;;  %6912 = vmatmul.mubr.msk.f32.gmra.mrb[108].mxu1 %vm919_vm3, %v879_v24 }
 0x11b   : > { %v676_v28 = vpop.f32.mrb[26].mxu1  ;;  %6914 = vmatprep.mubr.msk.f32.mxu1 %vm7919_vm1, %v7918_v1 }
 0x11c   : > { %v880_v29 = vmax.f32 %v672_v25, %v837_v27  ;;  %v677_v30 = vadd.f32 %v8268_v14, %v676_v28  ;;  %v6788_v31 = vpop.f32.mrb[27].mxu1  ;;  %v8403_v27 = vld [vmem:[%s10347_s6] sm:$0xff] }
 0x11d   : > { %7063 = vmatprep.subr.mxu0 %v8403_v27 }
 0x11e   : > { %v838_v32 = vmul.f32 0.2, %v677_v30  ;;  %6915 = vmatmul.mubr.msk.f32.gmra.mrb[110].mxu1 %vm919_vm3, %v880_v29  ;;  %7064 = vmatpush3.msra.mxu0 %v8403_v27 }
 0x11f   : > { %v681_v33 = vpop.f32.mrb[28].mxu1  ;;  %6917 = vmatprep.mubr.msk.f32.mxu1 %vm7919_vm1, %v7918_v1 }
 0x120   : > { %v881_v34 = vmax.f32 %v677_v30, %v838_v32  ;;  %v682_v35 = vadd.f32 %v8268_v14, %v681_v33  ;;  %v6791_v36 = vpop.f32.mrb[29].mxu1 }
 0x122   : > { %v839_v37 = vmul.f32 0.2, %v682_v35  ;;  %6918 = vmatmul.mubr.msk.f32.gmra.mrb[112].mxu1 %vm919_vm3, %v881_v34 }
 0x123   : > { %v686_v38 = vpop.f32.mrb[30].mxu1  ;;  %6920 = vmatprep.mubr.msk.f32.mxu1 %vm7919_vm1, %v7918_v1 }
 0x124   : > { %v882_v39 = vmax.f32 %v682_v35, %v839_v37  ;;  %v687_v40 = vadd.f32 %v8268_v14, %v686_v38  ;;  %v6794_v41 = vpop.f32.mrb[31].mxu1  ;;  %v5914_v37 = vld [vmem:[%s10347_s6 + $0x8] sm:$0xff] }
 0x125   : > { %7007 = vmatprep.subr.mxu1 %v5914_v37 }
 0x126   : > { %v840_v42 = vmul.f32 0.2, %v687_v40  ;;  %6921 = vmatmul.mubr.msk.f32.gmra.mrb[114].mxu1 %vm919_vm3, %v882_v39 }
 0x127   : > { %v691_v43 = vpop.f32.mrb[32].mxu1  ;;  %6923 = vmatprep.mubr.msk.f32.mxu1 %vm7919_vm1, %v7918_v1  ;;  %7008 = vmatpush3.msra.mxu1 %v5914_v37 }
 0x128   : > { %v883_v44 = vmax.f32 %v687_v40, %v840_v42  ;;  %v692_v45 = vadd.f32 %v8268_v14, %v691_v43  ;;  %v6797_v46 = vpop.f32.mrb[33].mxu1  ;;  %7567 = vmatprep.subr.mxu1 %v8403_v27 }
 0x12a   : > { %v841_v47 = vmul.f32 0.2, %v692_v45  ;;  %6924 = vmatmul.mubr.msk.f32.gmra.mrb[116].mxu1 %vm919_vm3, %v883_v44 }
 0x12b   : > { %v696_v48 = vpop.f32.mrb[34].mxu1  ;;  %6926 = vmatprep.mubr.msk.f32.mxu1 %vm7919_vm1, %v7918_v1 }
 0x12c   : > { %v884_v49 = vmax.f32 %v692_v45, %v841_v47  ;;  %v697_v50 = vadd.f32 %v8268_v14, %v696_v48  ;;  %v6800_v51 = vpop.f32.mrb[35].mxu1 }
 0x12e   : > { %v842_v52 = vmul.f32 0.2, %v697_v50  ;;  %6927 = vmatmul.mubr.msk.f32.gmra.mrb[118].mxu1 %vm919_vm3, %v884_v49 }
 0x12f   : > { %v701_v53 = vpop.f32.mrb[36].mxu1  ;;  %6929 = vmatprep.mubr.msk.f32.mxu1 %vm7919_vm1, %v7918_v1 }
 0x130   : > { %v885_v54 = vmax.f32 %v697_v50, %v842_v52  ;;  %v702_v55 = vadd.f32 %v8268_v14, %v701_v53  ;;  %v6803_v56 = vpop.f32.mrb[37].mxu1 }
 0x132   : > { %v843_v57 = vmul.f32 0.2, %v702_v55  ;;  %6930 = vmatmul.mubr.msk.f32.gmra.mrb[120].mxu1 %vm919_vm3, %v885_v54 }
 0x133   : > { %v706_v58 = vpop.f32.mrb[38].mxu1  ;;  %6932 = vmatprep.mubr.msk.f32.mxu1 %vm7919_vm1, %v7918_v1 }
 0x134   : > { %v886_v59 = vmax.f32 %v702_v55, %v843_v57  ;;  %v707_v60 = vadd.f32 %v8268_v14, %v706_v58  ;;  %v6806_v61 = vpop.f32.mrb[39].mxu1 }
 0x136   : > { %v844_v62 = vmul.f32 0.2, %v707_v60  ;;  %6933 = vmatmul.mubr.msk.f32.gmra.mrb[122].mxu1 %vm919_vm3, %v886_v59 }
 0x137   : > { %v711_v63 = vpop.f32.mrb[40].mxu1  ;;  %6935 = vmatprep.mubr.msk.f32.mxu1 %vm7919_vm1, %v7918_v1 }
 0x138   : > { %v887_v0 = vmax.f32 %v707_v60, %v844_v62  ;;  %v712_v2 = vadd.f32 %v8268_v14, %v711_v63  ;;  %v6809_v3 = vpop.f32.mrb[41].mxu1 }
 0x13a   : > { %v845_v4 = vmul.f32 0.2, %v712_v2  ;;  %6936 = vmatmul.mubr.msk.f32.gmra.mrb[124].mxu1 %vm919_vm3, %v887_v0 }
 0x13b   : > { %v716_v5 = vpop.f32.mrb[42].mxu1  ;;  %6938 = vmatprep.mubr.msk.f32.mxu1 %vm7919_vm1, %v7918_v1 }
 0x13c   : > { %v888_v6 = vmax.f32 %v712_v2, %v845_v4  ;;  %v717_v7 = vadd.f32 %v8268_v14, %v716_v5  ;;  %v6812_v8 = vpop.f32.mrb[43].mxu1 }
 0x13e   : > { %v846_v9 = vmul.f32 0.2, %v717_v7  ;;  %6939 = vmatmul.mubr.msk.f32.gmra.mrb[126].mxu1 %vm919_vm3, %v888_v6 }
 0x13f   : > { %v721_v10 = vpop.f32.mrb[44].mxu1  ;;  %6941 = vmatprep.mubr.msk.f32.mxu1 %vm7919_vm1, %v7918_v1 }
 0x140   : > { %v889_v11 = vmax.f32 %v717_v7, %v846_v9  ;;  %v722_v12 = vadd.f32 %v8268_v14, %v721_v10  ;;  %v6815_v13 = vpop.f32.mrb[45].mxu1 }
 0x142   : > { %v847_v15 = vmul.f32 0.2, %v722_v12  ;;  %6942 = vmatmul.mubr.msk.f32.gmra.mrb[128].mxu1 %vm919_vm3, %v889_v11 }
 0x143   : > { %v726_v16 = vpop.f32.mrb[46].mxu1  ;;  %6944 = vmatprep.mubr.msk.f32.mxu1 %vm7919_vm1, %v7918_v1 }
 0x144   : > { %v890_v17 = vmax.f32 %v722_v12, %v847_v15  ;;  %v727_v18 = vadd.f32 %v8268_v14, %v726_v16  ;;  %v6818_v19 = vpop.f32.mrb[47].mxu1 }
 0x146   : > { %v848_v20 = vmul.f32 0.2, %v727_v18  ;;  %6945 = vmatmul.mubr.msk.f32.gmra.mrb[130].mxu1 %vm919_vm3, %v890_v17 }
 0x147   : > { %v731_v21 = vpop.f32.mrb[48].mxu1  ;;  %6947 = vmatprep.mubr.msk.f32.mxu1 %vm7919_vm1, %v7918_v1 }
 0x148   : > { %v891_v22 = vmax.f32 %v727_v18, %v848_v20  ;;  %v732_v23 = vadd.f32 %v8268_v14, %v731_v21  ;;  %v6821_v24 = vpop.f32.mrb[49].mxu1 }
 0x14a   : > { %v849_v25 = vmul.f32 0.2, %v732_v23  ;;  %6948 = vmatmul.mubr.msk.f32.gmra.mrb[132].mxu1 %vm919_vm3, %v891_v22 }
 0x14b   : > { %v736_v26 = vpop.f32.mrb[50].mxu1  ;;  %6950 = vmatprep.mubr.msk.f32.mxu1 %vm7919_vm1, %v7918_v1 }
 0x14c   : > { %v892_v28 = vmax.f32 %v732_v23, %v849_v25  ;;  %v737_v29 = vadd.f32 %v8268_v14, %v736_v26  ;;  %v6824_v30 = vpop.f32.mrb[51].mxu1 }
 0x14e   : > { %v850_v31 = vmul.f32 0.2, %v737_v29  ;;  %6951 = vmatmul.mubr.msk.f32.gmra.mrb[134].mxu1 %vm919_vm3, %v892_v28 }
 0x14f   : > { %v741_v32 = vpop.f32.mrb[52].mxu1  ;;  %6953 = vmatprep.mubr.msk.f32.mxu1 %vm7919_vm1, %v7918_v1 }
 0x150   : > { %v893_v33 = vmax.f32 %v737_v29, %v850_v31  ;;  %v742_v34 = vadd.f32 %v8268_v14, %v741_v32  ;;  %v6827_v35 = vpop.f32.mrb[53].mxu1 }
 0x152   : > { %v851_v36 = vmul.f32 0.2, %v742_v34  ;;  %6954 = vmatmul.mubr.msk.f32.gmra.mrb[136].mxu1 %vm919_vm3, %v893_v33  ;;  %v8466_v33 = vld [vmem:[%s10347_s6 + $0x10] sm:$0xff] }
 0x153   : > { %v746_v38 = vpop.f32.mrb[54].mxu1  ;;  %6956 = vmatprep.mubr.msk.f32.mxu1 %vm7919_vm1, %v7918_v1  ;;  %7119 = vmatprep.subr.mxu0 %v8466_v33 }
 0x154   : > { %v894_v39 = vmax.f32 %v742_v34, %v851_v36  ;;  %v747_v40 = vadd.f32 %v8268_v14, %v746_v38  ;;  %v6830_v41 = vpop.f32.mrb[55].mxu1 }
 0x156   : > { %v852_v42 = vmul.f32 0.2, %v747_v40  ;;  %6957 = vmatmul.mubr.msk.f32.gmra.mrb[138].mxu1 %vm919_vm3, %v894_v39 }
 0x157   : > { %v751_v43 = vpop.f32.mrb[56].mxu1  ;;  %6959 = vmatprep.mubr.msk.f32.mxu1 %vm7919_vm1, %v7918_v1 }
 0x158   : > { %v895_v44 = vmax.f32 %v747_v40, %v852_v42  ;;  %v752_v45 = vadd.f32 %v8268_v14, %v751_v43  ;;  %v6833_v46 = vpop.f32.mrb[57].mxu1 }
 0x15a   : > { %v853_v47 = vmul.f32 0.2, %v752_v45  ;;  %6960 = vmatmul.mubr.msk.f32.gmra.mrb[140].mxu1 %vm919_vm3, %v895_v44 }
 0x15b   : > { %v756_v48 = vpop.f32.mrb[58].mxu1  ;;  %6962 = vmatprep.mubr.msk.f32.mxu1 %vm7919_vm1, %v7918_v1 }
 0x15c   : > { %v896_v49 = vmax.f32 %v752_v45, %v853_v47  ;;  %v757_v50 = vadd.f32 %v8268_v14, %v756_v48  ;;  %v6836_v51 = vpop.f32.mrb[59].mxu1 }
 0x15e   : > { %v854_v52 = vmul.f32 0.2, %v757_v50  ;;  %6963 = vmatmul.mubr.msk.f32.gmra.mrb[142].mxu1 %vm919_vm3, %v896_v49 }
 0x15f   : > { %v761_v53 = vpop.f32.mrb[60].mxu1  ;;  %6965 = vmatprep.mubr.msk.f32.mxu1 %vm7919_vm1, %v7918_v1 }
 0x160   : > { %v897_v54 = vmax.f32 %v757_v50, %v854_v52  ;;  %v762_v55 = vadd.f32 %v8268_v14, %v761_v53  ;;  %v6839_v56 = vpop.f32.mrb[61].mxu1 }
 0x162   : > { %v855_v57 = vmul.f32 0.2, %v762_v55  ;;  %6966 = vmatmul.mubr.msk.f32.gmra.mrb[144].mxu1 %vm919_vm3, %v897_v54 }
 0x163   : > { %v766_v58 = vpop.f32.mrb[62].mxu1  ;;  %6968 = vmatprep.mubr.msk.f32.mxu1 %vm7919_vm1, %v7918_v1 }
 0x164   : > { %v898_v59 = vmax.f32 %v762_v55, %v855_v57  ;;  %v767_v60 = vadd.f32 %v8268_v14, %v766_v58  ;;  %v6842_v61 = vpop.f32.mrb[63].mxu1 }
 0x166   : > { %v856_v62 = vmul.f32 0.2, %v767_v60  ;;  %6969 = vmatmul.mubr.msk.f32.gmra.mrb[146].mxu1 %vm919_vm3, %v898_v59  ;;  %v8493_v59 = vld [vmem:[%s10346_s5] ss:$0 sm:$0xff] }
 0x167   : > { %v771_v63 = vpop.f32.mrb[64].mxu1  ;;  %6971 = vmatprep.mubr.msk.f32.mxu1 %vm7919_vm1, %v7918_v1 }
 0x168   : > { %v899_v0 = vmax.f32 %v767_v60, %v856_v62  ;;  %v772_v2 = vadd.f32 %v8268_v14, %v771_v63  ;;  %v6845_v3 = vpop.f32.mrb[65].mxu1  ;;  %v1453_v63 = vpop.permute.xlu0 %1452 }
 0x16a   : > { %v857_v4 = vmul.f32 0.2, %v772_v2  ;;  %6972 = vmatmul.mubr.msk.f32.gmra.mrb[148].mxu1 %vm919_vm3, %v899_v0 }
 0x16b   : > { %v776_v5 = vpop.f32.mrb[66].mxu1  ;;  %6974 = vmatprep.mubr.msk.f32.mxu1 %vm7919_vm1, %v7918_v1 }
 0x16c   : > { %v900_v6 = vmax.f32 %v772_v2, %v857_v4  ;;  %v777_v7 = vadd.f32 %v8268_v14, %v776_v5  ;;  %v6848_v8 = vpop.f32.mrb[67].mxu1 }
 0x16e   : > { %v858_v9 = vmul.f32 0.2, %v777_v7  ;;  %6975 = vmatmul.mubr.msk.f32.gmra.mrb[150].mxu1 %vm919_vm3, %v900_v6 }
 0x16f   : > { %v781_v10 = vpop.f32.mrb[68].mxu1  ;;  %6977 = vmatprep.mubr.msk.f32.mxu1 %vm7919_vm1, %v7918_v1 }
 0x170   : > { %v901_v11 = vmax.f32 %v777_v7, %v858_v9  ;;  %v782_v12 = vadd.f32 %v8268_v14, %v781_v10  ;;  %v6851_v13 = vpop.f32.mrb[69].mxu1  ;;  %v1458_v10 = vpop.permute.xlu0 %1457 }
 0x171   : > { %v1463_v13 = vpop.permute.xlu1 %1462 }
 0x172   : > { %v859_v15 = vmul.f32 0.2, %v782_v12  ;;  %6978 = vmatmul.mubr.msk.f32.gmra.mrb[152].mxu1 %vm919_vm3, %v901_v11 }
 0x173   : > { %v786_v16 = vpop.f32.mrb[70].mxu1  ;;  %6980 = vmatprep.mubr.msk.f32.mxu1 %vm7919_vm1, %v7918_v1 }
 0x174   : > { %v902_v17 = vmax.f32 %v782_v12, %v859_v15  ;;  %v787_v18 = vadd.f32 %v8268_v14, %v786_v16  ;;  %v6854_v19 = vpop.f32.mrb[71].mxu1 }
 0x176   : > { %v860_v20 = vmul.f32 0.2, %v787_v18  ;;  %6981 = vmatmul.mubr.msk.f32.gmra.mrb[154].mxu1 %vm919_vm3, %v902_v17 }
 0x177   : > { %v791_v21 = vpop.f32.mrb[72].mxu1  ;;  %6983 = vmatprep.mubr.msk.f32.mxu1 %vm7919_vm1, %v7918_v1 }
 0x178   : > { %v903_v22 = vmax.f32 %v787_v18, %v860_v20  ;;  %v792_v23 = vadd.f32 %v8268_v14, %v791_v21  ;;  %v6857_v24 = vpop.f32.mrb[73].mxu1  ;;  %v8502_v18 = vld [vmem:[%s10347_s6 + $0x18] sm:$0xff] }
 0x17a   : > { %v861_v25 = vmul.f32 0.2, %v792_v23  ;;  %6984 = vmatmul.mubr.msk.f32.gmra.mrb[156].mxu1 %vm919_vm3, %v903_v22 }
 0x17b   : > { %v796_v26 = vpop.f32.mrb[74].mxu1  ;;  %6986 = vmatprep.mubr.msk.f32.mxu1 %vm7919_vm1, %v7918_v1 }
 0x17c   : > { %v904_v28 = vmax.f32 %v792_v23, %v861_v25  ;;  %v797_v29 = vadd.f32 %v8268_v14, %v796_v26  ;;  %v6860_v30 = vpop.f32.mrb[75].mxu1 }
 0x17e   : > { %v862_v31 = vmul.f32 0.2, %v797_v29  ;;  %6987 = vmatmul.mubr.msk.f32.gmra.mrb[158].mxu1 %vm919_vm3, %v904_v28 }
 0x17f   : > { %v801_v32 = vpop.f32.mrb[76].mxu1  ;;  %6989 = vmatprep.mubr.msk.f32.mxu1 %vm7919_vm1, %v7918_v1 }
 0x180   : > { %v905_v34 = vmax.f32 %v797_v29, %v862_v31  ;;  %v802_v35 = vadd.f32 %v8268_v14, %v801_v32  ;;  %v6863_v36 = vpop.f32.mrb[77].mxu1 }
 0x182   : > { %v863_v37 = vmul.f32 0.2, %v802_v35  ;;  %6990 = vmatmul.mubr.msk.f32.gmra.mrb[160].mxu1 %vm919_vm3, %v905_v34 }
 0x183   : > { %v806_v38 = vpop.f32.mrb[78].mxu1  ;;  %6992 = vmatprep.mubr.msk.f32.mxu1 %vm7919_vm1, %v7918_v1 }
 0x184   : > { %v906_v39 = vmax.f32 %v802_v35, %v863_v37  ;;  %v807_v40 = vadd.f32 %v8268_v14, %v806_v38  ;;  %v6866_v41 = vpop.f32.mrb[79].mxu1  ;;  %v1468_v35 = vpop.permute.xlu1 %1467 }
 0x186   : > { %v864_v42 = vmul.f32 0.2, %v807_v40  ;;  %6993 = vmatmul.mubr.msk.f32.gmra.mrb[162].mxu1 %vm919_vm3, %v906_v39 }
 0x187   : > { %v811_v43 = vpop.f32.mrb[80].mxu1  ;;  %6995 = vmatprep.mubr.msk.f32.mxu1 %vm7919_vm1, %v7918_v1 }
 0x188   : > { %v907_v44 = vmax.f32 %v807_v40, %v864_v42  ;;  %v812_v45 = vadd.f32 %v8268_v14, %v811_v43  ;;  %v6869_v46 = vpop.f32.mrb[81].mxu1 }
 0x189   : > { %v1473_v46 = vpop.permute.xlu0 %1472 }
 0x18a   : > { %v865_v47 = vmul.f32 0.2, %v812_v45  ;;  %6996 = vmatmul.mubr.msk.f32.gmra.mrb[164].mxu1 %vm919_vm3, %v907_v44 }
 0x18b   : > { %6998 = vmatprep.mubr.msk.f32.mxu1 %vm7919_vm1, %v7918_v1  ;;  %v816_v48 = vpop.f32.mrb[82].mxu1 }
 0x18c   : > { %v908_v49 = vmax.f32 %v812_v45, %v865_v47  ;;  %v817_v50 = vadd.f32 %v8268_v14, %v816_v48  ;;  %v6872_v51 = vpop.f32.mrb[83].mxu1 }
 0x18e   : > { %6999 = vmatmul.mubr.msk.f32.gmra.mrb[166].mxu1 %vm919_vm3, %v908_v49  ;;  %v866_v52 = vmul.f32 0.2, %v817_v50 }
 0x18f   : > { %v821_v53 = vpop.f32.mrb[84].mxu1  ;;  %7001 = vmatprep.mubr.msk.f32.mxu1 %vm7919_vm1, %v7918_v1 }
 0x190   : > { %v909_v54 = vmax.f32 %v817_v50, %v866_v52  ;;  %v822_v55 = vadd.f32 %v8268_v14, %v821_v53  ;;  %v6875_v56 = vpop.f32.mrb[85].mxu1 }
 0x192   : > { %v867_v57 = vmul.f32 0.2, %v822_v55  ;;  %7002 = vmatmul.mubr.msk.f32.gmra.mrb[168].mxu1 %vm919_vm3, %v909_v54 }
 0x193   : > { %7004 = vmatprep.mubr.msk.f32.mxu1 %vm7919_vm1, %v7918_v1 }
 0x194   : > { %v910_v58 = vmax.f32 %v822_v55, %v867_v57 }
 0x196   : > { %7005 = vmatmul.mubr.msk.f32.gmra.mrb[170].mxu1 %vm919_vm3, %v910_v58 }
 0x1c1   : > { %v1115_v60 = vpop.f32.mrb[86].mxu1 }
 0x1c2   : > { %v1116_v61 = vadd.f32 %v8493_v59, %v1115_v60  ;;  %v6880_v62 = vpop.f32.mrb[87].mxu1 }
 0x1c4   : > { %v1327_v14 = vmul.f32 0.2, %v1116_v61 }
 0x1c5   : > { %v1120_v0 = vpop.f32.mrb[88].mxu1 }
 0x1c6   : > { %v1368_v2 = vmax.f32 %v1116_v61, %v1327_v14  ;;  %v1121_v3 = vadd.f32 %v8493_v59, %v1120_v0  ;;  %v6883_v4 = vpop.f32.mrb[89].mxu1  ;;  %v1478_v14 = vpop.permute.xlu1 %1477 }
 0x1c8   : > { %v1328_v1 = vmul.f32 0.2, %v1121_v3  ;;  %v1655_v5 = vmul.f32 %v1453_v63, %v1368_v2 }
 0x1c9   : > { %v1125_v6 = vpop.f32.mrb[90].mxu1 }
 0x1ca   : > { %v1369_v7 = vmax.f32 %v1121_v3, %v1328_v1  ;;  %v1126_v8 = vadd.f32 %v8493_v59, %v1125_v6  ;;  %v6886_v9 = vpop.f32.mrb[91].mxu1  ;;  %7065 = vmatprep.mubr.msk.f32.mxu0 %vm919_vm3, %v1655_v5  ;;  %v1737_v16 = vrot.slane %v1655_v5, 1  ;;  %v2447_v17 = vrot.slane %v1655_v5, 2 }
 0x1cc   : > { %v1656_v11 = vmul.f32 %v1458_v10, %v1369_v7  ;;  %v1329_v12 = vmul.f32 0.2, %v1126_v8 }
 0x1cd   : > { %v1130_v15 = vpop.f32.mrb[92].mxu1 }
 0x1ce   : > { %v1370_v19 = vmax.f32 %v1126_v8, %v1329_v12  ;;  %v1131_v20 = vadd.f32 %v8493_v59, %v1130_v15  ;;  %v6889_v21 = vpop.f32.mrb[93].mxu1  ;;  %7066 = vmatmul.mubr.msk.f32.vlgmr.msra.gmra.mrb[0].mxu0 %vm919_vm3, %v1656_v11  ;;  %v1738_v22 = vrot.slane %v1656_v11, 1  ;;  %v2448_v23 = vrot.slane %v1656_v11, 2 }
 0x1cf   : > { %7120 = vmatpush3.msra.mxu0 %v8466_v33 }
 0x1d0   : > { %v1657_v24 = vmul.f32 %v1463_v13, %v1370_v19  ;;  %v1330_v25 = vmul.f32 0.2, %v1131_v20  ;;  %v1739_v26 = vsel %vm1736_vm4, %v1737_v16, %v1738_v22  ;;  %v8509_v28 = vsel %vm2446_vm5, %v2447_v17, %v2448_v23  ;;  %7175 = vmatprep.subr.mxu0 %v8502_v18  ;;  %v1483_v16 = vpop.permute.xlu0 %1482 }
 0x1d1   : > { %v1135_v29 = vpop.f32.mrb[94].mxu1  ;;  %7009 = vmatprep.mubr.msk.f32.mxu1 %vm919_vm3, %v1739_v26 }
 0x1d2   : > { %v1371_v30 = vmax.f32 %v1131_v20, %v1330_v25  ;;  %v1136_v31 = vadd.f32 %v8493_v59, %v1135_v29  ;;  %v6892_v32 = vpop.f32.mrb[95].mxu1  ;;  %7068 = vmatprep.mubr.msk.f32.mxu0 %vm919_vm3, %v1657_v24  ;;  %v1740_v34 = vrot.slane %v1657_v24, 1  ;;  %v2450_v33 = vrot.slane %v1657_v24, 2 }
 0x1d3   : > { %v3169_v47 = vrot.slane %v1657_v24, 3  ;;  %v3597_v49 = vrot.slane %v1657_v24, 4 }
 0x1d4   : > { %v1658_v36 = vmul.f32 %v1468_v35, %v1371_v30  ;;  %v1331_v37 = vmul.f32 0.2, %v1136_v31  ;;  %v1741_v38 = vsel %vm1736_vm4, %v1738_v22, %v1740_v34  ;;  %v8517_v39 = vsel %vm2446_vm5, %v2448_v23, %v2450_v33 }
 0x1d5   : > { %v1140_v40 = vpop.f32.mrb[96].mxu1  ;;  %7010 = vmatmul.mubr.msk.f32.vlgmr.msra.gmra.mrb[172].mxu1 %vm919_vm3, %v1741_v38  ;;  %v1488_v38 = vpop.permute.xlu1 %1487 }
 0x1d6   : > { %v1372_v41 = vmax.f32 %v1136_v31, %v1331_v37  ;;  %v1141_v42 = vadd.f32 %v8493_v59, %v1140_v40  ;;  %v6895_v43 = vpop.f32.mrb[97].mxu1  ;;  %7069 = vmatmul.mubr.msk.f32.gmra.mrb[2].mxu0 %vm919_vm3, %v1658_v36  ;;  %v1742_v44 = vrot.slane %v1658_v36, 1  ;;  %v2452_v45 = vrot.slane %v1658_v36, 2  ;;  %7568 = vmatpush3.msra.mxu1 %v8403_v27 }
 0x1d7   : > { %v3170_v48 = vrot.slane %v1658_v36, 3  ;;  %v3598_v50 = vrot.slane %v1658_v36, 4 }
 0x1d8   : > { %v1659_v51 = vmul.f32 %v1473_v46, %v1372_v41  ;;  %v1332_v52 = vmul.f32 0.2, %v1141_v42  ;;  %v1743_v53 = vsel %vm1736_vm4, %v1740_v34, %v1742_v44  ;;  %v8525_v54 = vsel %vm2446_vm5, %v2450_v33, %v2452_v45 }
 0x1d9   : > { %v1145_v55 = vpop.f32.mrb[98].mxu1  ;;  %7012 = vmatprep.mubr.msk.f32.mxu1 %vm919_vm3, %v1743_v53  ;;  %v8529_v56 = vsel %vm3168_vm6, %v3169_v47, %v3170_v48  ;;  %v8532_v27 = vsel %vm541_vm0, %v3597_v49, %v3598_v50 }
 0x1da   : > { %10394 = vst [vmem:[#allocation2_spill] sm:$0xff] %v8529_v56  ;;  %10395 = vst [vmem:[#allocation3_spill] sm:$0xff] %v8532_v27  ;;  %v1373_v57 = vmax.f32 %v1141_v42, %v1332_v52  ;;  %v1146_v58 = vadd.f32 %v8493_v59, %v1145_v55  ;;  %v6898_v60 = vpop.f32.mrb[99].mxu1  ;;  %7071 = vmatprep.mubr.msk.f32.mxu0 %vm919_vm3, %v1659_v51  ;;  %v1744_v61 = vrot.slane %v1659_v51, 1  ;;  %v2454_v62 = vrot.slane %v1659_v51, 2 }
 0x1db   : > { %v3172_v63 = vrot.slane %v1659_v51, 3  ;;  %v3600_v0 = vrot.slane %v1659_v51, 4  ;;  %v4319_v8 = vrot.slane %v1659_v51, 5  ;;  %v4748_v9 = vrot.slane %v1659_v51, 6 }
 0x1dc   : > { %v1660_v2 = vmul.f32 %v1478_v14, %v1373_v57  ;;  %v1333_v3 = vmul.f32 0.2, %v1146_v58  ;;  %v1745_v4 = vsel %vm1736_vm4, %v1742_v44, %v1744_v61  ;;  %v8538_v1 = vsel %vm2446_vm5, %v2452_v45, %v2454_v62 }
 0x1dd   : > { %v1150_v5 = vpop.f32.mrb[100].mxu1  ;;  %7013 = vmatmul.mubr.msk.f32.gmra.mrb[174].mxu1 %vm919_vm3, %v1745_v4  ;;  %v8542_v6 = vsel %vm3168_vm6, %v3170_v48, %v3172_v63  ;;  %v8545_v7 = vsel %vm541_vm0, %v3598_v50, %v3600_v0 }
 0x1de   : > { %10396 = vst [vmem:[#allocation4_spill] sm:$0xff] %v8542_v6  ;;  %10397 = vst [vmem:[#allocation5_spill] sm:$0xff] %v8545_v7  ;;  %v1374_v10 = vmax.f32 %v1146_v58, %v1333_v3  ;;  %v1151_v11 = vadd.f32 %v8493_v59, %v1150_v5  ;;  %v6901_v12 = vpop.f32.mrb[101].mxu1  ;;  %7072 = vmatmul.mubr.msk.f32.gmra.mrb[4].mxu0 %vm919_vm3, %v1660_v2  ;;  %v1746_v13 = vrot.slane %v1660_v2, 1  ;;  %v2456_v15 = vrot.slane %v1660_v2, 2 }
 0x1df   : > { %v3174_v17 = vrot.slane %v1660_v2, 3  ;;  %v3602_v19 = vrot.slane %v1660_v2, 4  ;;  %v4320_v20 = vrot.slane %v1660_v2, 5  ;;  %v4749_v21 = vrot.slane %v1660_v2, 6 }
 0x1e0   : > { %v1661_v22 = vmul.f32 %v1483_v16, %v1374_v10  ;;  %v1334_v23 = vmul.f32 0.2, %v1151_v11  ;;  %v1747_v24 = vsel %vm1736_vm4, %v1744_v61, %v1746_v13  ;;  %v8551_v25 = vsel %vm2446_vm5, %v2454_v62, %v2456_v15  ;;  %v1493_v61 = vpop.permute.xlu0 %1492 }
 0x1e1   : > { %v1155_v26 = vpop.f32.mrb[102].mxu1  ;;  %7015 = vmatprep.mubr.msk.f32.mxu1 %vm919_vm3, %v1747_v24  ;;  %v8555_v29 = vsel %vm3168_vm6, %v3172_v63, %v3174_v17  ;;  %v8558_v30 = vsel %vm541_vm0, %v3600_v0, %v3602_v19  ;;  %v8561_v31 = vsel %vm4318_vm7, %v4319_v8, %v4320_v20  ;;  %v8564_v32 = vsel %vm4747_vm8, %v4748_v9, %v4749_v21 }
 0x1e2   : > { %10398 = vst [vmem:[#allocation6_spill] sm:$0xff] %v8555_v29  ;;  %10399 = vst [vmem:[#allocation7_spill] sm:$0xff] %v8558_v30  ;;  %v1375_v34 = vmax.f32 %v1151_v11, %v1334_v23  ;;  %v1156_v33 = vadd.f32 %v8493_v59, %v1155_v26  ;;  %v6904_v35 = vpop.f32.mrb[103].mxu1  ;;  %7074 = vmatprep.mubr.msk.f32.mxu0 %vm919_vm3, %v1661_v22  ;;  %v1748_v36 = vrot.slane %v1661_v22, 1  ;;  %v2458_v37 = vrot.slane %v1661_v22, 2 }
 0x1e3   : > { %10400 = vst [vmem:[#allocation8_spill] sm:$0xff] %v8561_v31  ;;  %10401 = vst [vmem:[#allocation9_spill] sm:$0xff] %v8564_v32  ;;  %v3176_v40 = vrot.slane %v1661_v22, 3  ;;  %v3604_v41 = vrot.slane %v1661_v22, 4  ;;  %v4322_v42 = vrot.slane %v1661_v22, 5  ;;  %v4751_v43 = vrot.slane %v1661_v22, 6 }
 0x1e4   : > { %v1662_v44 = vmul.f32 %v1488_v38, %v1375_v34  ;;  %v1335_v45 = vmul.f32 0.2, %v1156_v33  ;;  %v1749_v46 = vsel %vm1736_vm4, %v1746_v13, %v1748_v36  ;;  %v8570_v47 = vsel %vm2446_vm5, %v2456_v15, %v2458_v37  ;;  %v8992_v29 = vld [vmem:[%s10346_s5] ss:$0 sm:$0xff] }
 0x1e5   : > { %v1160_v48 = vpop.f32.mrb[104].mxu1  ;;  %7016 = vmatmul.mubr.msk.f32.gmra.mrb[176].mxu1 %vm919_vm3, %v1749_v46  ;;  %v8574_v49 = vsel %vm3168_vm6, %v3174_v17, %v3176_v40  ;;  %v8577_v50 = vsel %vm541_vm0, %v3602_v19, %v3604_v41  ;;  %v8580_v51 = vsel %vm4318_vm7, %v4320_v20, %v4322_v42  ;;  %v8583_v52 = vsel %vm4747_vm8, %v4749_v21, %v4751_v43  ;;  %v1498_v20 = vpop.permute.xlu1 %1497 }
 0x1e6   : > { %10402 = vst [vmem:[#allocation10_spill] sm:$0xff] %v8574_v49  ;;  %10403 = vst [vmem:[#allocation11_spill] sm:$0xff] %v8577_v50  ;;  %v1376_v53 = vmax.f32 %v1156_v33, %v1335_v45  ;;  %v1161_v55 = vadd.f32 %v8493_v59, %v1160_v48  ;;  %v6907_v57 = vpop.f32.mrb[105].mxu1  ;;  %7075 = vmatmul.mubr.msk.f32.gmra.mrb[6].mxu0 %vm919_vm3, %v1662_v44  ;;  %v1750_v58 = vrot.slane %v1662_v44, 1  ;;  %v2460_v60 = vrot.slane %v1662_v44, 2  ;;  %v1503_v48 = vpop.permute.xlu0 %1502 }
 0x1e7   : > { %10404 = vst [vmem:[#allocation12_spill] sm:$0xff] %v8580_v51  ;;  %10405 = vst [vmem:[#allocation13_spill] sm:$0xff] %v8583_v52  ;;  %v3178_v62 = vrot.slane %v1662_v44, 3  ;;  %v3606_v14 = vrot.slane %v1662_v44, 4  ;;  %v4324_v63 = vrot.slane %v1662_v44, 5  ;;  %v4753_v0 = vrot.slane %v1662_v44, 6 }
 0x1e8   : > { %v1663_v2 = vmul.f32 %v1493_v61, %v1376_v53  ;;  %v1336_v3 = vmul.f32 0.2, %v1161_v55  ;;  %v1751_v4 = vsel %vm1736_vm4, %v1748_v36, %v1750_v58  ;;  %v8589_v5 = vsel %vm2446_vm5, %v2458_v37, %v2460_v60 }
 0x1e9   : > { %v1165_v8 = vpop.f32.mrb[106].mxu1  ;;  %7018 = vmatprep.mubr.msk.f32.mxu1 %vm919_vm3, %v1751_v4  ;;  %v8593_v9 = vsel %vm3168_vm6, %v3176_v40, %v3178_v62  ;;  %v8596_v10 = vsel %vm541_vm0, %v3604_v41, %v3606_v14  ;;  %v8599_v11 = vsel %vm4318_vm7, %v4322_v42, %v4324_v63  ;;  %v8602_v12 = vsel %vm4747_vm8, %v4751_v43, %v4753_v0 }
 0x1ea   : > { %10406 = vst [vmem:[#allocation14_spill] sm:$0xff] %v8593_v9  ;;  %10407 = vst [vmem:[#allocation15_spill] sm:$0xff] %v8596_v10  ;;  %v1377_v13 = vmax.f32 %v1161_v55, %v1336_v3  ;;  %v1166_v15 = vadd.f32 %v8493_v59, %v1165_v8  ;;  %v6910_v16 = vpop.f32.mrb[107].mxu1  ;;  %7077 = vmatprep.mubr.msk.f32.mxu0 %vm919_vm3, %v1663_v2  ;;  %v1752_v17 = vrot.slane %v1663_v2, 1  ;;  %v2462_v19 = vrot.slane %v1663_v2, 2 }
 0x1eb   : > { %10408 = vst [vmem:[#allocation16_spill] sm:$0xff] %v8599_v11  ;;  %10409 = vst [vmem:[#allocation17_spill] sm:$0xff] %v8602_v12  ;;  %v3180_v21 = vrot.slane %v1663_v2, 3  ;;  %v3608_v22 = vrot.slane %v1663_v2, 4  ;;  %v4326_v23 = vrot.slane %v1663_v2, 5  ;;  %v4755_v24 = vrot.slane %v1663_v2, 6 }
 0x1ec   : > { %v1664_v26 = vmul.f32 %v1498_v20, %v1377_v13  ;;  %v1337_v34 = vmul.f32 0.2, %v1166_v15  ;;  %v1753_v33 = vsel %vm1736_vm4, %v1750_v58, %v1752_v17  ;;  %v8608_v35 = vsel %vm2446_vm5, %v2460_v60, %v2462_v19 }
 0x1ed   : > { %v1170_v36 = vpop.f32.mrb[108].mxu1  ;;  %7019 = vmatmul.mubr.msk.f32.gmra.mrb[178].mxu1 %vm919_vm3, %v1753_v33  ;;  %v8612_v37 = vsel %vm3168_vm6, %v3178_v62, %v3180_v21  ;;  %v8615_v38 = vsel %vm541_vm0, %v3606_v14, %v3608_v22  ;;  %v8618_v40 = vsel %vm4318_vm7, %v4324_v63, %v4326_v23  ;;  %v8621_v41 = vsel %vm4747_vm8, %v4753_v0, %v4755_v24 }
 0x1ee   : > { %10410 = vst [vmem:[#allocation18_spill] sm:$0xff] %v8612_v37  ;;  %10411 = vst [vmem:[#allocation19_spill] sm:$0xff] %v8615_v38  ;;  %v1378_v42 = vmax.f32 %v1166_v15, %v1337_v34  ;;  %v1171_v43 = vadd.f32 %v8493_v59, %v1170_v36  ;;  %v6913_v44 = vpop.f32.mrb[109].mxu1  ;;  %7078 = vmatmul.mubr.msk.f32.gmra.mrb[8].mxu0 %vm919_vm3, %v1664_v26  ;;  %v1754_v45 = vrot.slane %v1664_v26, 1  ;;  %v2464_v46 = vrot.slane %v1664_v26, 2 }
 0x1ef   : > { %10412 = vst [vmem:[#allocation20_spill] sm:$0xff] %v8618_v40  ;;  %10413 = vst [vmem:[#allocation21_spill] sm:$0xff] %v8621_v41  ;;  %v3182_v53 = vrot.slane %v1664_v26, 3  ;;  %v3610_v55 = vrot.slane %v1664_v26, 4  ;;  %v4328_v57 = vrot.slane %v1664_v26, 5  ;;  %v4757_v58 = vrot.slane %v1664_v26, 6 }
 0x1f0   : > { %v1665_v60 = vmul.f32 %v1503_v48, %v1378_v42  ;;  %v1338_v61 = vmul.f32 0.2, %v1171_v43  ;;  %v1755_v62 = vsel %vm1736_vm4, %v1752_v17, %v1754_v45  ;;  %v8627_v14 = vsel %vm2446_vm5, %v2462_v19, %v2464_v46  ;;  %v1508_v19 = vpop.permute.xlu1 %1507 }
 0x1f1   : > { %v1175_v63 = vpop.f32.mrb[110].mxu1  ;;  %7021 = vmatprep.mubr.msk.f32.mxu1 %vm919_vm3, %v1755_v62  ;;  %v8631_v0 = vsel %vm3168_vm6, %v3180_v21, %v3182_v53  ;;  %v8634_v2 = vsel %vm541_vm0, %v3608_v22, %v3610_v55  ;;  %v8637_v3 = vsel %vm4318_vm7, %v4326_v23, %v4328_v57  ;;  %v8640_v4 = vsel %vm4747_vm8, %v4755_v24, %v4757_v58 }
 0x1f2   : > { %10414 = vst [vmem:[#allocation22_spill] sm:$0xff] %v8631_v0  ;;  %10415 = vst [vmem:[#allocation23_spill] sm:$0xff] %v8634_v2  ;;  %v1379_v8 = vmax.f32 %v1171_v43, %v1338_v61  ;;  %v1176_v13 = vadd.f32 %v8493_v59, %v1175_v63  ;;  %v6916_v15 = vpop.f32.mrb[111].mxu1  ;;  %7080 = vmatprep.mubr.msk.f32.mxu0 %vm919_vm3, %v1665_v60  ;;  %v1756_v16 = vrot.slane %v1665_v60, 1  ;;  %v2466_v17 = vrot.slane %v1665_v60, 2  ;;  %v1513_v63 = vpop.permute.xlu0 %1512 }
 0x1f3   : > { %10416 = vst [vmem:[#allocation24_spill] sm:$0xff] %v8637_v3  ;;  %10417 = vst [vmem:[#allocation25_spill] sm:$0xff] %v8640_v4  ;;  %v3184_v20 = vrot.slane %v1665_v60, 3  ;;  %v3612_v21 = vrot.slane %v1665_v60, 4  ;;  %v4330_v26 = vrot.slane %v1665_v60, 5  ;;  %v4759_v22 = vrot.slane %v1665_v60, 6 }
 0x1f4   : > { %v1666_v34 = vmul.f32 %v1508_v19, %v1379_v8  ;;  %v1339_v33 = vmul.f32 0.2, %v1176_v13  ;;  %v1757_v23 = vsel %vm1736_vm4, %v1754_v45, %v1756_v16  ;;  %v8646_v24 = vsel %vm2446_vm5, %v2464_v46, %v2466_v17 }
 0x1f5   : > { %v1180_v36 = vpop.f32.mrb[112].mxu1  ;;  %7022 = vmatmul.mubr.msk.f32.gmra.mrb[180].mxu1 %vm919_vm3, %v1757_v23  ;;  %v8650_v42 = vsel %vm3168_vm6, %v3182_v53, %v3184_v20  ;;  %v8653_v43 = vsel %vm541_vm0, %v3610_v55, %v3612_v21  ;;  %v8656_v44 = vsel %vm4318_vm7, %v4328_v57, %v4330_v26  ;;  %v8659_v48 = vsel %vm4747_vm8, %v4757_v58, %v4759_v22 }
 0x1f6   : > { %10418 = vst [vmem:[#allocation26_spill] sm:$0xff] %v8650_v42  ;;  %10419 = vst [vmem:[#allocation27_spill] sm:$0xff] %v8653_v43  ;;  %v1380_v60 = vmax.f32 %v1176_v13, %v1339_v33  ;;  %v1181_v45 = vadd.f32 %v8493_v59, %v1180_v36  ;;  %v6919_v46 = vpop.f32.mrb[113].mxu1  ;;  %7081 = vmatmul.mubr.msk.f32.gmra.mrb[10].mxu0 %vm919_vm3, %v1666_v34  ;;  %v1758_v61 = vrot.slane %v1666_v34, 1  ;;  %v2468_v62 = vrot.slane %v1666_v34, 2 }
 0x1f7   : > { %10420 = vst [vmem:[#allocation28_spill] sm:$0xff] %v8656_v44  ;;  %10421 = vst [vmem:[#allocation29_spill] sm:$0xff] %v8659_v48  ;;  %v3186_v53 = vrot.slane %v1666_v34, 3  ;;  %v3614_v8 = vrot.slane %v1666_v34, 4  ;;  %v4332_v15 = vrot.slane %v1666_v34, 5  ;;  %v4761_v55 = vrot.slane %v1666_v34, 6  ;;  %v1518_v48 = vpop.permute.xlu1 %1517 }
 0x1f8   : > { %v1667_v19 = vmul.f32 %v1513_v63, %v1380_v60  ;;  %v1340_v23 = vmul.f32 0.2, %v1181_v45  ;;  %v1759_v57 = vsel %vm1736_vm4, %v1756_v16, %v1758_v61  ;;  %v8665_v58 = vsel %vm2446_vm5, %v2466_v17, %v2468_v62 }
 0x1f9   : > { %v1185_v13 = vpop.f32.mrb[114].mxu1  ;;  %7024 = vmatprep.mubr.msk.f32.mxu1 %vm919_vm3, %v1759_v57  ;;  %v8669_v33 = vsel %vm3168_vm6, %v3184_v20, %v3186_v53  ;;  %v8672_v36 = vsel %vm541_vm0, %v3612_v21, %v3614_v8  ;;  %v8675_v46 = vsel %vm4318_vm7, %v4330_v26, %v4332_v15  ;;  %v8678_v34 = vsel %vm4747_vm8, %v4759_v22, %v4761_v55 }
 0x1fa   : > { %10422 = vst [vmem:[#allocation30_spill] sm:$0xff] %v8669_v33  ;;  %10423 = vst [vmem:[#allocation31_spill] sm:$0xff] %v8672_v36  ;;  %v1381_v60 = vmax.f32 %v1181_v45, %v1340_v23  ;;  %v1186_v16 = vadd.f32 %v8493_v59, %v1185_v13  ;;  %v6922_v17 = vpop.f32.mrb[115].mxu1  ;;  %7083 = vmatprep.mubr.msk.f32.mxu0 %vm919_vm3, %v1667_v19  ;;  %v1760_v63 = vrot.slane %v1667_v19, 1  ;;  %v2470_v57 = vrot.slane %v1667_v19, 2 }
 0x1fb   : > { %10424 = vst [vmem:[#allocation32_spill] sm:$0xff] %v8675_v46  ;;  %10425 = vst [vmem:[#allocation33_spill] sm:$0xff] %v8678_v34  ;;  %v3188_v20 = vrot.slane %v1667_v19, 3  ;;  %v3616_v4 = vrot.slane %v1667_v19, 4  ;;  %v4334_v41 = vrot.slane %v1667_v19, 5  ;;  %v4763_v21 = vrot.slane %v1667_v19, 6 }
 0x1fc   : > { %v8682_v12 = vmul.f32 %v1518_v48, %v1381_v60  ;;  %v1341_v26 = vmul.f32 0.2, %v1186_v16  ;;  %v1761_v52 = vsel %vm1736_vm4, %v1758_v61, %v1760_v63  ;;  %v8686_v22 = vsel %vm2446_vm5, %v2468_v62, %v2470_v57  ;;  %v1523_v60 = vpop.permute.xlu0 %1522 }
 0x1fd   : > { %v1190_v45 = vpop.f32.mrb[116].mxu1  ;;  %7025 = vmatmul.mubr.msk.f32.gmra.mrb[182].mxu1 %vm919_vm3, %v1761_v52  ;;  %v8690_v23 = vsel %vm3168_vm6, %v3186_v53, %v3188_v20  ;;  %v8693_v13 = vsel %vm541_vm0, %v3614_v8, %v3616_v4  ;;  %v8696_v17 = vsel %vm4318_vm7, %v4332_v15, %v4334_v41  ;;  %v8699_v48 = vsel %vm4747_vm8, %v4761_v55, %v4763_v21 }
 0x1fe   : > { %10426 = vst [vmem:[#allocation34_spill] sm:$0xff] %v8682_v12  ;;  %10427 = vst [vmem:[#allocation35_spill] sm:$0xff] %v8690_v23  ;;  %v1382_v19 = vmax.f32 %v1186_v16, %v1341_v26  ;;  %v1191_v61 = vadd.f32 %v8493_v59, %v1190_v45  ;;  %v6925_v62 = vpop.f32.mrb[117].mxu1  ;;  %7084 = vmatmul.mubr.msk.f32.gmra.mrb[12].mxu0 %vm919_vm3, %v8682_v12  ;;  %v1762_v52 = vrot.slane %v8682_v12, 1  ;;  %v10352_v53 = vrot.slane %v8682_v12, 2 }
 0x1ff   : > { %10428 = vst [vmem:[#allocation36_spill] sm:$0xff] %v8693_v13  ;;  %10429 = vst [vmem:[#allocation37_spill] sm:$0xff] %v8696_v17  ;;  %7121 = vmatprep.mubr.msk.f32.mxu0 %vm919_vm3, %v8509_v28  ;;  %v10356_v8 = vrot.slane %v8682_v12, 3  ;;  %v10353_v15 = vrot.slane %v8682_v12, 4  ;;  %v10354_v55 = vrot.slane %v8682_v12, 5  ;;  %v10355_v16 = vrot.slane %v8682_v12, 6 }
 0x200   : > { %10430 = vst [vmem:[#allocation38_spill] sm:$0xff] %v8699_v48  ;;  %v8712_v26 = vmul.f32 %v1523_v60, %v1382_v19  ;;  %v1342_v45 = vmul.f32 0.2, %v1191_v61  ;;  %v1763_v62 = vsel %vm1736_vm4, %v1760_v63, %v1762_v52  ;;  %v8718_v48 = vsel %vm2446_vm5, %v2470_v57, %v10352_v53  ;;  %v8724_v28 = vld [vmem:[%s10347_s6 + $0x20] sm:$0xff] }
 0x201   : > { %v1195_v34 = vpop.f32.mrb[118].mxu1  ;;  %7027 = vmatprep.mubr.msk.f32.mxu1 %vm919_vm3, %v1763_v62  ;;  %v8729_v19 = vsel %vm3168_vm6, %v3188_v20, %v10356_v8  ;;  %v8734_v63 = vsel %vm541_vm0, %v3616_v4, %v10353_v15  ;;  %v8739_v57 = vsel %vm4318_vm7, %v4334_v41, %v10354_v55  ;;  %v8744_v60 = vsel %vm4747_vm8, %v4763_v21, %v10355_v16  ;;  %v1528_v15 = vpop.permute.xlu1 %1527 }
 0x202   : > { %10431 = vst [vmem:[#allocation39_spill] sm:$0xff] %v8729_v19  ;;  %10432 = vst [vmem:[#allocation40_spill] sm:$0xff] %v8734_v63  ;;  %v1383_v62 = vmax.f32 %v1191_v61, %v1342_v45  ;;  %v1196_v53 = vadd.f32 %v8493_v59, %v1195_v34  ;;  %v6928_v20 = vpop.f32.mrb[119].mxu1  ;;  %7122 = vmatmul.mubr.msk.f32.vlgmr.msra.gmra.mrb[0].mxu0 %vm919_vm3, %v8517_v39  ;;  %v1764_v4 = vrot.slane %v8712_v26, 1 }
 0x203   : > { %10433 = vst [vmem:[#allocation41_spill] sm:$0xff] %v8739_v57  ;;  %10434 = vst [vmem:[#allocation42_spill] sm:$0xff] %v8744_v60  ;;  %7124 = vmatprep.mubr.msk.f32.mxu0 %vm919_vm3, %v8525_v54  ;;  %7176 = vmatpush3.msra.mxu0 %v8502_v18  ;;  %v1533_v18 = vpop.permute.xlu0 %1532 }
 0x204   : > { %v8753_v41 = vmul.f32 %v1528_v15, %v1383_v62  ;;  %v1343_v55 = vmul.f32 0.2, %v1196_v53  ;;  %v1765_v21 = vsel %vm1736_vm4, %v1762_v52, %v1764_v4  ;;  %7231 = vmatprep.subr.mxu0 %v8724_v28 }
 0x205   : > { %v1200_v34 = vpop.f32.mrb[120].mxu1  ;;  %7028 = vmatmul.mubr.msk.f32.gmra.mrb[184].mxu1 %vm919_vm3, %v1765_v21 }
 0x206   : > { %v1384_v61 = vmax.f32 %v1196_v53, %v1343_v55  ;;  %v1201_v39 = vadd.f32 %v8493_v59, %v1200_v34  ;;  %v6931_v45 = vpop.f32.mrb[121].mxu1  ;;  %7125 = vmatmul.mubr.msk.f32.gmra.mrb[2].mxu0 %vm919_vm3, %v8538_v1  ;;  %v1766_v20 = vrot.slane %v8753_v41, 1 }
 0x207   : > { %7127 = vmatprep.mubr.msk.f32.mxu0 %vm919_vm3, %v8551_v25  ;;  %v1538_v45 = vpop.permute.xlu1 %1537 }
 0x208   : > { %v8764_v15 = vmul.f32 %v1533_v18, %v1384_v61  ;;  %v1344_v52 = vmul.f32 0.2, %v1201_v39  ;;  %v1767_v62 = vsel %vm1736_vm4, %v1764_v4, %v1766_v20 }
 0x209   : > { %v1205_v16 = vpop.f32.mrb[122].mxu1  ;;  %7030 = vmatprep.mubr.msk.f32.mxu1 %vm919_vm3, %v1767_v62 }
 0x20a   : > { %v1385_v53 = vmax.f32 %v1201_v39, %v1344_v52  ;;  %v1206_v55 = vadd.f32 %v8493_v59, %v1205_v16  ;;  %v6934_v21 = vpop.f32.mrb[123].mxu1  ;;  %7128 = vmatmul.mubr.msk.f32.gmra.mrb[4].mxu0 %vm919_vm3, %v8570_v47  ;;  %v1768_v34 = vrot.slane %v8764_v15, 1 }
 0x20b   : > { %7130 = vmatprep.mubr.msk.f32.mxu0 %vm919_vm3, %v8589_v5  ;;  %v1543_v21 = vpop.permute.xlu0 %1542 }
 0x20c   : > { %v8774_v61 = vmul.f32 %v1538_v45, %v1385_v53  ;;  %v1345_v18 = vmul.f32 0.2, %v1206_v55  ;;  %v1769_v4 = vsel %vm1736_vm4, %v1766_v20, %v1768_v34 }
 0x20d   : > { %v1210_v8 = vpop.f32.mrb[124].mxu1  ;;  %7031 = vmatmul.mubr.msk.f32.gmra.mrb[186].mxu1 %vm919_vm3, %v1769_v4 }
 0x20e   : > { %v1386_v39 = vmax.f32 %v1206_v55, %v1345_v18  ;;  %v1211_v16 = vadd.f32 %v8493_v59, %v1210_v8  ;;  %v6937_v52 = vpop.f32.mrb[125].mxu1  ;;  %7131 = vmatmul.mubr.msk.f32.gmra.mrb[6].mxu0 %vm919_vm3, %v8608_v35  ;;  %v1770_v62 = vrot.slane %v8774_v61, 1  ;;  %v2480_v17 = vrot.slane %v8774_v61, 2 }
 0x20f   : > { %7133 = vmatprep.mubr.msk.f32.mxu0 %vm919_vm3, %v8627_v14  ;;  %v1548_v52 = vpop.permute.xlu1 %1547 }
 0x210   : > { %v8784_v53 = vmul.f32 %v1543_v21, %v1386_v39  ;;  %v1346_v45 = vmul.f32 0.2, %v1211_v16  ;;  %v1771_v20 = vsel %vm1736_vm4, %v1768_v34, %v1770_v62 }
 0x211   : > { %v1215_v60 = vpop.f32.mrb[126].mxu1  ;;  %7033 = vmatprep.mubr.msk.f32.mxu1 %vm919_vm3, %v1771_v20 }
 0x212   : > { %v1387_v55 = vmax.f32 %v1211_v16, %v1346_v45  ;;  %v1216_v8 = vadd.f32 %v8493_v59, %v1215_v60  ;;  %v6940_v18 = vpop.f32.mrb[127].mxu1  ;;  %7134 = vmatmul.mubr.msk.f32.gmra.mrb[8].mxu0 %vm919_vm3, %v8646_v24  ;;  %v1772_v4 = vrot.slane %v8784_v53, 1  ;;  %v2474_v60 = vrot.slane %v8712_v26, 2 }
 0x213   : > { %7136 = vmatprep.mubr.msk.f32.mxu0 %vm919_vm3, %v8665_v58 }
 0x214   : > { %v8794_v39 = vmul.f32 %v1548_v52, %v1387_v55  ;;  %v1347_v21 = vmul.f32 0.2, %v1216_v8  ;;  %v1773_v34 = vsel %vm1736_vm4, %v1770_v62, %v1772_v4  ;;  %v2476_v55 = vrot.slane %v8753_v41, 2  ;;  %v1553_v52 = vpop.permute.xlu0 %1552 }
 0x215   : > { %v1220_v32 = vpop.f32.mrb[128].mxu1  ;;  %7034 = vmatmul.mubr.msk.f32.gmra.mrb[188].mxu1 %vm919_vm3, %v1773_v34 }
 0x216   : > { %v1388_v16 = vmax.f32 %v1216_v8, %v1347_v21  ;;  %v1221_v45 = vadd.f32 %v8493_v59, %v1220_v32  ;;  %v6943_v20 = vpop.f32.mrb[129].mxu1  ;;  %7137 = vmatmul.mubr.msk.f32.gmra.mrb[10].mxu0 %vm919_vm3, %v8686_v22  ;;  %v1774_v18 = vrot.slane %v8794_v39, 1  ;;  %v10435_v32 = vrot.slane %v8682_v12, 2 }
 0x217   : > { %7139 = vmatprep.mubr.msk.f32.mxu0 %vm919_vm3, %v8718_v48  ;;  %v2478_v20 = vrot.slane %v8764_v15, 2 }
 0x218   : > { %v8806_v62 = vmul.f32 %v1553_v52, %v1388_v16  ;;  %v1348_v34 = vmul.f32 0.2, %v1221_v45  ;;  %v1775_v57 = vsel %vm1736_vm4, %v1772_v4, %v1774_v18  ;;  %v8813_v21 = vsel %vm2446_vm5, %v10435_v32, %v2474_v60  ;;  %v1558_v52 = vpop.permute.xlu1 %1557 }
 0x219   : > { %v1225_v8 = vpop.f32.mrb[130].mxu1  ;;  %7036 = vmatprep.mubr.msk.f32.mxu1 %vm919_vm3, %v1775_v57  ;;  %v8821_v4 = vsel %vm2446_vm5, %v2474_v60, %v2476_v55  ;;  %v8834_v60 = vsel %vm2446_vm5, %v2478_v20, %v2480_v17 }
 0x21a   : > { %v1389_v46 = vmax.f32 %v1221_v45, %v1348_v34  ;;  %v1226_v44 = vadd.f32 %v8493_v59, %v1225_v8  ;;  %v6946_v16 = vpop.f32.mrb[131].mxu1  ;;  %7140 = vmatmul.mubr.msk.f32.gmra.mrb[12].mxu0 %vm919_vm3, %v8813_v21  ;;  %v1776_v57 = vrot.slane %v8806_v62, 1  ;;  %v8831_v8 = vsel %vm2446_vm5, %v2476_v55, %v2478_v20 }
 0x21b   : > { %7142 = vmatprep.mubr.msk.f32.mxu0 %vm919_vm3, %v8821_v4  ;;  %v2482_v16 = vrot.slane %v8784_v53, 2 }
 0x21c   : > { %v8826_v32 = vmul.f32 %v1558_v52, %v1389_v46  ;;  %v1349_v3 = vmul.f32 0.2, %v1226_v44  ;;  %v1777_v45 = vsel %vm1736_vm4, %v1774_v18, %v1776_v57  ;;  %v2484_v18 = vrot.slane %v8794_v39, 2  ;;  %v1563_v52 = vpop.permute.xlu0 %1562 }
 0x21d   : > { %v1230_v34 = vpop.f32.mrb[132].mxu1  ;;  %7037 = vmatmul.mubr.msk.f32.gmra.mrb[190].mxu1 %vm919_vm3, %v1777_v45 }
 0x21e   : > { %v1390_v40 = vmax.f32 %v1226_v44, %v1349_v3  ;;  %v1231_v11 = vadd.f32 %v8493_v59, %v1230_v34  ;;  %v6949_v51 = vpop.f32.mrb[133].mxu1  ;;  %7143 = vmatmul.mubr.msk.f32.gmra.mrb[14].mxu0 %vm919_vm3, %v8831_v8  ;;  %v1778_v46 = vrot.slane %v8826_v32, 1  ;;  %v2486_v44 = vrot.slane %v8806_v62, 2 }
 0x21f   : > { %7145 = vmatprep.mubr.msk.f32.mxu0 %vm919_vm3, %v8834_v60  ;;  %v8849_v51 = vsel %vm2446_vm5, %v2480_v17, %v2482_v16  ;;  %v2488_v34 = vrot.slane %v8826_v32, 2 }
 0x220   : > { %v8844_v55 = vmul.f32 %v1563_v52, %v1390_v40  ;;  %v1350_v20 = vmul.f32 0.2, %v1231_v11  ;;  %v1779_v45 = vsel %vm1736_vm4, %v1776_v57, %v1778_v46  ;;  %v8857_v40 = vsel %vm2446_vm5, %v2482_v16, %v2484_v18  ;;  %v1568_v52 = vpop.permute.xlu1 %1567 }
 0x221   : > { %v1235_v3 = vpop.f32.mrb[134].mxu1  ;;  %7039 = vmatprep.mubr.msk.f32.mxu1 %vm919_vm3, %v1779_v45  ;;  %v8870_v16 = vsel %vm2446_vm5, %v2486_v44, %v2488_v34 }
 0x222   : > { %v1391_v31 = vmax.f32 %v1231_v11, %v1350_v20  ;;  %v1236_v63 = vadd.f32 %v8493_v59, %v1235_v3  ;;  %v6952_v13 = vpop.f32.mrb[135].mxu1  ;;  %7146 = vmatmul.mubr.msk.f32.gmra.mrb[16].mxu0 %vm919_vm3, %v8849_v51  ;;  %v1780_v57 = vrot.slane %v8844_v55, 1  ;;  %10437 = vst [vmem:[#allocation44_spill] sm:$0xff] %v8870_v16  ;;  %v2490_v3 = vrot.slane %v8844_v55, 2 }
 0x223   : > { %7148 = vmatprep.mubr.msk.f32.mxu0 %vm919_vm3, %v8857_v40  ;;  %v8867_v13 = vsel %vm2446_vm5, %v2484_v18, %v2486_v44 }
 0x224   : > { %v8862_v17 = vmul.f32 %v1568_v52, %v1391_v31  ;;  %v1351_v45 = vmul.f32 0.2, %v1236_v63  ;;  %v1781_v11 = vsel %vm1736_vm4, %v1778_v46, %v1780_v57  ;;  %10436 = vst [vmem:[#allocation43_spill] sm:$0xff] %v8867_v13  ;;  %v1573_v52 = vpop.permute.xlu0 %1572 }
 0x225   : > { %v1240_v20 = vpop.f32.mrb[136].mxu1  ;;  %7040 = vmatmul.mubr.msk.f32.gmra.mrb[192].mxu1 %vm919_vm3, %v1781_v11 }
 0x226   : > { %v1392_v36 = vmax.f32 %v1236_v63, %v1351_v45  ;;  %v1241_v43 = vadd.f32 %v8493_v59, %v1240_v20  ;;  %v6955_v2 = vpop.f32.mrb[137].mxu1  ;;  %7149 = vmatmul.mubr.msk.f32.gmra.mrb[18].mxu0 %vm919_vm3, %v8867_v13  ;;  %v1782_v31 = vrot.slane %v8862_v17, 1  ;;  %v2492_v46 = vrot.slane %v8862_v17, 2 }
 0x227   : > { %7151 = vmatprep.mubr.msk.f32.mxu0 %vm919_vm3, %v8870_v16  ;;  %v8885_v2 = vsel %vm2446_vm5, %v2488_v34, %v2490_v3 }
 0x228   : > { %v8880_v18 = vmul.f32 %v1573_v52, %v1392_v36  ;;  %v1352_v44 = vmul.f32 0.2, %v1241_v43  ;;  %v1783_v11 = vsel %vm1736_vm4, %v1780_v57, %v1782_v31  ;;  %10438 = vst [vmem:[#allocation45_spill] sm:$0xff] %v8885_v2  ;;  %v8888_v45 = vsel %vm2446_vm5, %v2490_v3, %v2492_v46  ;;  %v1578_v52 = vpop.permute.xlu1 %1577 }
 0x229   : > { %v1245_v63 = vpop.f32.mrb[138].mxu1  ;;  %7042 = vmatprep.mubr.msk.f32.mxu1 %vm919_vm3, %v1783_v11  ;;  %10439 = vst [vmem:[#allocation46_spill] sm:$0xff] %v8888_v45 }
 0x22a   : > { %v1393_v20 = vmax.f32 %v1241_v43, %v1352_v44  ;;  %v1246_v38 = vadd.f32 %v8493_v59, %v1245_v63  ;;  %v6958_v10 = vpop.f32.mrb[139].mxu1  ;;  %7152 = vmatmul.mubr.msk.f32.gmra.mrb[20].mxu0 %vm919_vm3, %v8885_v2  ;;  %v1784_v36 = vrot.slane %v8880_v18, 1  ;;  %v2494_v57 = vrot.slane %v8880_v18, 2 }
 0x22b   : > { %7154 = vmatprep.mubr.msk.f32.mxu0 %vm919_vm3, %v8888_v45 }
 0x22c   : > { %v8897_v34 = vmul.f32 %v1578_v52, %v1393_v20  ;;  %v1353_v11 = vmul.f32 0.2, %v1246_v38  ;;  %v1785_v3 = vsel %vm1736_vm4, %v1782_v31, %v1784_v36  ;;  %v8901_v43 = vsel %vm2446_vm5, %v2492_v46, %v2494_v57  ;;  %v1583_v52 = vpop.permute.xlu0 %1582 }
 0x22d   : > { %10440 = vst [vmem:[#allocation47_spill] sm:$0xff] %v8901_v43  ;;  %v1250_v10 = vpop.f32.mrb[140].mxu1  ;;  %7043 = vmatmul.mubr.msk.f32.gmra.mrb[194].mxu1 %vm919_vm3, %v1785_v3 }
 0x22e   : > { %v1394_v44 = vmax.f32 %v1246_v38, %v1353_v11  ;;  %v1251_v63 = vadd.f32 %v8493_v59, %v1250_v10  ;;  %v6961_v50 = vpop.f32.mrb[141].mxu1  ;;  %7155 = vmatmul.mubr.msk.f32.gmra.mrb[22].mxu0 %vm919_vm3, %v8901_v43  ;;  %v1786_v30 = vrot.slane %v8897_v34, 1  ;;  %v2496_v20 = vrot.slane %v8897_v34, 2 }
 0x230   : > { %v8909_v7 = vmul.f32 %v1583_v52, %v1394_v44  ;;  %v1354_v31 = vmul.f32 0.2, %v1251_v63  ;;  %v1787_v46 = vsel %vm1736_vm4, %v1784_v36, %v1786_v30  ;;  %v8913_v27 = vsel %vm2446_vm5, %v2494_v57, %v2496_v20  ;;  %v1588_v52 = vpop.permute.xlu1 %1587 }
 0x231   : > { %10441 = vst [vmem:[#allocation48_spill] sm:$0xff] %v8913_v27  ;;  %v1255_v38 = vpop.f32.mrb[142].mxu1  ;;  %7045 = vmatprep.mubr.msk.f32.mxu1 %vm919_vm3, %v1787_v46  ;;  %7157 = vmatprep.mubr.msk.f32.mxu0 %vm919_vm3, %v8913_v27 }
 0x232   : > { %v1395_v50 = vmax.f32 %v1251_v63, %v1354_v31  ;;  %v1256_v11 = vadd.f32 %v8493_v59, %v1255_v38  ;;  %v6964_v3 = vpop.f32.mrb[143].mxu1  ;;  %v1788_v10 = vrot.slane %v8909_v7, 1  ;;  %v2498_v44 = vrot.slane %v8909_v7, 2 }
 0x234   : > { %v8921_v12 = vmul.f32 %v1588_v52, %v1395_v50  ;;  %v1355_v36 = vmul.f32 0.2, %v1256_v11  ;;  %v1789_v57 = vsel %vm1736_vm4, %v1786_v30, %v1788_v10  ;;  %v8925_v19 = vsel %vm2446_vm5, %v2496_v20, %v2498_v44  ;;  %v1593_v52 = vpop.permute.xlu0 %1592 }
 0x235   : > { %10442 = vst [vmem:[#allocation49_spill] sm:$0xff] %v8925_v19  ;;  %v1260_v46 = vpop.f32.mrb[144].mxu1  ;;  %7046 = vmatmul.mubr.msk.f32.gmra.mrb[196].mxu1 %vm919_vm3, %v1789_v57  ;;  %7158 = vmatmul.mubr.msk.f32.gmra.mrb[24].mxu0 %vm919_vm3, %v8925_v19 }
 0x236   : > { %v1396_v63 = vmax.f32 %v1256_v11, %v1355_v36  ;;  %v1261_v31 = vadd.f32 %v8493_v59, %v1260_v46  ;;  %v6967_v38 = vpop.f32.mrb[145].mxu1  ;;  %v1790_v3 = vrot.slane %v8921_v12, 1  ;;  %v2500_v50 = vrot.slane %v8921_v12, 2 }
 0x238   : > { %v8933_v23 = vmul.f32 %v1593_v52, %v1396_v63  ;;  %v1356_v30 = vmul.f32 0.2, %v1261_v31  ;;  %v1791_v20 = vsel %vm1736_vm4, %v1788_v10, %v1790_v3  ;;  %v8937_v33 = vsel %vm2446_vm5, %v2498_v44, %v2500_v50  ;;  %v1598_v52 = vpop.permute.xlu1 %1597  ;;  %v1603_v37 = vpop.permute.xlu0 %1602 }
 0x239   : > { %10443 = vst [vmem:[#allocation50_spill] sm:$0xff] %v8937_v33  ;;  %v1265_v57 = vpop.f32.mrb[146].mxu1  ;;  %7048 = vmatprep.mubr.msk.f32.mxu1 %vm919_vm3, %v1791_v20  ;;  %7160 = vmatprep.mubr.msk.f32.mxu0 %vm919_vm3, %v8937_v33 }
 0x23a   : > { %v1397_v11 = vmax.f32 %v1261_v31, %v1356_v30  ;;  %v1266_v36 = vadd.f32 %v8493_v59, %v1265_v57  ;;  %v6970_v46 = vpop.f32.mrb[147].mxu1  ;;  %v1792_v38 = vrot.slane %v8933_v23, 1  ;;  %v2502_v63 = vrot.slane %v8933_v23, 2 }
 0x23c   : > { %v8945_v42 = vmul.f32 %v1598_v52, %v1397_v11  ;;  %v1357_v10 = vmul.f32 0.2, %v1266_v36  ;;  %v1793_v44 = vsel %vm1736_vm4, %v1790_v3, %v1792_v38  ;;  %v8949_v0 = vsel %vm2446_vm5, %v2500_v50, %v2502_v63 }
 0x23d   : > { %10444 = vst [vmem:[#allocation51_spill] sm:$0xff] %v8949_v0  ;;  %v1270_v20 = vpop.f32.mrb[148].mxu1  ;;  %7049 = vmatmul.mubr.msk.f32.gmra.mrb[198].mxu1 %vm919_vm3, %v1793_v44  ;;  %7161 = vmatmul.mubr.msk.f32.gmra.mrb[26].mxu0 %vm919_vm3, %v8949_v0 }
 0x23e   : > { %v1398_v11 = vmax.f32 %v1266_v36, %v1357_v10  ;;  %v1271_v46 = vadd.f32 %v8493_v59, %v1270_v20  ;;  %v6973_v52 = vpop.f32.mrb[149].mxu1  ;;  %v1794_v3 = vrot.slane %v8945_v42, 1  ;;  %v2504_v50 = vrot.slane %v8945_v42, 2 }
 0x23f   : > { %v3222_v44 = vrot.slane %v8945_v42, 3  ;;  %v3650_v9 = vrot.slane %v8945_v42, 4  ;;  %v4368_v49 = vrot.slane %v8945_v42, 5  ;;  %v10446_v20 = vrot.slane %v8933_v23, 3 }
 0x240   : > { %v8964_v30 = vmul.f32 %v1603_v37, %v1398_v11  ;;  %v1358_v57 = vmul.f32 0.2, %v1271_v46  ;;  %v1795_v36 = vsel %vm1736_vm4, %v1792_v38, %v1794_v3  ;;  %v8968_v59 = vsel %vm2446_vm5, %v2502_v63, %v2504_v50 }
 0x241   : > { %10445 = vst [vmem:[#allocation52_spill] sm:$0xff] %v8968_v59  ;;  %v1275_v10 = vpop.f32.mrb[150].mxu1  ;;  %7051 = vmatprep.mubr.msk.f32.mxu1 %vm919_vm3, %v1795_v36  ;;  %7163 = vmatprep.mubr.msk.f32.mxu0 %vm919_vm3, %v8968_v59  ;;  %v8976_v52 = vsel %vm3168_vm6, %v10446_v20, %v3222_v44  ;;  %v10448_v37 = vrot.slane %v8933_v23, 4  ;;  %v10450_v38 = vrot.slane %v8933_v23, 5  ;;  %v4797_v36 = vrot.slane %v8945_v42, 6 }
 0x242   : > { %10447 = vst [vmem:[#allocation53_spill] sm:$0xff] %v8976_v52  ;;  %v1399_v31 = vmax.f32 %v1271_v46, %v1358_v57  ;;  %v1276_v20 = vadd.f32 %v8992_v29, %v1275_v10  ;;  %v6976_v52 = vpop.f32.mrb[151].mxu1  ;;  %v1796_v6 = vrot.slane %v8964_v30, 1  ;;  %v3224_v56 = vrot.slane %v8964_v30, 3 }
 0x243   : > { %v8981_v11 = vsel %vm541_vm0, %v10448_v37, %v3650_v9  ;;  %v8986_v63 = vsel %vm4318_vm7, %v10450_v38, %v4368_v49  ;;  %v2506_v37 = vrot.slane %v8964_v30, 2  ;;  %v3652_v38 = vrot.slane %v8964_v30, 4 }
 0x244   : > { %10449 = vst [vmem:[#allocation54_spill] sm:$0xff] %v8981_v11  ;;  %10451 = vst [vmem:[#allocation55_spill] sm:$0xff] %v8986_v63  ;;  %v1608_v11 = vpop.permute.xlu1 %1607  ;;  %v4370_v63 = vrot.slane %v8964_v30, 5  ;;  %v10452_v57 = vrot.slane %v8933_v23, 6  ;;  %v1359_v10 = vmul.f32 0.2, %v1276_v20  ;;  %v1797_v52 = vsel %vm1736_vm4, %v1794_v3, %v1796_v6 }
 0x245   : > { %v9005_v59 = vmul.f32 %v1608_v11, %v1399_v31  ;;  %v9009_v0 = vsel %vm2446_vm5, %v2504_v50, %v2506_v37  ;;  %v1280_v33 = vpop.f32.mrb[152].mxu1  ;;  %7052 = vmatmul.mubr.msk.f32.gmra.mrb[200].mxu1 %vm919_vm3, %v1797_v52  ;;  %v9015_v19 = vsel %vm3168_vm6, %v3222_v44, %v3224_v56  ;;  %v4799_v3 = vrot.slane %v8964_v30, 6 }
 0x246   : > { %v9003_v46 = vsel %vm4747_vm8, %v10452_v57, %v4797_v36  ;;  %10454 = vst [vmem:[#allocation57_spill] sm:$0xff] %v9009_v0  ;;  %7164 = vmatmul.mubr.msk.f32.gmra.mrb[28].mxu0 %vm919_vm3, %v9009_v0  ;;  %10455 = vst [vmem:[#allocation58_spill] sm:$0xff] %v9015_v19  ;;  %v9018_v57 = vsel %vm541_vm0, %v3650_v9, %v3652_v38  ;;  %v9021_v31 = vsel %vm4318_vm7, %v4368_v49, %v4370_v63  ;;  %v1613_v0 = vpop.permute.xlu0 %1612 }
 0x247   : > { %10453 = vst [vmem:[#allocation56_spill] sm:$0xff] %v9003_v46  ;;  %10456 = vst [vmem:[#allocation59_spill] sm:$0xff] %v9018_v57  ;;  %v1400_v11 = vmax.f32 %v1276_v20, %v1359_v10  ;;  %v1281_v50 = vadd.f32 %v8992_v29, %v1280_v33  ;;  %v6979_v46 = vpop.f32.mrb[153].mxu1  ;;  %v1798_v52 = vrot.slane %v9005_v59, 1  ;;  %v2508_v27 = vrot.slane %v9005_v59, 2 }
 0x248   : > { %10457 = vst [vmem:[#allocation60_spill] sm:$0xff] %v9021_v31  ;;  %v3226_v44 = vrot.slane %v9005_v59, 3  ;;  %v3654_v19 = vrot.slane %v9005_v59, 4  ;;  %v4372_v9 = vrot.slane %v9005_v59, 5  ;;  %v9031_v49 = vsel %vm4747_vm8, %v4797_v36, %v4799_v3 }
 0x249   : > { %10458 = vst [vmem:[#allocation61_spill] sm:$0xff] %v9031_v49  ;;  %v9033_v31 = vmul.f32 %v1613_v0, %v1400_v11  ;;  %v1360_v20 = vmul.f32 0.2, %v1281_v50  ;;  %v1799_v33 = vsel %vm1736_vm4, %v1796_v6, %v1798_v52  ;;  %v9037_v46 = vsel %vm2446_vm5, %v2506_v37, %v2508_v27  ;;  %v1285_v10 = vpop.f32.mrb[154].mxu1 }
 0x24a   : > { %10460 = vst [vmem:[#allocation63_spill] sm:$0xff] %v9037_v46  ;;  %7054 = vmatprep.mubr.msk.f32.mxu1 %vm919_vm3, %v1799_v33  ;;  %7166 = vmatprep.mubr.msk.f32.mxu0 %vm919_vm3, %v9037_v46  ;;  %v9043_v57 = vsel %vm3168_vm6, %v3224_v56, %v3226_v44  ;;  %v9046_v36 = vsel %vm541_vm0, %v3652_v38, %v3654_v19  ;;  %v4801_v6 = vrot.slane %v9005_v59, 6  ;;  %v6982_v49 = vpop.f32.mrb[155].mxu1  ;;  %v1618_v46 = vpop.permute.xlu1 %1617 }
 0x24b   : > { %10459 = vst [vmem:[#allocation62_spill] sm:$0xff] %v9033_v31  ;;  %10461 = vst [vmem:[#allocation64_spill] sm:$0xff] %v9043_v57  ;;  %v9049_v0 = vsel %vm4318_vm7, %v4370_v63, %v4372_v9  ;;  %v1401_v11 = vmax.f32 %v1281_v50, %v1360_v20  ;;  %v1286_v37 = vadd.f32 %v8992_v29, %v1285_v10  ;;  %v1800_v33 = vrot.slane %v9033_v31, 1 }
 0x24c   : > { %10462 = vst [vmem:[#allocation65_spill] sm:$0xff] %v9046_v36  ;;  %10463 = vst [vmem:[#allocation66_spill] sm:$0xff] %v9049_v0  ;;  %v2510_v43 = vrot.slane %v9033_v31, 2  ;;  %v3228_v56 = vrot.slane %v9033_v31, 3  ;;  %v3656_v57 = vrot.slane %v9033_v31, 4  ;;  %v4374_v38 = vrot.slane %v9033_v31, 5 }
 0x24d   : > { %v9059_v63 = vsel %vm4747_vm8, %v4799_v3, %v4801_v6  ;;  %v9061_v0 = vmul.f32 %v1618_v46, %v1401_v11  ;;  %v1361_v50 = vmul.f32 0.2, %v1286_v37  ;;  %v1801_v20 = vsel %vm1736_vm4, %v1798_v52, %v1800_v33  ;;  %v1290_v10 = vpop.f32.mrb[156].mxu1 }
 0x24e   : > { %10464 = vst [vmem:[#allocation67_spill] sm:$0xff] %v9059_v63  ;;  %v9065_v49 = vsel %vm2446_vm5, %v2508_v27, %v2510_v43  ;;  %7055 = vmatmul.mubr.msk.f32.gmra.mrb[202].mxu1 %vm919_vm3, %v1801_v20  ;;  %v9071_v36 = vsel %vm3168_vm6, %v3226_v44, %v3228_v56  ;;  %v9074_v3 = vsel %vm541_vm0, %v3654_v19, %v3656_v57  ;;  %v4803_v52 = vrot.slane %v9033_v31, 6  ;;  %v6985_v63 = vpop.f32.mrb[157].mxu1 }
 0x24f   : > { %10465 = vst [vmem:[#allocation68_spill] sm:$0xff] %v9061_v0  ;;  %10466 = vst [vmem:[#allocation69_spill] sm:$0xff] %v9065_v49  ;;  %7167 = vmatmul.mubr.msk.f32.gmra.mrb[30].mxu0 %vm919_vm3, %v9065_v49  ;;  %v9077_v46 = vsel %vm4318_vm7, %v4372_v9, %v4374_v38  ;;  %v1402_v11 = vmax.f32 %v1286_v37, %v1361_v50  ;;  %v1291_v27 = vadd.f32 %v8992_v29, %v1290_v10  ;;  %v1623_v49 = vpop.permute.xlu0 %1622 }
 0x250   : > { %10467 = vst [vmem:[#allocation70_spill] sm:$0xff] %v9071_v36  ;;  %10468 = vst [vmem:[#allocation71_spill] sm:$0xff] %v9074_v3  ;;  %v1802_v20 = vrot.slane %v9061_v0, 1  ;;  %v2512_v45 = vrot.slane %v9061_v0, 2  ;;  %v3230_v44 = vrot.slane %v9061_v0, 3  ;;  %v3658_v36 = vrot.slane %v9061_v0, 4 }
 0x251   : > { %10469 = vst [vmem:[#allocation72_spill] sm:$0xff] %v9077_v46  ;;  %v4376_v19 = vrot.slane %v9061_v0, 5  ;;  %v9087_v9 = vsel %vm4747_vm8, %v4801_v6, %v4803_v52  ;;  %v9089_v46 = vmul.f32 %v1623_v49, %v1402_v11  ;;  %v1362_v37 = vmul.f32 0.2, %v1291_v27  ;;  %v1295_v10 = vpop.f32.mrb[158].mxu1 }
 0x252   : > { %10470 = vst [vmem:[#allocation73_spill] sm:$0xff] %v9087_v9  ;;  %v1803_v50 = vsel %vm1736_vm4, %v1800_v33, %v1802_v20  ;;  %v9093_v63 = vsel %vm2446_vm5, %v2510_v43, %v2512_v45  ;;  %v9099_v3 = vsel %vm3168_vm6, %v3228_v56, %v3230_v44  ;;  %v9102_v6 = vsel %vm541_vm0, %v3656_v57, %v3658_v36  ;;  %v6988_v9 = vpop.f32.mrb[159].mxu1 }
 0x253   : > { %10471 = vst [vmem:[#allocation74_spill] sm:$0xff] %v9089_v46  ;;  %10472 = vst [vmem:[#allocation75_spill] sm:$0xff] %v9093_v63  ;;  %7057 = vmatprep.mubr.msk.f32.mxu1 %vm919_vm3, %v1803_v50  ;;  %7169 = vmatprep.mubr.msk.f32.mxu0 %vm919_vm3, %v9093_v63  ;;  %v9105_v49 = vsel %vm4318_vm7, %v4374_v38, %v4376_v19  ;;  %v4805_v33 = vrot.slane %v9061_v0, 6  ;;  %v1403_v11 = vmax.f32 %v1291_v27, %v1362_v37  ;;  %v1628_v63 = vpop.permute.xlu1 %1627 }
 0x254   : > { %10473 = vst [vmem:[#allocation76_spill] sm:$0xff] %v9099_v3  ;;  %10474 = vst [vmem:[#allocation77_spill] sm:$0xff] %v9102_v6  ;;  %v1296_v43 = vadd.f32 %v8992_v29, %v1295_v10  ;;  %v1804_v50 = vrot.slane %v9089_v46, 1  ;;  %v2514_v2 = vrot.slane %v9089_v46, 2  ;;  %v3232_v56 = vrot.slane %v9089_v46, 3 }
 0x255   : > { %10475 = vst [vmem:[#allocation78_spill] sm:$0xff] %v9105_v49  ;;  %v3660_v3 = vrot.slane %v9089_v46, 4  ;;  %v4378_v57 = vrot.slane %v9089_v46, 5  ;;  %v9115_v38 = vsel %vm4747_vm8, %v4803_v52, %v4805_v33  ;;  %v9117_v49 = vmul.f32 %v1628_v63, %v1403_v11  ;;  %v1300_v10 = vpop.f32.mrb[160].mxu1 }
 0x256   : > { %10476 = vst [vmem:[#allocation79_spill] sm:$0xff] %v9115_v38  ;;  %v1363_v27 = vmul.f32 0.2, %v1296_v43  ;;  %v1805_v37 = vsel %vm1736_vm4, %v1802_v20, %v1804_v50  ;;  %v9121_v9 = vsel %vm2446_vm5, %v2512_v45, %v2514_v2  ;;  %v9127_v6 = vsel %vm3168_vm6, %v3230_v44, %v3232_v56  ;;  %v6991_v38 = vpop.f32.mrb[161].mxu1 }
 0x257   : > { %10477 = vst [vmem:[#allocation80_spill] sm:$0xff] %v9121_v9  ;;  %7058 = vmatmul.mubr.msk.f32.gmra.mrb[204].mxu1 %vm919_vm3, %v1805_v37  ;;  %7170 = vmatmul.mubr.msk.f32.gmra.mrb[32].mxu0 %vm919_vm3, %v9121_v9  ;;  %10478 = vst [vmem:[#allocation81_spill] sm:$0xff] %v9127_v6  ;;  %v9130_v52 = vsel %vm541_vm0, %v3658_v36, %v3660_v3  ;;  %v9133_v63 = vsel %vm4318_vm7, %v4376_v19, %v4378_v57  ;;  %v4807_v20 = vrot.slane %v9089_v46, 6  ;;  %v1633_v9 = vpop.permute.xlu0 %1632  ;;  %v1638_v16 = vpop.permute.xlu1 %1637 }
 0x258   : > { %10479 = vst [vmem:[#allocation82_spill] sm:$0xff] %v9130_v52  ;;  %10480 = vst [vmem:[#allocation83_spill] sm:$0xff] %v9133_v63  ;;  %v1404_v11 = vmax.f32 %v1296_v43, %v1363_v27  ;;  %v1301_v45 = vadd.f32 %v8992_v29, %v1300_v10  ;;  %v1806_v37 = vrot.slane %v9117_v49, 1  ;;  %v2516_v0 = vrot.slane %v9117_v49, 2 }
 0x259   : > { %v3234_v44 = vrot.slane %v9117_v49, 3  ;;  %v3662_v6 = vrot.slane %v9117_v49, 4  ;;  %v4380_v36 = vrot.slane %v9117_v49, 5  ;;  %v9143_v19 = vsel %vm4747_vm8, %v4805_v33, %v4807_v20  ;;  %v1305_v27 = vpop.f32.mrb[162].mxu1 }
 0x25a   : > { %10481 = vst [vmem:[#allocation84_spill] sm:$0xff] %v9143_v19  ;;  %v1691_v63 = vmul.f32 %v1633_v9, %v1404_v11  ;;  %v1364_v52 = vmul.f32 0.2, %v1301_v45  ;;  %v1807_v43 = vsel %vm1736_vm4, %v1804_v50, %v1806_v37  ;;  %v9147_v38 = vsel %vm2446_vm5, %v2514_v2, %v2516_v0  ;;  %v6994_v11 = vpop.f32.mrb[163].mxu1 }
 0x25b   : > { %10482 = vst [vmem:[#allocation85_spill] sm:$0xff] %v9147_v38  ;;  %7060 = vmatprep.mubr.msk.f32.mxu1 %vm919_vm3, %v1807_v43  ;;  %7172 = vmatprep.mubr.msk.f32.mxu0 %vm919_vm3, %v9147_v38  ;;  %v9153_v10 = vsel %vm3168_vm6, %v3232_v56, %v3234_v44  ;;  %v9156_v46 = vsel %vm541_vm0, %v3660_v3, %v3662_v6  ;;  %v4809_v50 = vrot.slane %v9117_v49, 6  ;;  %v1643_v11 = vpop.permute.xlu0 %1642 }
 0x25c   : > { %10483 = vst [vmem:[#allocation86_spill] sm:$0xff] %v9156_v46  ;;  %v9159_v33 = vsel %vm4318_vm7, %v4378_v57, %v4380_v36  ;;  %v1405_v9 = vmax.f32 %v1301_v45, %v1364_v52  ;;  %v1306_v2 = vadd.f32 %v8992_v29, %v1305_v27  ;;  %v1808_v19 = vrot.slane %v1691_v63, 1 }
 0x25d   : > { %10484 = vst [vmem:[#allocation87_spill] sm:$0xff] %v9159_v33  ;;  %v2518_v43 = vrot.slane %v1691_v63, 2  ;;  %v3236_v31 = vrot.slane %v1691_v63, 3  ;;  %v3664_v38 = vrot.slane %v1691_v63, 4  ;;  %v4382_v13 = vrot.slane %v1691_v63, 5  ;;  %v1310_v52 = vpop.f32.mrb[164].mxu1 }
 0x25e   : > { %v9164_v56 = vsel %vm4747_vm8, %v4807_v20, %v4809_v50  ;;  %v1692_v3 = vmul.f32 %v1638_v16, %v1405_v9  ;;  %v1365_v46 = vmul.f32 0.2, %v1306_v2  ;;  %v1809_v57 = vsel %vm1736_vm4, %v1806_v37, %v1808_v19  ;;  %v6997_v19 = vpop.f32.mrb[165].mxu1 }
 0x25f   : > { %10485 = vst [vmem:[#allocation88_spill] sm:$0xff] %v9164_v56  ;;  %v9168_v33 = vsel %vm2446_vm5, %v2516_v0, %v2518_v43  ;;  %7061 = vmatmul.mubr.msk.f32.gmra.mrb[206].mxu1 %vm919_vm3, %v1809_v57  ;;  %v9174_v45 = vsel %vm3168_vm6, %v3234_v44, %v3236_v31  ;;  %v9177_v27 = vsel %vm541_vm0, %v3662_v6, %v3664_v38  ;;  %v4811_v20 = vrot.slane %v1691_v63, 6 }
 0x260   : > { %7173 = vmatmul.mubr.msk.f32.gmra.mrb[34].mxu0 %vm919_vm3, %v9168_v33  ;;  %v9180_v16 = vsel %vm4318_vm7, %v4380_v36, %v4382_v13  ;;  %v1406_v37 = vmax.f32 %v1306_v2, %v1365_v46  ;;  %v1311_v0 = vadd.f32 %v8992_v29, %v1310_v52  ;;  %7086 = vmatprep.mubr.msk.f32.mxu1 %vm919_vm3, %v8712_v26  ;;  %v2877_v9 = vrot.slane %v1692_v3, 2  ;;  %v9196_v52 = vld [vmem:[%s10347_s6 + $0x28] sm:$0xff] }
 0x261   : > { %10486 = vst [vmem:[#allocation89_spill] sm:$0xff] %v9180_v16  ;;  %7177 = vmatprep.mubr.msk.f32.mxu0 %vm919_vm3, %v8525_v54  ;;  %v3238_v44 = vrot.slane %v1692_v3, 3  ;;  %v3666_v57 = vrot.slane %v1692_v3, 4  ;;  %v4384_v6 = vrot.slane %v1692_v3, 5  ;;  %v9188_v56 = vsel %vm4747_vm8, %v4809_v50, %v4811_v20  ;;  %v1315_v19 = vpop.f32.mrb[166].mxu1  ;;  %v1648_v16 = vpop.permute.xlu1 %1647 }
 0x262   : > { %10487 = vst [vmem:[#allocation90_spill] sm:$0xff] %v9188_v56  ;;  %v4813_v36 = vrot.slane %v1692_v3, 6  ;;  %v1693_v63 = vmul.f32 %v1643_v11, %v1406_v37  ;;  %v1366_v46 = vmul.f32 0.2, %v1311_v0  ;;  %v9191_v2 = vsel %vm2446_vm5, %v2518_v43, %v2877_v9  ;;  %v7000_v11 = vpop.f32.mrb[167].mxu1 }
 0x263   : > { %v9199_v54 = vsel %vm3168_vm6, %v3236_v31, %v3238_v44  ;;  %7087 = vmatmul.mubr.msk.f32.vlgmr.msra.gmra.mrb[186].mxu1 %vm919_vm3, %v8753_v41  ;;  %v9206_v50 = vsel %vm541_vm0, %v3664_v38, %v3666_v57  ;;  %v9209_v43 = vsel %vm4318_vm7, %v4382_v13, %v4384_v6  ;;  %v1316_v31 = vadd.f32 %v8992_v29, %v1315_v19  ;;  %v1653_v11 = vpop.permute.xlu0 %1652 }
 0x264   : > { %7178 = vmatmul.mubr.msk.f32.vlgmr.msra.gmra.mrb[0].mxu0 %vm919_vm3, %v8538_v1  ;;  %v9212_v3 = vsel %vm4747_vm8, %v4811_v20, %v4813_v36  ;;  %v1407_v37 = vmax.f32 %v1311_v0, %v1366_v46  ;;  %7089 = vmatprep.mubr.msk.f32.mxu1 %vm919_vm3, %v8764_v15  ;;  %v2879_v56 = vrot.slane %v1693_v63, 2  ;;  %v3240_v1 = vrot.slane %v1693_v63, 3 }
 0x265   : > { %7232 = vmatpush3.msra.mxu0 %v8724_v28  ;;  %7180 = vmatprep.mubr.msk.f32.mxu0 %vm919_vm3, %v8551_v25  ;;  %v3668_v13 = vrot.slane %v1693_v63, 4  ;;  %v4386_v38 = vrot.slane %v1693_v63, 5  ;;  %v4815_v20 = vrot.slane %v1693_v63, 6  ;;  %v1367_v46 = vmul.f32 0.2, %v1316_v31  ;;  %v1320_v25 = vpop.f32.mrb[168].mxu1 }
 0x266   : > { %7287 = vmatprep.subr.mxu0 %v9196_v52  ;;  %v1694_v0 = vmul.f32 %v1648_v16, %v1407_v37  ;;  %v9222_v29 = vsel %vm2446_vm5, %v2877_v9, %v2879_v56  ;;  %v9225_v28 = vsel %vm3168_vm6, %v3238_v44, %v3240_v1  ;;  %v7003_v9 = vpop.f32.mrb[169].mxu1 }
 0x267   : > { %7090 = vmatmul.mubr.msk.f32.gmra.mrb[188].mxu1 %vm919_vm3, %v8774_v61  ;;  %v9232_v19 = vsel %vm541_vm0, %v3666_v57, %v3668_v13  ;;  %v9235_v63 = vsel %vm4318_vm7, %v4384_v6, %v4386_v38  ;;  %v9238_v16 = vsel %vm4747_vm8, %v4813_v36, %v4815_v20  ;;  %v1408_v56 = vmax.f32 %v1316_v31, %v1367_v46  ;;  %v10507_v9 = vld [vmem:[#allocation80_spill] sm:$0xff] }
 0x268   : > { %7181 = vmatmul.mubr.msk.f32.gmra.mrb[2].mxu0 %vm919_vm3, %v8570_v47  ;;  %7092 = vmatprep.mubr.msk.f32.mxu1 %vm919_vm3, %v8784_v53  ;;  %v4027_v44 = vrot.slane %v1694_v0, 4  ;;  %v4388_v47 = vrot.slane %v1694_v0, 5  ;;  %v4817_v37 = vrot.slane %v1694_v0, 6 }
 0x269   : > { %7183 = vmatprep.mubr.msk.f32.mxu0 %vm919_vm3, %v8589_v5  ;;  %v1695_v57 = vmul.f32 %v1653_v11, %v1408_v56  ;;  %v1324_v5 = vpop.f32.mrb[170].mxu1  ;;  %v10506_v56 = vld [vmem:[#allocation75_spill] sm:$0xff]  ;;  %v9365_v11 = vld [vmem:[%s10347_s6 + $0x30] sm:$0xff] }
 0x26a   : > { %v9245_v1 = vsel %vm541_vm0, %v3668_v13, %v4027_v44  ;;  %v9248_v6 = vsel %vm4318_vm7, %v4386_v38, %v4388_v47  ;;  %v9251_v36 = vsel %vm4747_vm8, %v4815_v20, %v4817_v37  ;;  %v7006_v31 = vpop.f32.mrb[171].mxu1  ;;  %v10512_v5 = vld [vmem:[#allocation4_spill] sm:$0xff] }
 0x26b   : > { %10488 = vst [vmem:[#allocation91_spill] sm:$0xff] %v9251_v36  ;;  %7093 = vmatmul.mubr.msk.f32.gmra.mrb[190].mxu1 %vm919_vm3, %v8794_v39  ;;  %v4029_v13 = vrot.slane %v1695_v57, 4  ;;  %v4390_v38 = vrot.slane %v1695_v57, 5  ;;  %v4819_v0 = vrot.slane %v1695_v57, 6 }
 0x26c   : > { %7184 = vmatmul.mubr.msk.f32.gmra.mrb[4].mxu0 %vm919_vm3, %v8608_v35  ;;  %7095 = vmatprep.mubr.msk.f32.mxu1 %vm919_vm3, %v8806_v62  ;;  %v10490_v35 = vld [vmem:[#allocation43_spill] sm:$0xff] }
 0x26d   : > { %7186 = vmatprep.mubr.msk.f32.mxu0 %vm919_vm3, %v8627_v14  ;;  %v9262_v20 = vsel %vm541_vm0, %v4027_v44, %v4029_v13  ;;  %v9265_v46 = vsel %vm4318_vm7, %v4388_v47, %v4390_v38  ;;  %v9268_v25 = vsel %vm4747_vm8, %v4817_v37, %v4819_v0  ;;  %v10491_v14 = vld [vmem:[#allocation62_spill] sm:$0xff]  ;;  %v10508_v44 = vld [vmem:[#allocation85_spill] sm:$0xff] }
 0x26e   : > { %10489 = vst [vmem:[#allocation92_spill] sm:$0xff] %v9268_v25  ;;  %v10509_v47 = vld [vmem:[#allocation2_spill] sm:$0xff] }
 0x26f   : > { %7096 = vmatmul.mubr.msk.f32.gmra.mrb[192].mxu1 %vm919_vm3, %v8826_v32  ;;  %v10518_v38 = vld [vmem:[#allocation18_spill] sm:$0xff] }
 0x270   : > { %7187 = vmatmul.mubr.msk.f32.gmra.mrb[6].mxu0 %vm919_vm3, %v8646_v24  ;;  %7098 = vmatprep.mubr.msk.f32.mxu1 %vm919_vm3, %v8844_v55  ;;  %v10492_v24 = vld [vmem:[#allocation44_spill] sm:$0xff]  ;;  %v10519_v0 = vld [vmem:[#allocation22_spill] sm:$0xff] }
 0x271   : > { %7189 = vmatprep.mubr.msk.f32.mxu0 %vm919_vm3, %v8665_v58  ;;  %v10494_v58 = vld [vmem:[#allocation45_spill] sm:$0xff]  ;;  %v9641_v25 = vld [vmem:[%s10347_s6 + $0x40] sm:$0xff] }
 0x273   : > { %7099 = vmatmul.mubr.msk.f32.gmra.mrb[194].mxu1 %vm919_vm3, %v8862_v17 }
 0x274   : > { %7190 = vmatmul.mubr.msk.f32.gmra.mrb[8].mxu0 %vm919_vm3, %v8686_v22  ;;  %7101 = vmatprep.mubr.msk.f32.mxu1 %vm919_vm3, %v8880_v18  ;;  %v10495_v22 = vld [vmem:[#allocation74_spill] sm:$0xff] }
 0x275   : > { %7192 = vmatprep.mubr.msk.f32.mxu0 %vm919_vm3, %v8718_v48  ;;  %v10496_v48 = vld [vmem:[#allocation46_spill] sm:$0xff] }
 0x277   : > { %7102 = vmatmul.mubr.msk.f32.gmra.mrb[196].mxu1 %vm919_vm3, %v8897_v34 }
 0x278   : > { %7193 = vmatmul.mubr.msk.f32.gmra.mrb[10].mxu0 %vm919_vm3, %v8813_v21  ;;  %7104 = vmatprep.mubr.msk.f32.mxu1 %vm919_vm3, %v8909_v7  ;;  %v10497_v21 = vld [vmem:[#allocation47_spill] sm:$0xff] }
 0x279   : > { %7195 = vmatprep.mubr.msk.f32.mxu0 %vm919_vm3, %v8821_v4  ;;  %v10498_v4 = vld [vmem:[#allocation48_spill] sm:$0xff] }
 0x27b   : > { %7105 = vmatmul.mubr.msk.f32.gmra.mrb[198].mxu1 %vm919_vm3, %v8921_v12 }
 0x27c   : > { %7196 = vmatmul.mubr.msk.f32.gmra.mrb[12].mxu0 %vm919_vm3, %v8831_v8  ;;  %7107 = vmatprep.mubr.msk.f32.mxu1 %vm919_vm3, %v8933_v23  ;;  %v10499_v8 = vld [vmem:[#allocation49_spill] sm:$0xff] }
 0x27d   : > { %7198 = vmatprep.mubr.msk.f32.mxu0 %vm919_vm3, %v8834_v60  ;;  %v10500_v60 = vld [vmem:[#allocation50_spill] sm:$0xff] }
 0x27f   : > { %7108 = vmatmul.mubr.msk.f32.gmra.mrb[200].mxu1 %vm919_vm3, %v8945_v42  ;;  %v10493_v42 = vld [vmem:[#allocation68_spill] sm:$0xff] }
 0x280   : > { %7199 = vmatmul.mubr.msk.f32.gmra.mrb[14].mxu0 %vm919_vm3, %v8849_v51  ;;  %7110 = vmatprep.mubr.msk.f32.mxu1 %vm919_vm3, %v8964_v30  ;;  %v10501_v51 = vld [vmem:[#allocation51_spill] sm:$0xff]  ;;  %v10503_v30 = vld [vmem:[#allocation57_spill] sm:$0xff] }
 0x281   : > { %7201 = vmatprep.mubr.msk.f32.mxu0 %vm919_vm3, %v8857_v40  ;;  %v10502_v40 = vld [vmem:[#allocation52_spill] sm:$0xff] }
 0x283   : > { %7111 = vmatmul.mubr.msk.f32.gmra.mrb[202].mxu1 %vm919_vm3, %v9005_v59  ;;  %v10504_v59 = vld [vmem:[#allocation63_spill] sm:$0xff] }
 0x284   : > { %7202 = vmatmul.mubr.msk.f32.gmra.mrb[16].mxu0 %vm919_vm3, %v10490_v35  ;;  %7113 = vmatprep.mubr.msk.f32.mxu1 %vm919_vm3, %v10491_v14  ;;  %v10521_v35 = vld [vmem:[#allocation30_spill] sm:$0xff] }
 0x285   : > { %7204 = vmatprep.mubr.msk.f32.mxu0 %vm919_vm3, %v10492_v24  ;;  %v3192_v24 = vrot.slane %v8712_v26, 3 }
 0x287   : > { %7114 = vmatmul.mubr.msk.f32.gmra.mrb[204].mxu1 %vm919_vm3, %v10493_v42 }
 0x288   : > { %7205 = vmatmul.mubr.msk.f32.gmra.mrb[18].mxu0 %vm919_vm3, %v10494_v58  ;;  %7116 = vmatprep.mubr.msk.f32.mxu1 %vm919_vm3, %v10495_v22  ;;  %v10524_v58 = vld [vmem:[#allocation35_spill] sm:$0xff]  ;;  %v3194_v22 = vrot.slane %v8753_v41, 3 }
 0x289   : > { %7207 = vmatprep.mubr.msk.f32.mxu0 %vm919_vm3, %v10496_v48  ;;  %v10525_v48 = vld [vmem:[#allocation39_spill] sm:$0xff] }
 0x28b   : > { %7117 = vmatmul.mubr.msk.f32.gmra.mrb[206].mxu1 %vm919_vm3, %v9117_v49  ;;  %v10505_v49 = vld [vmem:[#allocation69_spill] sm:$0xff] }
 0x28c   : > { %7208 = vmatmul.mubr.msk.f32.gmra.mrb[20].mxu0 %vm919_vm3, %v10497_v21  ;;  %v10526_v21 = vld [vmem:[#allocation34_spill] sm:$0xff] }
 0x28d   : > { %7210 = vmatprep.mubr.msk.f32.mxu0 %vm919_vm3, %v10498_v4  ;;  %v10527_v4 = vrot.slane %v10526_v21, 3 }
 0x290   : > { %7211 = vmatmul.mubr.msk.f32.gmra.mrb[22].mxu0 %vm919_vm3, %v10499_v8  ;;  %v3193_v8 = vsel %vm3168_vm6, %v10527_v4, %v3192_v24  ;;  %v3214_v4 = vrot.slane %v8897_v34, 3 }
 0x291   : > { %7213 = vmatprep.mubr.msk.f32.mxu0 %vm919_vm3, %v10500_v60  ;;  %v3196_v60 = vrot.slane %v8764_v15, 3 }
 0x294   : > { %7214 = vmatmul.mubr.msk.f32.gmra.mrb[24].mxu0 %vm919_vm3, %v10501_v51  ;;  %v3195_v51 = vsel %vm3168_vm6, %v3192_v24, %v3194_v22  ;;  %v3210_v24 = vrot.slane %v8862_v17, 3 }
 0x295   : > { %7216 = vmatprep.mubr.msk.f32.mxu0 %vm919_vm3, %v10502_v40  ;;  %v3198_v40 = vrot.slane %v8774_v61, 3 }
 0x298   : > { %7217 = vmatmul.mubr.msk.f32.gmra.mrb[26].mxu0 %vm919_vm3, %v10503_v30 }
 0x299   : > { %7219 = vmatprep.mubr.msk.f32.mxu0 %vm919_vm3, %v10504_v59  ;;  %v3197_v59 = vsel %vm3168_vm6, %v3194_v22, %v3196_v60  ;;  %v3212_v22 = vrot.slane %v8880_v18, 3 }
 0x29c   : > { %7220 = vmatmul.mubr.msk.f32.gmra.mrb[28].mxu0 %vm919_vm3, %v10505_v49  ;;  %v3200_v49 = vrot.slane %v8784_v53, 3 }
 0x29d   : > { %7222 = vmatprep.mubr.msk.f32.mxu0 %vm919_vm3, %v10506_v56 }
 0x2a0   : > { %7223 = vmatmul.mubr.msk.f32.gmra.mrb[30].mxu0 %vm919_vm3, %v10507_v9  ;;  %v3199_v9 = vsel %vm3168_vm6, %v3196_v60, %v3198_v40  ;;  %v3213_v60 = vsel %vm3168_vm6, %v3210_v24, %v3212_v22 }
 0x2a1   : > { %7225 = vmatprep.mubr.msk.f32.mxu0 %vm919_vm3, %v10508_v44  ;;  %v3202_v44 = vrot.slane %v8794_v39, 3 }
 0x2a4   : > { %7226 = vmatmul.mubr.msk.f32.gmra.mrb[32].mxu0 %vm919_vm3, %v9168_v33  ;;  %v10513_v33 = vld [vmem:[#allocation6_spill] sm:$0xff] }
 0x2a5   : > { %7228 = vmatprep.mubr.msk.f32.mxu0 %vm919_vm3, %v9191_v2  ;;  %v10514_v2 = vld [vmem:[#allocation10_spill] sm:$0xff] }
 0x2a8   : > { %7229 = vmatmul.mubr.msk.f32.gmra.mrb[34].mxu0 %vm919_vm3, %v9222_v29  ;;  %v9360_v37 = vpop.f32.mrb[172].mxu1  ;;  %v10515_v29 = vld [vmem:[#allocation14_spill] sm:$0xff] }
 0x2a9   : > { %7233 = vmatprep.mubr.msk.f32.mxu0 %vm919_vm3, %v10509_v47  ;;  %10510 = vst [vmem:[#allocation43_spill] sm:$0xff] %v9360_v37  ;;  %v9367_v57 = vpop.f32.mrb[173].mxu1  ;;  %v3201_v47 = vsel %vm3168_vm6, %v3198_v40, %v3200_v49 }
 0x2aa   : > { %10511 = vst [vmem:[#allocation62_spill] sm:$0xff] %v9367_v57 }
 0x2ac   : > { %7234 = vmatmul.mubr.msk.f32.vlgmr.msra.gmra.mrb[0].mxu0 %vm919_vm3, %v10512_v5  ;;  %v3204_v5 = vrot.slane %v8806_v62, 3 }
 0x2ad   : > { %7288 = vmatpush3.msra.mxu0 %v9196_v52  ;;  %7236 = vmatprep.mubr.msk.f32.mxu0 %vm919_vm3, %v10513_v33  ;;  %v10520_v52 = vld [vmem:[#allocation26_spill] sm:$0xff]  ;;  %v3203_v33 = vsel %vm3168_vm6, %v3200_v49, %v3202_v44  ;;  %v3218_v49 = vrot.slane %v8921_v12, 3 }
 0x2ae   : > { %7343 = vmatprep.subr.mxu0 %v9365_v11 }
 0x2b0   : > { %7237 = vmatmul.mubr.msk.f32.gmra.mrb[2].mxu0 %vm919_vm3, %v10514_v2  ;;  %v9379_v31 = vpop.f32.mrb[174].mxu1  ;;  %v3206_v2 = vrot.slane %v8826_v32, 3 }
 0x2b1   : > { %7239 = vmatprep.mubr.msk.f32.mxu0 %vm919_vm3, %v10515_v29  ;;  %10516 = vst [vmem:[#allocation44_spill] sm:$0xff] %v9379_v31  ;;  %v9381_v13 = vpop.f32.mrb[175].mxu1  ;;  %v10562_v31 = vld [vmem:[#allocation86_spill] sm:$0xff] }
 0x2b2   : > { %10517 = vst [vmem:[#allocation68_spill] sm:$0xff] %v9381_v13  ;;  %v10561_v13 = vld [vmem:[#allocation82_spill] sm:$0xff] }
 0x2b4   : > { %7240 = vmatmul.mubr.msk.f32.gmra.mrb[4].mxu0 %vm919_vm3, %v10518_v38  ;;  %v3205_v38 = vsel %vm3168_vm6, %v3202_v44, %v3204_v5 }
 0x2b5   : > { %7242 = vmatprep.mubr.msk.f32.mxu0 %vm919_vm3, %v10519_v0  ;;  %v3208_v0 = vrot.slane %v8844_v55, 3 }
 0x2b8   : > { %7243 = vmatmul.mubr.msk.f32.gmra.mrb[6].mxu0 %vm919_vm3, %v10520_v52  ;;  %v9391_v14 = vpop.f32.mrb[176].mxu1 }
 0x2b9   : > { %7245 = vmatprep.mubr.msk.f32.mxu0 %vm919_vm3, %v10521_v35  ;;  %10522 = vst [vmem:[#allocation45_spill] sm:$0xff] %v9391_v14  ;;  %v9394_v42 = vpop.f32.mrb[177].mxu1  ;;  %v3207_v35 = vsel %vm3168_vm6, %v3204_v5, %v3206_v2  ;;  %v10535_v5 = vrot.slane %v8933_v23, 3  ;;  %v10558_v14 = vld [vmem:[#allocation65_spill] sm:$0xff] }
 0x2ba   : > { %10523 = vst [vmem:[#allocation74_spill] sm:$0xff] %v9394_v42  ;;  %v10556_v42 = vld [vmem:[#allocation54_spill] sm:$0xff] }
 0x2bc   : > { %7246 = vmatmul.mubr.msk.f32.gmra.mrb[8].mxu0 %vm919_vm3, %v10524_v58  ;;  %v3209_v58 = vsel %vm3168_vm6, %v3206_v2, %v3208_v0 }
 0x2bd   : > { %7248 = vmatprep.mubr.msk.f32.mxu0 %vm919_vm3, %v10525_v48  ;;  %v3211_v48 = vsel %vm3168_vm6, %v3208_v0, %v3210_v24  ;;  %v10538_v0 = vld [vmem:[#allocation58_spill] sm:$0xff] }
 0x2be   : > { %v10540_v24 = vld [vmem:[#allocation70_spill] sm:$0xff] }
 0x2c0   : > { %7249 = vmatmul.mubr.msk.f32.gmra.mrb[10].mxu0 %vm919_vm3, %v3193_v8  ;;  %v9409_v30 = vpop.f32.mrb[178].mxu1 }
 0x2c1   : > { %7251 = vmatprep.mubr.msk.f32.mxu0 %vm919_vm3, %v3195_v51  ;;  %10528 = vst [vmem:[#allocation46_spill] sm:$0xff] %v9409_v30  ;;  %v9413_v56 = vpop.f32.mrb[179].mxu1  ;;  %v3216_v51 = vrot.slane %v8909_v7, 3 }
 0x2c2   : > { %10529 = vst [vmem:[#allocation47_spill] sm:$0xff] %v9413_v56  ;;  %v3646_v56 = vrot.slane %v8921_v12, 4 }
 0x2c3   : > { %v3219_v44 = vsel %vm3168_vm6, %v3216_v51, %v3218_v49 }
 0x2c4   : > { %7252 = vmatmul.mubr.msk.f32.gmra.mrb[12].mxu0 %vm919_vm3, %v3197_v59  ;;  %v3215_v59 = vsel %vm3168_vm6, %v3212_v22, %v3214_v4  ;;  %v10542_v22 = vld [vmem:[#allocation81_spill] sm:$0xff] }
 0x2c5   : > { %7254 = vmatprep.mubr.msk.f32.mxu0 %vm919_vm3, %v3199_v9  ;;  %v3217_v9 = vsel %vm3168_vm6, %v3214_v4, %v3216_v51  ;;  %v9488_v4 = vld [vmem:[%s10347_s6 + $0x38] sm:$0xff]  ;;  %v10549_v51 = vld [vmem:[#allocation23_spill] sm:$0xff] }
 0x2c8   : > { %7255 = vmatmul.mubr.msk.f32.gmra.mrb[14].mxu0 %vm919_vm3, %v3201_v47  ;;  %v9425_v29 = vpop.f32.mrb[180].mxu1 }
 0x2c9   : > { %7257 = vmatprep.mubr.msk.f32.mxu0 %vm919_vm3, %v3203_v33  ;;  %10530 = vst [vmem:[#allocation48_spill] sm:$0xff] %v9425_v29  ;;  %v9429_v52 = vpop.f32.mrb[181].mxu1  ;;  %v3221_v33 = vsel %vm3168_vm6, %v3218_v49, %v10535_v5  ;;  %v3620_v49 = vrot.slane %v8712_v26, 4  ;;  %v10553_v5 = vld [vmem:[#allocation40_spill] sm:$0xff]  ;;  %v3644_v29 = vrot.slane %v8909_v7, 4 }
 0x2ca   : > { %10531 = vst [vmem:[#allocation49_spill] sm:$0xff] %v9429_v52  ;;  %v3642_v52 = vrot.slane %v8897_v34, 4 }
 0x2cc   : > { %7258 = vmatmul.mubr.msk.f32.gmra.mrb[16].mxu0 %vm919_vm3, %v3205_v38  ;;  %v10537_v38 = vld [vmem:[#allocation53_spill] sm:$0xff] }
 0x2cd   : > { %7260 = vmatprep.mubr.msk.f32.mxu0 %vm919_vm3, %v3207_v35  ;;  %v10539_v35 = vld [vmem:[#allocation64_spill] sm:$0xff] }
 0x2d0   : > { %7261 = vmatmul.mubr.msk.f32.gmra.mrb[18].mxu0 %vm919_vm3, %v3209_v58  ;;  %v9441_v8 = vpop.f32.mrb[182].mxu1  ;;  %v10541_v58 = vld [vmem:[#allocation76_spill] sm:$0xff] }
 0x2d1   : > { %7263 = vmatprep.mubr.msk.f32.mxu0 %vm919_vm3, %v3211_v48  ;;  %10532 = vst [vmem:[#allocation50_spill] sm:$0xff] %v9441_v8  ;;  %v9445_v40 = vpop.f32.mrb[183].mxu1  ;;  %v10543_v48 = vld [vmem:[#allocation3_spill] sm:$0xff]  ;;  %v3640_v8 = vrot.slane %v8880_v18, 4 }
 0x2d2   : > { %10533 = vst [vmem:[#allocation51_spill] sm:$0xff] %v9445_v40  ;;  %v3638_v40 = vrot.slane %v8862_v17, 4 }
 0x2d4   : > { %7264 = vmatmul.mubr.msk.f32.gmra.mrb[20].mxu0 %vm919_vm3, %v3213_v60  ;;  %v10544_v60 = vld [vmem:[#allocation5_spill] sm:$0xff] }
 0x2d5   : > { %7266 = vmatprep.mubr.msk.f32.mxu0 %vm919_vm3, %v3215_v59  ;;  %v10550_v59 = vld [vmem:[#allocation27_spill] sm:$0xff] }
 0x2d8   : > { %7267 = vmatmul.mubr.msk.f32.gmra.mrb[22].mxu0 %vm919_vm3, %v3217_v9  ;;  %v9455_v47 = vpop.f32.mrb[184].mxu1  ;;  %v10552_v9 = vld [vmem:[#allocation36_spill] sm:$0xff] }
 0x2d9   : > { %7269 = vmatprep.mubr.msk.f32.mxu0 %vm919_vm3, %v3219_v44  ;;  %10534 = vst [vmem:[#allocation52_spill] sm:$0xff] %v9455_v47  ;;  %v9460_v2 = vpop.f32.mrb[185].mxu1  ;;  %v3622_v44 = vrot.slane %v8753_v41, 4  ;;  %v3636_v47 = vrot.slane %v8844_v55, 4 }
 0x2da   : > { %10536 = vst [vmem:[#allocation57_spill] sm:$0xff] %v9460_v2  ;;  %v3634_v2 = vrot.slane %v8826_v32, 4 }
 0x2dc   : > { %7270 = vmatmul.mubr.msk.f32.gmra.mrb[24].mxu0 %vm919_vm3, %v3221_v33  ;;  %v10554_v33 = vrot.slane %v10526_v21, 4 }
 0x2dd   : > { %7272 = vmatprep.mubr.msk.f32.mxu0 %vm919_vm3, %v10537_v38 }
 0x2de   : > { %v9517_v38 = vsel %vm541_vm0, %v10554_v33, %v3620_v49  ;;  %v3632_v33 = vrot.slane %v8806_v62, 4 }
 0x2e0   : > { %7273 = vmatmul.mubr.msk.f32.gmra.mrb[26].mxu0 %vm919_vm3, %v10538_v0  ;;  %v3624_v0 = vrot.slane %v8764_v15, 4 }
 0x2e1   : > { %7275 = vmatprep.mubr.msk.f32.mxu0 %vm919_vm3, %v10539_v35  ;;  %v9523_v35 = vsel %vm541_vm0, %v3620_v49, %v3622_v44 }
 0x2e4   : > { %7276 = vmatmul.mubr.msk.f32.gmra.mrb[28].mxu0 %vm919_vm3, %v10540_v24  ;;  %v3626_v24 = vrot.slane %v8774_v61, 4 }
 0x2e5   : > { %7278 = vmatprep.mubr.msk.f32.mxu0 %vm919_vm3, %v10541_v58  ;;  %v9529_v58 = vsel %vm541_vm0, %v3622_v44, %v3624_v0 }
 0x2e8   : > { %7279 = vmatmul.mubr.msk.f32.gmra.mrb[30].mxu0 %vm919_vm3, %v10542_v22  ;;  %v3628_v22 = vrot.slane %v8784_v53, 4 }
 0x2e9   : > { %7281 = vmatprep.mubr.msk.f32.mxu0 %vm919_vm3, %v9153_v10  ;;  %v10545_v10 = vld [vmem:[#allocation7_spill] sm:$0xff] }
 0x2ea   : > { %v9541_v49 = vsel %vm541_vm0, %v3626_v24, %v3628_v22 }
 0x2ec   : > { %7282 = vmatmul.mubr.msk.f32.gmra.mrb[32].mxu0 %vm919_vm3, %v9174_v45  ;;  %v10546_v45 = vld [vmem:[#allocation11_spill] sm:$0xff] }
 0x2ed   : > { %7284 = vmatprep.mubr.msk.f32.mxu0 %vm919_vm3, %v9199_v54  ;;  %v10547_v54 = vld [vmem:[#allocation15_spill] sm:$0xff] }
 0x2f0   : > { %7285 = vmatmul.mubr.msk.f32.gmra.mrb[34].mxu0 %vm919_vm3, %v9225_v28  ;;  %v10548_v28 = vld [vmem:[#allocation19_spill] sm:$0xff] }
 0x2f1   : > { %7289 = vmatprep.mubr.msk.f32.mxu0 %vm919_vm3, %v10543_v48  ;;  %v9535_v48 = vsel %vm541_vm0, %v3624_v0, %v3626_v24  ;;  %v9559_v24 = vsel %vm541_vm0, %v3632_v33, %v3634_v2 }
 0x2f4   : > { %7290 = vmatmul.mubr.msk.f32.vlgmr.msra.gmra.mrb[0].mxu0 %vm919_vm3, %v10544_v60  ;;  %v3630_v60 = vrot.slane %v8794_v39, 4 }
 0x2f5   : > { %7344 = vmatpush3.msra.mxu0 %v9365_v11  ;;  %7292 = vmatprep.mubr.msk.f32.mxu0 %vm919_vm3, %v10545_v10  ;;  %v10551_v11 = vld [vmem:[#allocation31_spill] sm:$0xff] }
 0x2f6   : > { %7399 = vmatprep.subr.mxu0 %v9488_v4  ;;  %v9547_v44 = vsel %vm541_vm0, %v3628_v22, %v3630_v60  ;;  %v9553_v0 = vsel %vm541_vm0, %v3630_v60, %v3632_v33  ;;  %v9565_v22 = vsel %vm541_vm0, %v3634_v2, %v3636_v47  ;;  %v9571_v60 = vsel %vm541_vm0, %v3636_v47, %v3638_v40 }
 0x2f7   : > { %v9577_v33 = vsel %vm541_vm0, %v3638_v40, %v3640_v8  ;;  %v9583_v2 = vsel %vm541_vm0, %v3640_v8, %v3642_v52  ;;  %v9589_v47 = vsel %vm541_vm0, %v3642_v52, %v3644_v29  ;;  %v9594_v40 = vsel %vm541_vm0, %v3644_v29, %v3646_v56  ;;  %v5289_v52 = vld [vmem:[%s10349_s8] sm:$0xf]  ;;  %v10557_v29 = vld [vmem:[#allocation59_spill] sm:$0xff] }
 0x2f8   : > { %7293 = vmatmul.mubr.msk.f32.gmra.mrb[2].mxu0 %vm919_vm3, %v10546_v45  ;;  %v10555_v8 = vrot.slane %v8933_v23, 4  ;;  %7511 = vmatprep.subr.msk.mxu1 %vm541_vm0, %v5289_v52 }
 0x2f9   : > { %7295 = vmatprep.mubr.msk.f32.mxu0 %vm919_vm3, %v10547_v54  ;;  %7512 = vmatpush3.msk.msra.mxu1 %vm541_vm0, %v5289_v52 }
 0x2fa   : > { %v9601_v30 = vsel %vm541_vm0, %v3646_v56, %v10555_v8  ;;  %v10559_v56 = vld [vmem:[#allocation71_spill] sm:$0xff]  ;;  %v10560_v8 = vld [vmem:[#allocation77_spill] sm:$0xff] }
 0x2fc   : > { %7296 = vmatmul.mubr.msk.f32.gmra.mrb[4].mxu0 %vm919_vm3, %v10548_v28 }
 0x2fd   : > { %7298 = vmatprep.mubr.msk.f32.mxu0 %vm919_vm3, %v10549_v51 }
 0x300   : > { %7299 = vmatmul.mubr.msk.f32.gmra.mrb[6].mxu0 %vm919_vm3, %v10550_v59 }
 0x301   : > { %7301 = vmatprep.mubr.msk.f32.mxu0 %vm919_vm3, %v10551_v11 }
 0x304   : > { %7302 = vmatmul.mubr.msk.f32.gmra.mrb[8].mxu0 %vm919_vm3, %v10552_v9 }
 0x305   : > { %7304 = vmatprep.mubr.msk.f32.mxu0 %vm919_vm3, %v10553_v5 }
 0x308   : > { %7305 = vmatmul.mubr.msk.f32.gmra.mrb[10].mxu0 %vm919_vm3, %v9517_v38 }
 0x309   : > { %7307 = vmatprep.mubr.msk.f32.mxu0 %vm919_vm3, %v9523_v35 }
 0x30c   : > { %7308 = vmatmul.mubr.msk.f32.gmra.mrb[12].mxu0 %vm919_vm3, %v9529_v58 }
 0x30d   : > { %7310 = vmatprep.mubr.msk.f32.mxu0 %vm919_vm3, %v9535_v48 }
 0x310   : > { %7311 = vmatmul.mubr.msk.f32.gmra.mrb[14].mxu0 %vm919_vm3, %v9541_v49 }
 0x311   : > { %7313 = vmatprep.mubr.msk.f32.mxu0 %vm919_vm3, %v9547_v44 }
 0x314   : > { %7314 = vmatmul.mubr.msk.f32.gmra.mrb[16].mxu0 %vm919_vm3, %v9553_v0 }
 0x315   : > { %7316 = vmatprep.mubr.msk.f32.mxu0 %vm919_vm3, %v9559_v24 }
 0x318   : > { %7317 = vmatmul.mubr.msk.f32.gmra.mrb[18].mxu0 %vm919_vm3, %v9565_v22 }
 0x319   : > { %7319 = vmatprep.mubr.msk.f32.mxu0 %vm919_vm3, %v9571_v60 }
 0x31c   : > { %7320 = vmatmul.mubr.msk.f32.gmra.mrb[20].mxu0 %vm919_vm3, %v9577_v33 }
 0x31d   : > { %7322 = vmatprep.mubr.msk.f32.mxu0 %vm919_vm3, %v9583_v2 }
 0x320   : > { %7323 = vmatmul.mubr.msk.f32.gmra.mrb[22].mxu0 %vm919_vm3, %v9589_v47 }
 0x321   : > { %7325 = vmatprep.mubr.msk.f32.mxu0 %vm919_vm3, %v9594_v40 }
 0x324   : > { %7326 = vmatmul.mubr.msk.f32.gmra.mrb[24].mxu0 %vm919_vm3, %v9601_v30 }
 0x325   : > { %7328 = vmatprep.mubr.msk.f32.mxu0 %vm919_vm3, %v10556_v42 }
 0x328   : > { %7329 = vmatmul.mubr.msk.f32.gmra.mrb[26].mxu0 %vm919_vm3, %v10557_v29 }
 0x329   : > { %7331 = vmatprep.mubr.msk.f32.mxu0 %vm919_vm3, %v10558_v14 }
 0x32c   : > { %7332 = vmatmul.mubr.msk.f32.gmra.mrb[28].mxu0 %vm919_vm3, %v10559_v56 }
 0x32d   : > { %7334 = vmatprep.mubr.msk.f32.mxu0 %vm919_vm3, %v10560_v8 }
 0x330   : > { %7335 = vmatmul.mubr.msk.f32.gmra.mrb[30].mxu0 %vm919_vm3, %v10561_v13 }
 0x331   : > { %7337 = vmatprep.mubr.msk.f32.mxu0 %vm919_vm3, %v10562_v31 }
 0x334   : > { %7338 = vmatmul.mubr.msk.f32.gmra.mrb[32].mxu0 %vm919_vm3, %v9177_v27 }
 0x335   : > { %7340 = vmatprep.mubr.msk.f32.mxu0 %vm919_vm3, %v9206_v50 }
 0x336   : > { %v9628_v52 = vpop.f32.mrb[186].mxu1 }
 0x337   : > { %v9630_v57 = vpop.f32.mrb[187].mxu1 }
 0x338   : > { %7341 = vmatmul.mubr.msk.f32.gmra.mrb[34].mxu0 %vm919_vm3, %v9232_v19 }
 0x339   : > { %7345 = vmatprep.mubr.msk.f32.mxu0 %vm919_vm3, %v10545_v10 }
 0x33a   : > { %v9636_v37 = vpop.f32.mrb[188].mxu1 }
 0x33b   : > { %10563 = vst [vmem:[#allocation63_spill] sm:$0xff] %v9636_v37  ;;  %v9643_v36 = vpop.f32.mrb[189].mxu1 }
 0x33c   : > { %7346 = vmatmul.mubr.msk.f32.vlgmr.msra.gmra.mrb[0].mxu0 %vm919_vm3, %v10546_v45 }
 0x33d   : > { %7400 = vmatpush3.msra.mxu0 %v9488_v4  ;;  %7348 = vmatprep.mubr.msk.f32.mxu0 %vm919_vm3, %v10547_v54 }
 0x33e   : > { %7455 = vmatprep.subr.mxu0 %v9641_v25  ;;  %v9651_v10 = vpop.f32.mrb[190].mxu1 }
 0x33f   : > { %10564 = vst [vmem:[#allocation69_spill] sm:$0xff] %v9651_v10  ;;  %v9653_v37 = vpop.f32.mrb[191].mxu1 }
 0x340   : > { %10565 = vst [vmem:[#allocation75_spill] sm:$0xff] %v9653_v37  ;;  %7349 = vmatmul.mubr.msk.f32.gmra.mrb[2].mxu0 %vm919_vm3, %v10548_v28 }
 0x341   : > { %7351 = vmatprep.mubr.msk.f32.mxu0 %vm919_vm3, %v10549_v51  ;;  %v7873_v51 = vld [vmem:[%s7998_s20 + $0x10] sm:$0xff] }
 0x342   : > { %v9659_v45 = vpop.f32.mrb[192].mxu1 }
 0x343   : > { %10566 = vst [vmem:[#allocation80_spill] sm:$0xff] %v9659_v45  ;;  %v9661_v4 = vpop.f32.mrb[193].mxu1 }
 0x344   : > { %10567 = vst [vmem:[#allocation85_spill] sm:$0xff] %v9661_v4  ;;  %7352 = vmatmul.mubr.msk.f32.gmra.mrb[4].mxu0 %vm919_vm3, %v10550_v59  ;;  %v5297_v4 = vrot.slane %v7873_v51, 3  ;;  %v7874_v59 = vld [vmem:[%s7998_s20 + $0x18] sm:$0xff] }
 0x345   : > { %7354 = vmatprep.mubr.msk.f32.mxu0 %vm919_vm3, %v10551_v11  ;;  %v5298_v45 = vrot.slane %v7874_v59, 3  ;;  %v7875_v11 = vld [vmem:[%s7998_s20 + $0x20] sm:$0xff]  ;;  %v7877_v59 = vld [vmem:[%s7998_s20 + $0x30] sm:$0xff] }
 0x346   : > { %v9667_v54 = vpop.f32.mrb[194].mxu1 }
 0x347   : > { %10568 = vst [vmem:[#allocation2_spill] sm:$0xff] %v9667_v54  ;;  %v9669_v37 = vpop.f32.mrb[195].mxu1  ;;  %v5299_v51 = vsel %vm3168_vm6, %v5297_v4, %v5298_v45 }
 0x348   : > { %10569 = vst [vmem:[#allocation4_spill] sm:$0xff] %v9669_v37  ;;  %7355 = vmatmul.mubr.msk.f32.gmra.mrb[6].mxu0 %vm919_vm3, %v10552_v9  ;;  %v5300_v37 = vrot.slane %v7875_v11, 3  ;;  %7513 = vmatprep.mubr.msk.f32.mxu1 %vm411_vm2, %v5299_v51 }
 0x349   : > { %7357 = vmatprep.mubr.msk.f32.mxu0 %vm919_vm3, %v10553_v5  ;;  %v7876_v5 = vld [vmem:[%s7998_s20 + $0x28] sm:$0xff] }
 0x34a   : > { %v9675_v28 = vpop.f32.mrb[196].mxu1 }
 0x34b   : > { %10570 = vst [vmem:[#allocation6_spill] sm:$0xff] %v9675_v28  ;;  %v9679_v10 = vpop.f32.mrb[197].mxu1  ;;  %v5302_v28 = vrot.slane %v7876_v5, 3  ;;  %v7878_v5 = vld [vmem:[%s7998_s20 + $0x38] sm:$0xff] }
 0x34c   : > { %7358 = vmatmul.mubr.msk.f32.gmra.mrb[8].mxu0 %vm919_vm3, %v9517_v38  ;;  %v5304_v38 = vrot.slane %v7877_v59, 3 }
 0x34d   : > { %7360 = vmatprep.mubr.msk.f32.mxu0 %vm919_vm3, %v9523_v35  ;;  %v5301_v35 = vsel %vm3168_vm6, %v5298_v45, %v5300_v37  ;;  %v5303_v4 = vsel %vm3168_vm6, %v5300_v37, %v5302_v28 }
 0x34e   : > { %v9686_v9 = vpop.f32.mrb[198].mxu1  ;;  %7514 = vmatmul.mubr.msk.f32.vlgmr.msra.gmra.mrb[208].mxu1 %vm411_vm2, %v5301_v35  ;;  %v5305_v45 = vsel %vm3168_vm6, %v5302_v28, %v5304_v38  ;;  %v7880_v35 = vld [vmem:[%s7998_s20 + $0x48] sm:$0xff] }
 0x34f   : > { %v9689_v54 = vpop.f32.mrb[199].mxu1  ;;  %7516 = vmatprep.mubr.msk.f32.mxu1 %vm411_vm2, %v5303_v4 }
 0x350   : > { %10571 = vst [vmem:[#allocation10_spill] sm:$0xff] %v9689_v54  ;;  %7361 = vmatmul.mubr.msk.f32.gmra.mrb[10].mxu0 %vm919_vm3, %v9529_v58  ;;  %v5306_v54 = vrot.slane %v7878_v5, 3  ;;  %v5310_v5 = vrot.slane %v7880_v35, 3 }
 0x351   : > { %7363 = vmatprep.mubr.msk.f32.mxu0 %vm919_vm3, %v9535_v48  ;;  %v7879_v48 = vld [vmem:[%s7998_s20 + $0x40] sm:$0xff] }
 0x352   : > { %v9700_v11 = vpop.f32.mrb[200].mxu1  ;;  %v5308_v59 = vrot.slane %v7879_v48, 3  ;;  %7517 = vmatmul.mubr.msk.f32.gmra.mrb[210].mxu1 %vm411_vm2, %v5305_v45  ;;  %v5307_v37 = vsel %vm3168_vm6, %v5304_v38, %v5306_v54  ;;  %v7882_v45 = vld [vmem:[%s7998_s20 + $0x58] sm:$0xff] }
 0x353   : > { %v9703_v58 = vpop.f32.mrb[201].mxu1  ;;  %7519 = vmatprep.mubr.msk.f32.mxu1 %vm411_vm2, %v5307_v37  ;;  %v5314_v35 = vrot.slane %v7882_v45, 3 }
 0x354   : > { %7364 = vmatmul.mubr.msk.f32.gmra.mrb[12].mxu0 %vm919_vm3, %v9541_v49  ;;  %v5309_v28 = vsel %vm3168_vm6, %v5306_v54, %v5308_v59  ;;  %v5311_v38 = vsel %vm3168_vm6, %v5308_v59, %v5310_v5 }
 0x355   : > { %7366 = vmatprep.mubr.msk.f32.mxu0 %vm919_vm3, %v9547_v44  ;;  %v7881_v44 = vld [vmem:[%s7998_s20 + $0x50] sm:$0xff] }
 0x356   : > { %v9714_v51 = vpop.f32.mrb[202].mxu1  ;;  %v5312_v48 = vrot.slane %v7881_v44, 3  ;;  %7520 = vmatmul.mubr.msk.f32.gmra.mrb[212].mxu1 %vm411_vm2, %v5309_v28  ;;  %v7884_v28 = vld [vmem:[%s7998_s20 + $0x68] sm:$0xff] }
 0x357   : > { %v9717_v49 = vpop.f32.mrb[203].mxu1  ;;  %7522 = vmatprep.mubr.msk.f32.mxu1 %vm411_vm2, %v5311_v38  ;;  %v5318_v45 = vrot.slane %v7884_v28, 3  ;;  %v7886_v38 = vld [vmem:[%s7998_s20 + $0x78] sm:$0xff] }
 0x358   : > { %7367 = vmatmul.mubr.msk.f32.gmra.mrb[14].mxu0 %vm919_vm3, %v9553_v0  ;;  %v5313_v54 = vsel %vm3168_vm6, %v5310_v5, %v5312_v48  ;;  %v5315_v59 = vsel %vm3168_vm6, %v5312_v48, %v5314_v35  ;;  %v7887_v48 = vld [vmem:[%s7998_s20 + $0x80] sm:$0xff] }
 0x359   : > { %7369 = vmatprep.mubr.msk.f32.mxu0 %vm919_vm3, %v9559_v24  ;;  %v7883_v24 = vld [vmem:[%s7998_s20 + $0x60] sm:$0xff]  ;;  %v5324_v28 = vrot.slane %v7887_v48, 3  ;;  %v7893_v48 = vld [vmem:[%s7998_s20 + $0xb0] sm:$0xff] }
 0x35a   : > { %v9728_v4 = vpop.f32.mrb[204].mxu1  ;;  %v5316_v44 = vrot.slane %v7883_v24, 3  ;;  %7523 = vmatmul.mubr.msk.f32.gmra.mrb[214].mxu1 %vm411_vm2, %v5313_v54  ;;  %v5322_v54 = vrot.slane %v7886_v38, 3 }
 0x35b   : > { %v9731_v0 = vpop.f32.mrb[205].mxu1  ;;  %7525 = vmatprep.mubr.msk.f32.mxu1 %vm411_vm2, %v5315_v59 }
 0x35c   : > { %7370 = vmatmul.mubr.msk.f32.gmra.mrb[16].mxu0 %vm919_vm3, %v9565_v22  ;;  %v5317_v5 = vsel %vm3168_vm6, %v5314_v35, %v5316_v44  ;;  %v7888_v35 = vld [vmem:[%s7998_s20 + $0x88] sm:$0xff] }
 0x35d   : > { %7372 = vmatprep.mubr.msk.f32.mxu0 %vm919_vm3, %v9571_v60  ;;  %v7885_v60 = vld [vmem:[%s7998_s20 + $0x70] sm:$0xff]  ;;  %v5326_v59 = vrot.slane %v7888_v35, 3 }
 0x35e   : > { %v9742_v37 = vpop.f32.mrb[206].mxu1  ;;  %v5320_v24 = vrot.slane %v7885_v60, 3  ;;  %7526 = vmatmul.mubr.msk.f32.gmra.mrb[216].mxu1 %vm411_vm2, %v5317_v5 }
 0x35f   : > { %10572 = vst [vmem:[#allocation14_spill] sm:$0xff] %v9742_v37  ;;  %v9745_v22 = vpop.f32.mrb[207].mxu1  ;;  %v10625_v37 = vld [vmem:[#allocation47_spill] sm:$0xff] }
 0x360   : > { %10573 = vst [vmem:[#allocation18_spill] sm:$0xff] %v9745_v22  ;;  %7373 = vmatmul.mubr.msk.f32.gmra.mrb[18].mxu0 %vm919_vm3, %v9577_v33  ;;  %v5319_v33 = vsel %vm3168_vm6, %v5316_v44, %v5318_v45  ;;  %v7889_v44 = vld [vmem:[%s7998_s20 + $0x90] sm:$0xff] }
 0x361   : > { %7375 = vmatprep.mubr.msk.f32.mxu0 %vm919_vm3, %v9583_v2  ;;  %7528 = vmatprep.mubr.msk.f32.mxu1 %vm411_vm2, %v5319_v33  ;;  %v5321_v2 = vsel %vm3168_vm6, %v5318_v45, %v5320_v24  ;;  %v5328_v60 = vrot.slane %v7889_v44, 3  ;;  %v7890_v45 = vld [vmem:[%s7998_s20 + $0x98] sm:$0xff]  ;;  %v7896_v44 = vld [vmem:[%s7998_s20 + $0xc8] sm:$0xff] }
 0x362   : > { %7529 = vmatmul.mubr.msk.f32.gmra.mrb[218].mxu1 %vm411_vm2, %v5321_v2  ;;  %v5330_v5 = vrot.slane %v7890_v45, 3  ;;  %v7894_v2 = vld [vmem:[%s7998_s20 + $0xb8] sm:$0xff] }
 0x363   : > { %v5338_v35 = vrot.slane %v7894_v2, 3  ;;  %v10575_v2 = vld [vmem:[#allocation12_spill] sm:$0xff] }
 0x364   : > { %7376 = vmatmul.mubr.msk.f32.gmra.mrb[20].mxu0 %vm919_vm3, %v9589_v47  ;;  %v5323_v47 = vsel %vm3168_vm6, %v5320_v24, %v5322_v54  ;;  %v7891_v24 = vld [vmem:[%s7998_s20 + $0xa0] sm:$0xff] }
 0x365   : > { %7378 = vmatprep.mubr.msk.f32.mxu0 %vm919_vm3, %v9594_v40  ;;  %7531 = vmatprep.mubr.msk.f32.mxu1 %vm411_vm2, %v5323_v47  ;;  %v5325_v40 = vsel %vm3168_vm6, %v5322_v54, %v5324_v28  ;;  %v5332_v38 = vrot.slane %v7891_v24, 3  ;;  %v7892_v54 = vld [vmem:[%s7998_s20 + $0xa8] sm:$0xff]  ;;  %v7899_v24 = vld [vmem:[%s7998_s20 + $0xe0] sm:$0xff] }
 0x366   : > { %7532 = vmatmul.mubr.msk.f32.gmra.mrb[220].mxu1 %vm411_vm2, %v5325_v40  ;;  %v5334_v33 = vrot.slane %v7892_v54, 3  ;;  %v7897_v40 = vld [vmem:[%s7998_s20 + $0xd0] sm:$0xff] }
 0x367   : > { %v5344_v45 = vrot.slane %v7897_v40, 3  ;;  %v7905_v40 = vld [vmem:[%s7998_s20 + $0x110] sm:$0xff] }
 0x368   : > { %7379 = vmatmul.mubr.msk.f32.gmra.mrb[22].mxu0 %vm919_vm3, %v9601_v30  ;;  %v5327_v30 = vsel %vm3168_vm6, %v5324_v28, %v5326_v59  ;;  %v5336_v28 = vrot.slane %v7893_v48, 3  ;;  %v10574_v48 = vld [vmem:[#allocation8_spill] sm:$0xff] }
 0x369   : > { %7381 = vmatprep.mubr.msk.f32.mxu0 %vm919_vm3, %v10556_v42  ;;  %7534 = vmatprep.mubr.msk.f32.mxu1 %vm411_vm2, %v5327_v30  ;;  %v5329_v42 = vsel %vm3168_vm6, %v5326_v59, %v5328_v60  ;;  %v7895_v59 = vld [vmem:[%s7998_s20 + $0xc0] sm:$0xff] }
 0x36a   : > { %7535 = vmatmul.mubr.msk.f32.gmra.mrb[222].mxu1 %vm411_vm2, %v5329_v42  ;;  %v5340_v47 = vrot.slane %v7895_v59, 3  ;;  %v7900_v42 = vld [vmem:[%s7998_s20 + $0xe8] sm:$0xff]  ;;  %v10576_v59 = vld [vmem:[#allocation16_spill] sm:$0xff] }
 0x36b   : > { %v5350_v54 = vrot.slane %v7900_v42, 3  ;;  %v7908_v42 = vld [vmem:[%s7998_s20 + $0x128] sm:$0xff] }
 0x36c   : > { %7382 = vmatmul.mubr.msk.f32.gmra.mrb[24].mxu0 %vm919_vm3, %v10557_v29  ;;  %v5331_v29 = vsel %vm3168_vm6, %v5328_v60, %v5330_v5  ;;  %v5342_v60 = vrot.slane %v7896_v44, 3 }
 0x36d   : > { %7384 = vmatprep.mubr.msk.f32.mxu0 %vm919_vm3, %v10558_v14  ;;  %7537 = vmatprep.mubr.msk.f32.mxu1 %vm411_vm2, %v5331_v29  ;;  %v5333_v14 = vsel %vm3168_vm6, %v5330_v5, %v5332_v38  ;;  %v7898_v5 = vld [vmem:[%s7998_s20 + $0xd8] sm:$0xff] }
 0x36e   : > { %7538 = vmatmul.mubr.msk.f32.gmra.mrb[224].mxu1 %vm411_vm2, %v5333_v14  ;;  %v5346_v30 = vrot.slane %v7898_v5, 3  ;;  %v7906_v5 = vld [vmem:[%s7998_s20 + $0x118] sm:$0xff] }
 0x370   : > { %7385 = vmatmul.mubr.msk.f32.gmra.mrb[26].mxu0 %vm919_vm3, %v10559_v56  ;;  %v5335_v56 = vsel %vm3168_vm6, %v5332_v38, %v5334_v33  ;;  %v5348_v38 = vrot.slane %v7899_v24, 3 }
 0x371   : > { %7387 = vmatprep.mubr.msk.f32.mxu0 %vm919_vm3, %v10560_v8  ;;  %7540 = vmatprep.mubr.msk.f32.mxu1 %vm411_vm2, %v5335_v56  ;;  %v5337_v8 = vsel %vm3168_vm6, %v5334_v33, %v5336_v28  ;;  %v7901_v33 = vld [vmem:[%s7998_s20 + $0xf0] sm:$0xff] }
 0x372   : > { %7541 = vmatmul.mubr.msk.f32.gmra.mrb[226].mxu1 %vm411_vm2, %v5337_v8  ;;  %v5352_v29 = vrot.slane %v7901_v33, 3  ;;  %v7904_v8 = vld [vmem:[%s7998_s20 + $0x108] sm:$0xff] }
 0x373   : > { %v5358_v44 = vrot.slane %v7904_v8, 3  ;;  %v4342_v8 = vrot.slane %v8764_v15, 5 }
 0x374   : > { %7388 = vmatmul.mubr.msk.f32.gmra.mrb[28].mxu0 %vm919_vm3, %v10561_v13  ;;  %v5339_v13 = vsel %vm3168_vm6, %v5336_v28, %v5338_v35  ;;  %v7902_v28 = vld [vmem:[%s7998_s20 + $0xf8] sm:$0xff] }
 0x375   : > { %7390 = vmatprep.mubr.msk.f32.mxu0 %vm919_vm3, %v10562_v31  ;;  %7543 = vmatprep.mubr.msk.f32.mxu1 %vm411_vm2, %v5339_v13  ;;  %v5341_v31 = vsel %vm3168_vm6, %v5338_v35, %v5340_v47  ;;  %v5354_v14 = vrot.slane %v7902_v28, 3  ;;  %v7903_v35 = vld [vmem:[%s7998_s20 + $0x100] sm:$0xff]  ;;  %v10581_v28 = vld [vmem:[#allocation37_spill] sm:$0xff] }
 0x376   : > { %7544 = vmatmul.mubr.msk.f32.gmra.mrb[228].mxu1 %vm411_vm2, %v5341_v31  ;;  %v5356_v56 = vrot.slane %v7903_v35, 3  ;;  %v10582_v35 = vld [vmem:[#allocation41_spill] sm:$0xff] }
 0x377   : > { %v5355_v13 = vsel %vm3168_vm6, %v5352_v29, %v5354_v14 }
 0x378   : > { %7391 = vmatmul.mubr.msk.f32.gmra.mrb[30].mxu0 %vm919_vm3, %v9177_v27  ;;  %v5343_v27 = vsel %vm3168_vm6, %v5340_v47, %v5342_v60  ;;  %v5353_v47 = vsel %vm3168_vm6, %v5350_v54, %v5352_v29  ;;  %v5357_v31 = vsel %vm3168_vm6, %v5354_v14, %v5356_v56  ;;  %v4338_v29 = vrot.slane %v8712_v26, 5 }
 0x379   : > { %7393 = vmatprep.mubr.msk.f32.mxu0 %vm919_vm3, %v9206_v50  ;;  %7546 = vmatprep.mubr.msk.f32.mxu1 %vm411_vm2, %v5343_v27  ;;  %v5345_v50 = vsel %vm3168_vm6, %v5342_v60, %v5344_v45  ;;  %v10577_v60 = vld [vmem:[#allocation20_spill] sm:$0xff]  ;;  %v7907_v27 = vld [vmem:[%s7998_s20 + $0x120] sm:$0xff]  ;;  %v4340_v14 = vrot.slane %v8753_v41, 5 }
 0x37a   : > { %7547 = vmatmul.mubr.msk.f32.gmra.mrb[230].mxu1 %vm411_vm2, %v5345_v50  ;;  %v5364_v24 = vrot.slane %v7907_v27, 3  ;;  %v5359_v50 = vsel %vm3168_vm6, %v5356_v56, %v5358_v44 }
 0x37c   : > { %7394 = vmatmul.mubr.msk.f32.gmra.mrb[32].mxu0 %vm919_vm3, %v9232_v19  ;;  %v5347_v19 = vsel %vm3168_vm6, %v5344_v45, %v5346_v30  ;;  %v10578_v45 = vld [vmem:[#allocation24_spill] sm:$0xff] }
 0x37d   : > { %7396 = vmatprep.mubr.msk.f32.mxu0 %vm919_vm3, %v9245_v1  ;;  %7549 = vmatprep.mubr.msk.f32.mxu1 %vm411_vm2, %v5347_v19  ;;  %v5349_v1 = vsel %vm3168_vm6, %v5346_v30, %v5348_v38  ;;  %v5362_v30 = vrot.slane %v7906_v5, 3  ;;  %v10580_v19 = vld [vmem:[#allocation32_spill] sm:$0xff] }
 0x37e   : > { %7550 = vmatmul.mubr.msk.f32.gmra.mrb[232].mxu1 %vm411_vm2, %v5349_v1 }
 0x380   : > { %7397 = vmatmul.mubr.msk.f32.gmra.mrb[34].mxu0 %vm919_vm3, %v9262_v20  ;;  %v5351_v20 = vsel %vm3168_vm6, %v5348_v38, %v5350_v54  ;;  %v10579_v38 = vld [vmem:[#allocation28_spill] sm:$0xff]  ;;  %v5366_v54 = vrot.slane %v7908_v42, 3 }
 0x381   : > { %7401 = vmatprep.mubr.msk.f32.mxu0 %vm919_vm3, %v10574_v48  ;;  %7552 = vmatprep.mubr.msk.f32.mxu1 %vm411_vm2, %v5351_v20  ;;  %v7909_v48 = vld [vmem:[%s7998_s20 + $0x130] sm:$0xff]  ;;  %v5365_v20 = vsel %vm3168_vm6, %v5362_v30, %v5364_v24 }
 0x382   : > { %7553 = vmatmul.mubr.msk.f32.gmra.mrb[234].mxu1 %vm411_vm2, %v5353_v47  ;;  %v5368_v1 = vrot.slane %v7909_v48, 3  ;;  %v5367_v56 = vsel %vm3168_vm6, %v5364_v24, %v5366_v54  ;;  %v4352_v24 = vrot.slane %v8826_v32, 5  ;;  %v4360_v48 = vrot.slane %v8897_v34, 5 }
 0x383   : > { %7555 = vmatprep.mubr.msk.f32.mxu1 %vm411_vm2, %v5355_v13 }
 0x384   : > { %7402 = vmatmul.mubr.msk.f32.vlgmr.msra.gmra.mrb[0].mxu0 %vm919_vm3, %v10575_v2  ;;  %v5369_v13 = vsel %vm3168_vm6, %v5366_v54, %v5368_v1  ;;  %v4356_v54 = vrot.slane %v8862_v17, 5 }
 0x385   : > { %7456 = vmatpush3.msra.mxu0 %v9641_v25  ;;  %7404 = vmatprep.mubr.msk.f32.mxu0 %vm919_vm3, %v10576_v59  ;;  %v5360_v25 = vrot.slane %v7905_v40, 3  ;;  %v10583_v59 = vrot.slane %v10526_v21, 5  ;;  %v4343_v40 = vsel %vm4318_vm7, %v4340_v14, %v4342_v8 }
 0x386   : > { %7556 = vmatmul.mubr.msk.f32.gmra.mrb[236].mxu1 %vm411_vm2, %v5357_v31  ;;  %v4348_v31 = vrot.slane %v8794_v39, 5 }
 0x387   : > { %7558 = vmatprep.mubr.msk.f32.mxu1 %vm411_vm2, %v5359_v50  ;;  %v5361_v33 = vsel %vm3168_vm6, %v5358_v44, %v5360_v25  ;;  %v5363_v2 = vsel %vm3168_vm6, %v5360_v25, %v5362_v30  ;;  %v4339_v47 = vsel %vm4318_vm7, %v10583_v59, %v4338_v29  ;;  %v4341_v44 = vsel %vm4318_vm7, %v4338_v29, %v4340_v14 }
 0x388   : > { %7405 = vmatmul.mubr.msk.f32.gmra.mrb[2].mxu0 %vm919_vm3, %v10577_v60  ;;  %v4344_v60 = vrot.slane %v8774_v61, 5  ;;  %v4346_v25 = vrot.slane %v8784_v53, 5  ;;  %v4350_v30 = vrot.slane %v8806_v62, 5  ;;  %v4354_v50 = vrot.slane %v8844_v55, 5 }
 0x389   : > { %7407 = vmatprep.mubr.msk.f32.mxu0 %vm919_vm3, %v10578_v45 }
 0x38a   : > { %7559 = vmatmul.mubr.msk.f32.gmra.mrb[238].mxu1 %vm411_vm2, %v5361_v33  ;;  %v4345_v45 = vsel %vm4318_vm7, %v4342_v8, %v4344_v60  ;;  %v4347_v5 = vsel %vm4318_vm7, %v4344_v60, %v4346_v25  ;;  %v4349_v27 = vsel %vm4318_vm7, %v4346_v25, %v4348_v31  ;;  %v4353_v42 = vsel %vm4318_vm7, %v4350_v30, %v4352_v24  ;;  %v10586_v8 = vld [vmem:[#allocation60_spill] sm:$0xff]  ;;  %v10591_v25 = vld [vmem:[#allocation87_spill] sm:$0xff] }
 0x38b   : > { %7561 = vmatprep.mubr.msk.f32.mxu1 %vm411_vm2, %v5363_v2  ;;  %v4358_v33 = vrot.slane %v8880_v18, 5  ;;  %v4357_v29 = vsel %vm4318_vm7, %v4354_v50, %v4356_v54  ;;  %v4364_v2 = vrot.slane %v8921_v12, 5  ;;  %v10588_v60 = vld [vmem:[#allocation72_spill] sm:$0xff] }
 0x38c   : > { %7408 = vmatmul.mubr.msk.f32.gmra.mrb[4].mxu0 %vm919_vm3, %v10579_v38  ;;  %v4351_v38 = vsel %vm4318_vm7, %v4348_v31, %v4350_v30  ;;  %v10593_v31 = vld [vmem:[#allocation9_spill] sm:$0xff] }
 0x38d   : > { %7410 = vmatprep.mubr.msk.f32.mxu0 %vm919_vm3, %v10580_v19  ;;  %v4355_v19 = vsel %vm4318_vm7, %v4352_v24, %v4354_v50  ;;  %v4359_v1 = vsel %vm4318_vm7, %v4356_v54, %v4358_v33  ;;  %v4361_v14 = vsel %vm4318_vm7, %v4358_v33, %v4360_v48  ;;  %v10595_v30 = vld [vmem:[#allocation17_spill] sm:$0xff]  ;;  %v10600_v24 = vld [vmem:[#allocation38_spill] sm:$0xff] }
 0x38e   : > { %7562 = vmatmul.mubr.msk.f32.gmra.mrb[240].mxu1 %vm411_vm2, %v5365_v20  ;;  %v10601_v50 = vld [vmem:[#allocation42_spill] sm:$0xff] }
 0x38f   : > { %7564 = vmatprep.mubr.msk.f32.mxu1 %vm411_vm2, %v5367_v56  ;;  %v10584_v56 = vrot.slane %v8933_v23, 5 }
 0x390   : > { %7411 = vmatmul.mubr.msk.f32.gmra.mrb[6].mxu0 %vm919_vm3, %v10581_v28  ;;  %v4362_v28 = vrot.slane %v8909_v7, 5 }
 0x391   : > { %7413 = vmatprep.mubr.msk.f32.mxu0 %vm919_vm3, %v10582_v35  ;;  %v4367_v59 = vsel %vm4318_vm7, %v4364_v2, %v10584_v56  ;;  %v4791_v56 = vrot.slane %v8909_v7, 6 }
 0x392   : > { %7565 = vmatmul.mubr.msk.f32.gmra.mrb[242].mxu1 %vm411_vm2, %v5369_v13  ;;  %v4363_v20 = vsel %vm4318_vm7, %v4360_v48, %v4362_v28  ;;  %v4365_v35 = vsel %vm4318_vm7, %v4362_v28, %v4364_v2  ;;  %v10589_v13 = vld [vmem:[#allocation78_spill] sm:$0xff]  ;;  %v4777_v48 = vrot.slane %v8794_v39, 6  ;;  %v4781_v28 = vrot.slane %v8826_v32, 6 }
 0x393   : > { %v4785_v2 = vrot.slane %v8862_v17, 6 }
 0x394   : > { %7414 = vmatmul.mubr.msk.f32.gmra.mrb[8].mxu0 %vm919_vm3, %v4339_v47  ;;  %v10585_v47 = vld [vmem:[#allocation55_spill] sm:$0xff] }
 0x395   : > { %7416 = vmatprep.mubr.msk.f32.mxu0 %vm919_vm3, %v4341_v44  ;;  %v10587_v44 = vld [vmem:[#allocation66_spill] sm:$0xff] }
 0x398   : > { %7417 = vmatmul.mubr.msk.f32.gmra.mrb[10].mxu0 %vm919_vm3, %v4343_v40  ;;  %v10590_v40 = vld [vmem:[#allocation83_spill] sm:$0xff] }
 0x399   : > { %7419 = vmatprep.mubr.msk.f32.mxu0 %vm919_vm3, %v4345_v45  ;;  %v10592_v45 = vld [vmem:[#allocation89_spill] sm:$0xff] }
 0x39c   : > { %7420 = vmatmul.mubr.msk.f32.gmra.mrb[12].mxu0 %vm919_vm3, %v4347_v5  ;;  %v10594_v5 = vld [vmem:[#allocation13_spill] sm:$0xff] }
 0x39d   : > { %7422 = vmatprep.mubr.msk.f32.mxu0 %vm919_vm3, %v4349_v27  ;;  %v10596_v27 = vld [vmem:[#allocation21_spill] sm:$0xff] }
 0x3a0   : > { %7423 = vmatmul.mubr.msk.f32.gmra.mrb[14].mxu0 %vm919_vm3, %v4351_v38  ;;  %v4769_v38 = vrot.slane %v8753_v41, 6  ;;  %v4775_v41 = vrot.slane %v8784_v53, 6 }
 0x3a1   : > { %7425 = vmatprep.mubr.msk.f32.mxu0 %vm919_vm3, %v4353_v42  ;;  %v10602_v42 = vrot.slane %v10526_v21, 6 }
 0x3a4   : > { %7426 = vmatmul.mubr.msk.f32.gmra.mrb[16].mxu0 %vm919_vm3, %v4355_v19  ;;  %v4771_v19 = vrot.slane %v8764_v15, 6 }
 0x3a5   : > { %7428 = vmatprep.mubr.msk.f32.mxu0 %vm919_vm3, %v4357_v29 }
 0x3a6   : > { %v4772_v29 = vsel %vm4747_vm8, %v4769_v38, %v4771_v19 }
 0x3a8   : > { %7429 = vmatmul.mubr.msk.f32.gmra.mrb[18].mxu0 %vm919_vm3, %v4359_v1  ;;  %v4779_v1 = vrot.slane %v8806_v62, 6 }
 0x3a9   : > { %7431 = vmatprep.mubr.msk.f32.mxu0 %vm919_vm3, %v4361_v14  ;;  %v4783_v14 = vrot.slane %v8844_v55, 6 }
 0x3aa   : > { %v4780_v53 = vsel %vm4747_vm8, %v4777_v48, %v4779_v1  ;;  %v4782_v39 = vsel %vm4747_vm8, %v4779_v1, %v4781_v28 }
 0x3ab   : > { %v4784_v62 = vsel %vm4747_vm8, %v4781_v28, %v4783_v14  ;;  %v4786_v32 = vsel %vm4747_vm8, %v4783_v14, %v4785_v2 }
 0x3ac   : > { %7432 = vmatmul.mubr.msk.f32.gmra.mrb[20].mxu0 %vm919_vm3, %v4363_v20  ;;  %v4787_v20 = vrot.slane %v8880_v18, 6 }
 0x3ad   : > { %7434 = vmatprep.mubr.msk.f32.mxu0 %vm919_vm3, %v4365_v35  ;;  %v4789_v35 = vrot.slane %v8897_v34, 6 }
 0x3ae   : > { %v4788_v55 = vsel %vm4747_vm8, %v4785_v2, %v4787_v20 }
 0x3af   : > { %v4790_v17 = vsel %vm4747_vm8, %v4787_v20, %v4789_v35  ;;  %v4792_v18 = vsel %vm4747_vm8, %v4789_v35, %v4791_v56 }
 0x3b0   : > { %7435 = vmatmul.mubr.msk.f32.gmra.mrb[22].mxu0 %vm919_vm3, %v4367_v59  ;;  %v4793_v59 = vrot.slane %v8921_v12, 6  ;;  %v10605_v12 = vld [vmem:[#allocation61_spill] sm:$0xff] }
 0x3b1   : > { %7437 = vmatprep.mubr.msk.f32.mxu0 %vm919_vm3, %v10585_v47  ;;  %v10603_v47 = vrot.slane %v8933_v23, 6  ;;  %v10609_v23 = vld [vmem:[#allocation84_spill] sm:$0xff] }
 0x3b2   : > { %v4794_v34 = vsel %vm4747_vm8, %v4791_v56, %v4793_v59 }
 0x3b3   : > { %v4796_v7 = vsel %vm4747_vm8, %v4793_v59, %v10603_v47 }
 0x3b4   : > { %7438 = vmatmul.mubr.msk.f32.gmra.mrb[24].mxu0 %vm919_vm3, %v10586_v8  ;;  %v10604_v8 = vld [vmem:[#allocation56_spill] sm:$0xff] }
 0x3b5   : > { %7440 = vmatprep.mubr.msk.f32.mxu0 %vm919_vm3, %v10587_v44  ;;  %v10606_v44 = vld [vmem:[#allocation67_spill] sm:$0xff] }
 0x3b8   : > { %7441 = vmatmul.mubr.msk.f32.gmra.mrb[26].mxu0 %vm919_vm3, %v10588_v60  ;;  %v10607_v60 = vld [vmem:[#allocation73_spill] sm:$0xff] }
 0x3b9   : > { %7443 = vmatprep.mubr.msk.f32.mxu0 %vm919_vm3, %v10589_v13  ;;  %v10608_v13 = vld [vmem:[#allocation79_spill] sm:$0xff] }
 0x3bc   : > { %7444 = vmatmul.mubr.msk.f32.gmra.mrb[28].mxu0 %vm919_vm3, %v10590_v40  ;;  %v10610_v40 = vld [vmem:[#allocation88_spill] sm:$0xff] }
 0x3bd   : > { %7446 = vmatprep.mubr.msk.f32.mxu0 %vm919_vm3, %v10591_v25  ;;  %v10611_v25 = vld [vmem:[#allocation90_spill] sm:$0xff] }
 0x3c0   : > { %7447 = vmatmul.mubr.msk.f32.gmra.mrb[30].mxu0 %vm919_vm3, %v10592_v45  ;;  %v10612_v45 = vld [vmem:[#allocation91_spill] sm:$0xff] }
 0x3c1   : > { %7449 = vmatprep.mubr.msk.f32.mxu0 %vm919_vm3, %v9209_v43  ;;  %v10597_v43 = vld [vmem:[#allocation25_spill] sm:$0xff] }
 0x3c4   : > { %7450 = vmatmul.mubr.msk.f32.gmra.mrb[32].mxu0 %vm919_vm3, %v9235_v63  ;;  %v10598_v63 = vld [vmem:[#allocation29_spill] sm:$0xff] }
 0x3c5   : > { %7452 = vmatprep.mubr.msk.f32.mxu0 %vm919_vm3, %v9248_v6  ;;  %v10599_v6 = vld [vmem:[#allocation33_spill] sm:$0xff] }
 0x3c8   : > { %7453 = vmatmul.mubr.msk.f32.gmra.mrb[34].mxu0 %vm919_vm3, %v9265_v46  ;;  %v4767_v46 = vrot.slane %v8712_v26, 6  ;;  %v4773_v26 = vrot.slane %v8774_v61, 6  ;;  %v4778_v61 = vsel %vm4747_vm8, %v4775_v41, %v4777_v48 }
 0x3c9   : > { %7457 = vmatprep.mubr.msk.f32.mxu0 %vm919_vm3, %v10593_v31  ;;  %v10613_v31 = vld [vmem:[#allocation92_spill] sm:$0xff] }
 0x3ca   : > { %v4768_v54 = vsel %vm4747_vm8, %v10602_v42, %v4767_v46  ;;  %v4770_v33 = vsel %vm4747_vm8, %v4767_v46, %v4769_v38  ;;  %v4774_v21 = vsel %vm4747_vm8, %v4771_v19, %v4773_v26  ;;  %v4776_v15 = vsel %vm4747_vm8, %v4773_v26, %v4775_v41 }
 0x3cc   : > { %7458 = vmatmul.mubr.msk.f32.vlgmr.msra.gmra.mrb[0].mxu0 %vm919_vm3, %v10594_v5 }
 0x3cd   : > { %7460 = vmatprep.mubr.msk.f32.mxu0 %vm919_vm3, %v10595_v30 }
 0x3d0   : > { %7461 = vmatmul.mubr.msk.f32.gmra.mrb[2].mxu0 %vm919_vm3, %v10596_v27 }
 0x3d1   : > { %7463 = vmatprep.mubr.msk.f32.mxu0 %vm919_vm3, %v10597_v43 }
 0x3d4   : > { %7464 = vmatmul.mubr.msk.f32.gmra.mrb[4].mxu0 %vm919_vm3, %v10598_v63 }
 0x3d5   : > { %7466 = vmatprep.mubr.msk.f32.mxu0 %vm919_vm3, %v10599_v6 }
 0x3d8   : > { %7467 = vmatmul.mubr.msk.f32.gmra.mrb[6].mxu0 %vm919_vm3, %v10600_v24 }
 0x3d9   : > { %7469 = vmatprep.mubr.msk.f32.mxu0 %vm919_vm3, %v10601_v50 }
 0x3dc   : > { %7470 = vmatmul.mubr.msk.f32.gmra.mrb[8].mxu0 %vm919_vm3, %v4768_v54 }
 0x3dd   : > { %7472 = vmatprep.mubr.msk.f32.mxu0 %vm919_vm3, %v4770_v33 }
 0x3e0   : > { %7473 = vmatmul.mubr.msk.f32.gmra.mrb[10].mxu0 %vm919_vm3, %v4772_v29 }
 0x3e1   : > { %7475 = vmatprep.mubr.msk.f32.mxu0 %vm919_vm3, %v4774_v21 }
 0x3e4   : > { %7476 = vmatmul.mubr.msk.f32.gmra.mrb[12].mxu0 %vm919_vm3, %v4776_v15 }
 0x3e5   : > { %7478 = vmatprep.mubr.msk.f32.mxu0 %vm919_vm3, %v4778_v61 }
 0x3e8   : > { %7479 = vmatmul.mubr.msk.f32.gmra.mrb[14].mxu0 %vm919_vm3, %v4780_v53 }
 0x3e9   : > { %7481 = vmatprep.mubr.msk.f32.mxu0 %vm919_vm3, %v4782_v39 }
 0x3ec   : > { %7482 = vmatmul.mubr.msk.f32.gmra.mrb[16].mxu0 %vm919_vm3, %v4784_v62 }
 0x3ed   : > { %7484 = vmatprep.mubr.msk.f32.mxu0 %vm919_vm3, %v4786_v32 }
 0x3f0   : > { %7485 = vmatmul.mubr.msk.f32.gmra.mrb[18].mxu0 %vm919_vm3, %v4788_v55 }
 0x3f1   : > { %7487 = vmatprep.mubr.msk.f32.mxu0 %vm919_vm3, %v4790_v17 }
 0x3f4   : > { %7488 = vmatmul.mubr.msk.f32.gmra.mrb[20].mxu0 %vm919_vm3, %v4792_v18  ;;  %v10112_v18 = vld [vmem:[%s10348_s7] ss:$0 sm:$0xff] }
 0x3f5   : > { %7490 = vmatprep.mubr.msk.f32.mxu0 %vm919_vm3, %v4794_v34  ;;  %v10618_v34 = vld [vmem:[#allocation43_spill] sm:$0xff] }
 0x3f8   : > { %7491 = vmatmul.mubr.msk.f32.gmra.mrb[22].mxu0 %vm919_vm3, %v4796_v7 }
 0x3f9   : > { %7493 = vmatprep.mubr.msk.f32.mxu0 %vm919_vm3, %v10604_v8  ;;  %v10619_v8 = vld [vmem:[#allocation62_spill] sm:$0xff] }
 0x3fc   : > { %7494 = vmatmul.mubr.msk.f32.gmra.mrb[24].mxu0 %vm919_vm3, %v10605_v12 }
 0x3fd   : > { %7496 = vmatprep.mubr.msk.f32.mxu0 %vm919_vm3, %v10606_v44  ;;  %v10119_v44 = vld [vmem:[%s10350_s9] ss:$0 sm:$0xff] }
 0x400   : > { %7497 = vmatmul.mubr.msk.f32.gmra.mrb[26].mxu0 %vm919_vm3, %v10607_v60 }
 0x401   : > { %7499 = vmatprep.mubr.msk.f32.mxu0 %vm919_vm3, %v10608_v13 }
 0x404   : > { %7500 = vmatmul.mubr.msk.f32.gmra.mrb[28].mxu0 %vm919_vm3, %v10609_v23 }
 0x405   : > { %7502 = vmatprep.mubr.msk.f32.mxu0 %vm919_vm3, %v10610_v40 }
 0x408   : > { %7503 = vmatmul.mubr.msk.f32.gmra.mrb[30].mxu0 %vm919_vm3, %v10611_v25  ;;  %v10620_v25 = vld [vmem:[#allocation44_spill] sm:$0xff] }
 0x409   : > { %7505 = vmatprep.mubr.msk.f32.mxu0 %vm919_vm3, %v9212_v3 }
 0x40c   : > { %7506 = vmatmul.mubr.msk.f32.gmra.mrb[32].mxu0 %vm919_vm3, %v9238_v16 }
 0x40d   : > { %7508 = vmatprep.mubr.msk.f32.mxu0 %vm919_vm3, %v10612_v45 }
 0x410   : > { %7509 = vmatmul.mubr.msk.f32.gmra.mrb[34].mxu0 %vm919_vm3, %v10613_v31 }
 0x421   : > { %v7515_v5 = vpop.f32.mrb[208].mxu1 }
 0x422   : > { %v5511_v30 = vpop.f32.mrb[209].mxu1 }
 0x425   : > { %v7518_v27 = vpop.f32.mrb[210].mxu1 }
 0x426   : > { %v10043_v43 = vpop.f32.mrb[211].mxu1 }
 0x429   : > { %v10045_v63 = vpop.f32.mrb[212].mxu1 }
 0x42a   : > { %v10047_v6 = vpop.f32.mrb[213].mxu1 }
 0x42d   : > { %v10049_v46 = vpop.f32.mrb[214].mxu1 }
 0x42e   : > { %v10051_v3 = vpop.f32.mrb[215].mxu1 }
 0x431   : > { %v10053_v16 = vpop.f32.mrb[216].mxu1 }
 0x432   : > { %v10055_v24 = vpop.f32.mrb[217].mxu1 }
 0x435   : > { %v10057_v38 = vpop.f32.mrb[218].mxu1 }
 0x436   : > { %v10059_v50 = vpop.f32.mrb[219].mxu1 }
 0x439   : > { %v10061_v42 = vpop.f32.mrb[220].mxu1 }
 0x43a   : > { %v10063_v54 = vpop.f32.mrb[221].mxu1 }
 0x43d   : > { %v10065_v19 = vpop.f32.mrb[222].mxu1 }
 0x43e   : > { %v10067_v33 = vpop.f32.mrb[223].mxu1 }
 0x441   : > { %v10069_v26 = vpop.f32.mrb[224].mxu1 }
 0x442   : > { %v10071_v29 = vpop.f32.mrb[225].mxu1 }
 0x445   : > { %v10073_v41 = vpop.f32.mrb[226].mxu1 }
 0x446   : > { %v10075_v21 = vpop.f32.mrb[227].mxu1 }
 0x449   : > { %v10077_v48 = vpop.f32.mrb[228].mxu1 }
 0x44a   : > { %v10079_v15 = vpop.f32.mrb[229].mxu1 }
 0x44d   : > { %v10081_v1 = vpop.f32.mrb[230].mxu1 }
 0x44e   : > { %v10083_v61 = vpop.f32.mrb[231].mxu1 }
 0x451   : > { %v10085_v28 = vpop.f32.mrb[232].mxu1 }
 0x452   : > { %v10087_v53 = vpop.f32.mrb[233].mxu1 }
 0x455   : > { %v10089_v14 = vpop.f32.mrb[234].mxu1 }
 0x456   : > { %v10091_v39 = vpop.f32.mrb[235].mxu1 }
 0x459   : > { %v10093_v2 = vpop.f32.mrb[236].mxu1 }
 0x45a   : > { %v10095_v62 = vpop.f32.mrb[237].mxu1 }
 0x45d   : > { %v10097_v20 = vpop.f32.mrb[238].mxu1 }
 0x45e   : > { %v10099_v32 = vpop.f32.mrb[239].mxu1 }
 0x461   : > { %v10101_v35 = vpop.f32.mrb[240].mxu1 }
 0x462   : > { %10614 = vst [vmem:[#allocation22_spill] sm:$0xff] %v10101_v35  ;;  %v10103_v55 = vpop.f32.mrb[241].mxu1  ;;  %v5522_v35 = vadd.f32 %v10119_v44, %v10043_v43  ;;  %v5537_v43 = vadd.f32 %v10045_v63, %v10119_v44 }
 0x463   : > { %10615 = vst [vmem:[#allocation26_spill] sm:$0xff] %v10103_v55 }
 0x465   : > { %v10105_v56 = vpop.f32.mrb[242].mxu1 }
 0x466   : > { %10616 = vst [vmem:[#allocation30_spill] sm:$0xff] %v10105_v56  ;;  %v10107_v17 = vpop.f32.mrb[243].mxu1 }
 0x467   : > { %10617 = vst [vmem:[#allocation35_spill] sm:$0xff] %v10107_v17  ;;  %v10621_v17 = vld [vmem:[#allocation68_spill] sm:$0xff] }
 0x49f   : > { %v7459_v59 = vpop.f32.mrb[0].mxu0 }
 0x4a0   : > { %v7569_v47 = vadd.f32 %v7459_v59, %v10618_v34  ;;  %v4959_v7 = vpop.f32.mrb[1].mxu0  ;;  %v5517_v59 = vadd.f32 %v7515_v5, %v10119_v44 }
 0x4a1   : > { %v7570_v12 = vadd.f32 %v4959_v7, %v10619_v8  ;;  %v5512_v8 = vadd.f32 %v10119_v44, %v5511_v30 }
 0x4a2   : > { %v5182_v60 = vadd.f32 %v7569_v47, %v10112_v18 }
 0x4a3   : > { %v5181_v13 = vadd.f32 %v7570_v12, %v10112_v18  ;;  %v7462_v23 = vpop.f32.mrb[2].mxu0 }
 0x4a4   : > { %v5218_v40 = vmul.f32 0.2, %v5182_v60  ;;  %v7571_v45 = vadd.f32 %v7462_v23, %v10620_v25  ;;  %v4969_v31 = vpop.f32.mrb[3].mxu0 }
 0x4a5   : > { %v5217_v34 = vmul.f32 0.2, %v5181_v13  ;;  %v7572_v7 = vadd.f32 %v4969_v31, %v10621_v17  ;;  %v10622_v17 = vld [vmem:[#allocation45_spill] sm:$0xff] }
 0x4a6   : > { %v5184_v56 = vadd.f32 %v7571_v45, %v10112_v18  ;;  %v5254_v55 = vmax.f32 %v5182_v60, %v5218_v40  ;;  %v5527_v45 = vadd.f32 %v7518_v27, %v10119_v44 }
 0x4a7   : > { %v5183_v47 = vadd.f32 %v7572_v7, %v10112_v18  ;;  %v5253_v12 = vmax.f32 %v5181_v13, %v5217_v34  ;;  %v7465_v5 = vpop.f32.mrb[4].mxu0  ;;  %v10623_v7 = vld [vmem:[#allocation74_spill] sm:$0xff] }
 0x4a8   : > { %v5220_v23 = vmul.f32 0.2, %v5184_v56  ;;  %v5691_v25 = vadd.f32 %v5517_v59, %v5254_v55  ;;  %v7573_v31 = vadd.f32 %v7465_v5, %v10622_v17  ;;  %v4979_v30 = vpop.f32.mrb[5].mxu0 }
 0x4a9   : > { %v5219_v60 = vmul.f32 0.2, %v5183_v47  ;;  %v5690_v40 = vadd.f32 %v5512_v8, %v5253_v12  ;;  %v7574_v22 = vadd.f32 %v4979_v30, %v10623_v7  ;;  %v10624_v12 = vld [vmem:[#allocation46_spill] sm:$0xff] }
 0x4aa   : > { %5728 = vst.msk [vmem:[%s10133_s14 + $0x8] sm:$0xff] %vm5726_vm9, %v5691_v25  ;;  %v5186_v13 = vadd.f32 %v7573_v31, %v10112_v18  ;;  %v5256_v34 = vmax.f32 %v5184_v56, %v5220_v23  ;;  %v5532_v56 = vadd.f32 %v10119_v44, %v10047_v6  ;;  %v5547_v6 = vadd.f32 %v10049_v46, %v10119_v44 }
 0x4ab   : > { %5727 = vst.msk [vmem:[%s10133_s14] sm:$0xff] %vm5726_vm9, %v5690_v40  ;;  %v5185_v55 = vadd.f32 %v7574_v22, %v10112_v18  ;;  %v5255_v59 = vmax.f32 %v5183_v47, %v5219_v60  ;;  %v7468_v27 = vpop.f32.mrb[6].mxu0  ;;  %v10626_v40 = vld [vmem:[#allocation48_spill] sm:$0xff] }
 0x4ac   : > { %v5222_v5 = vmul.f32 0.2, %v5186_v13  ;;  %v5693_v8 = vadd.f32 %v5527_v45, %v5256_v34  ;;  %v7575_v17 = vadd.f32 %v7468_v27, %v10624_v12  ;;  %v4989_v30 = vpop.f32.mrb[7].mxu0 }
 0x4ad   : > { %v5221_v25 = vmul.f32 0.2, %v5185_v55  ;;  %v5692_v7 = vadd.f32 %v5522_v35, %v5255_v59  ;;  %v7576_v31 = vadd.f32 %v4989_v30, %v10625_v37 }
 0x4ae   : > { %5730 = vst.msk [vmem:[%s10133_s14 + $0x18] sm:$0xff] %vm5726_vm9, %v5693_v8  ;;  %v5188_v22 = vadd.f32 %v7575_v17, %v10112_v18  ;;  %v5258_v47 = vmax.f32 %v5186_v13, %v5222_v5  ;;  %v10627_v8 = vld [vmem:[#allocation49_spill] sm:$0xff]  ;;  %v5542_v13 = vadd.f32 %v10119_v44, %v10051_v3  ;;  %v5557_v3 = vadd.f32 %v10053_v16, %v10119_v44 }
 0x4af   : > { %5729 = vst.msk [vmem:[%s10133_s14 + $0x10] sm:$0xff] %vm5726_vm9, %v5692_v7  ;;  %v5187_v23 = vadd.f32 %v7576_v31, %v10112_v18  ;;  %v5257_v45 = vmax.f32 %v5185_v55, %v5221_v25  ;;  %v7471_v63 = vpop.f32.mrb[8].mxu0  ;;  %v10628_v7 = vld [vmem:[#allocation50_spill] sm:$0xff] }
 0x4b0   : > { %v5224_v60 = vmul.f32 0.2, %v5188_v22  ;;  %v5695_v35 = vadd.f32 %v5537_v43, %v5258_v47  ;;  %v7577_v37 = vadd.f32 %v7471_v63, %v10626_v40  ;;  %v4999_v34 = vpop.f32.mrb[9].mxu0  ;;  %v10629_v63 = vld [vmem:[#allocation51_spill] sm:$0xff] }
 0x4b1   : > { %v5223_v59 = vmul.f32 0.2, %v5187_v23  ;;  %v5694_v27 = vadd.f32 %v5532_v56, %v5257_v45  ;;  %v7578_v12 = vadd.f32 %v4999_v34, %v10627_v8 }
 0x4b2   : > { %5732 = vst.msk [vmem:[%s10133_s14 + $0x28] sm:$0xff] %vm5726_vm9, %v5695_v35  ;;  %v5190_v55 = vadd.f32 %v7577_v37, %v10112_v18  ;;  %v5260_v5 = vmax.f32 %v5188_v22, %v5224_v60  ;;  %v5552_v22 = vadd.f32 %v10119_v44, %v10055_v24  ;;  %v5567_v24 = vadd.f32 %v10057_v38, %v10119_v44 }
 0x4b3   : > { %5731 = vst.msk [vmem:[%s10133_s14 + $0x20] sm:$0xff] %vm5726_vm9, %v5694_v27  ;;  %v5189_v17 = vadd.f32 %v7578_v12, %v10112_v18  ;;  %v5259_v30 = vmax.f32 %v5187_v23, %v5223_v59  ;;  %v7474_v46 = vpop.f32.mrb[10].mxu0  ;;  %v10630_v59 = vld [vmem:[#allocation52_spill] sm:$0xff] }
 0x4b4   : > { %v5226_v43 = vmul.f32 0.2, %v5190_v55  ;;  %v5697_v25 = vadd.f32 %v5547_v6, %v5260_v5  ;;  %v7579_v31 = vadd.f32 %v7474_v46, %v10628_v7  ;;  %v5009_v56 = vpop.f32.mrb[11].mxu0  ;;  %v10631_v5 = vld [vmem:[#allocation57_spill] sm:$0xff] }
 0x4b5   : > { %v5225_v47 = vmul.f32 0.2, %v5189_v17  ;;  %v5696_v45 = vadd.f32 %v5542_v13, %v5259_v30  ;;  %v7580_v35 = vadd.f32 %v5009_v56, %v10629_v63 }
 0x4b6   : > { %5734 = vst.msk [vmem:[%s10133_s14 + $0x38] sm:$0xff] %vm5726_vm9, %v5697_v25  ;;  %v5192_v23 = vadd.f32 %v7579_v31, %v10112_v18  ;;  %v5262_v60 = vmax.f32 %v5190_v55, %v5226_v43  ;;  %v5562_v55 = vadd.f32 %v10119_v44, %v10059_v50  ;;  %v5577_v50 = vadd.f32 %v10061_v42, %v10119_v44 }
 0x4b7   : > { %5733 = vst.msk [vmem:[%s10133_s14 + $0x30] sm:$0xff] %vm5726_vm9, %v5696_v45  ;;  %v5191_v40 = vadd.f32 %v7580_v35, %v10112_v18  ;;  %v5261_v37 = vmax.f32 %v5189_v17, %v5225_v47  ;;  %v7477_v16 = vpop.f32.mrb[12].mxu0  ;;  %v5572_v35 = vadd.f32 %v10119_v44, %v10063_v54  ;;  %v5587_v54 = vadd.f32 %v10065_v19, %v10119_v44 }
 0x4b8   : > { %v5228_v34 = vmul.f32 0.2, %v5192_v23  ;;  %v5699_v6 = vadd.f32 %v5557_v3, %v5262_v60  ;;  %v7581_v27 = vadd.f32 %v7477_v16, %v10630_v59  ;;  %v5019_v8 = vpop.f32.mrb[13].mxu0  ;;  %v10632_v16 = vld [vmem:[#allocation63_spill] sm:$0xff] }
 0x4b9   : > { %v5227_v12 = vmul.f32 0.2, %v5191_v40  ;;  %v5698_v13 = vadd.f32 %v5552_v22, %v5261_v37  ;;  %v7582_v30 = vadd.f32 %v5019_v8, %v10631_v5  ;;  %v5582_v8 = vadd.f32 %v10119_v44, %v10067_v33 }
 0x4ba   : > { %5736 = vst.msk [vmem:[%s10133_s14 + $0x48] sm:$0xff] %vm5726_vm9, %v5699_v6  ;;  %v5194_v17 = vadd.f32 %v7581_v27, %v10112_v18  ;;  %v5264_v46 = vmax.f32 %v5192_v23, %v5228_v34  ;;  %v5597_v33 = vadd.f32 %v10069_v26, %v10119_v44 }
 0x4bb   : > { %5735 = vst.msk [vmem:[%s10133_s14 + $0x40] sm:$0xff] %vm5726_vm9, %v5698_v13  ;;  %v5193_v43 = vadd.f32 %v7582_v30, %v10112_v18  ;;  %v5263_v25 = vmax.f32 %v5191_v40, %v5227_v12  ;;  %v7480_v38 = vpop.f32.mrb[14].mxu0 }
 0x4bc   : > { %v5230_v7 = vmul.f32 0.2, %v5194_v17  ;;  %v5701_v31 = vadd.f32 %v5567_v24, %v5264_v46  ;;  %v7583_v56 = vadd.f32 %v7480_v38, %v9628_v52  ;;  %v5029_v3 = vpop.f32.mrb[15].mxu0  ;;  %v10634_v38 = vld [vmem:[#allocation75_spill] sm:$0xff] }
 0x4bd   : > { %v5229_v47 = vmul.f32 0.2, %v5193_v43  ;;  %v5700_v45 = vadd.f32 %v5562_v55, %v5263_v25  ;;  %v7584_v63 = vadd.f32 %v5029_v3, %v9630_v57 }
 0x4be   : > { %5738 = vst.msk [vmem:[%s10133_s14 + $0x58] sm:$0xff] %vm5726_vm9, %v5701_v31  ;;  %v5196_v22 = vadd.f32 %v7583_v56, %v10112_v18  ;;  %v5266_v23 = vmax.f32 %v5194_v17, %v5230_v7  ;;  %v10633_v17 = vld [vmem:[#allocation69_spill] sm:$0xff]  ;;  %v5592_v31 = vadd.f32 %v10119_v44, %v10071_v29  ;;  %v5607_v29 = vadd.f32 %v10073_v41, %v10119_v44 }
 0x4bf   : > { %5737 = vst.msk [vmem:[%s10133_s14 + $0x50] sm:$0xff] %vm5726_vm9, %v5700_v45  ;;  %v5195_v52 = vadd.f32 %v7584_v63, %v10112_v18  ;;  %v5265_v60 = vmax.f32 %v5193_v43, %v5229_v47  ;;  %v7483_v42 = vpop.f32.mrb[16].mxu0 }
 0x4c0   : > { %v5232_v40 = vmul.f32 0.2, %v5196_v22  ;;  %v5703_v37 = vadd.f32 %v5577_v50, %v5266_v23  ;;  %v7585_v57 = vadd.f32 %v7483_v42, %v10632_v16  ;;  %v5039_v34 = vpop.f32.mrb[17].mxu0  ;;  %v10636_v42 = vld [vmem:[#allocation85_spill] sm:$0xff] }
 0x4c1   : > { %v5231_v6 = vmul.f32 0.2, %v5195_v52  ;;  %v5702_v59 = vadd.f32 %v5572_v35, %v5265_v60  ;;  %v7586_v27 = vadd.f32 %v5039_v34, %v9643_v36  ;;  %v10635_v35 = vld [vmem:[#allocation80_spill] sm:$0xff] }
 0x4c2   : > { %5740 = vst.msk [vmem:[%s10133_s14 + $0x68] sm:$0xff] %vm5726_vm9, %v5703_v37  ;;  %v5198_v24 = vadd.f32 %v7585_v57, %v10112_v18  ;;  %v5268_v12 = vmax.f32 %v5196_v22, %v5232_v40  ;;  %v5602_v37 = vadd.f32 %v10119_v44, %v10075_v21  ;;  %v5617_v21 = vadd.f32 %v10077_v48, %v10119_v44 }
 0x4c3   : > { %5739 = vst.msk [vmem:[%s10133_s14 + $0x60] sm:$0xff] %vm5726_vm9, %v5702_v59  ;;  %v5197_v13 = vadd.f32 %v7586_v27, %v10112_v18  ;;  %v5267_v5 = vmax.f32 %v5195_v52, %v5231_v6  ;;  %v7486_v19 = vpop.f32.mrb[18].mxu0  ;;  %v10637_v27 = vld [vmem:[#allocation2_spill] sm:$0xff] }
 0x4c4   : > { %v5234_v30 = vmul.f32 0.2, %v5198_v24  ;;  %v5705_v55 = vadd.f32 %v5587_v54, %v5268_v12  ;;  %v7587_v36 = vadd.f32 %v7486_v19, %v10633_v17  ;;  %v5049_v46 = vpop.f32.mrb[19].mxu0 }
 0x4c5   : > { %v5233_v43 = vmul.f32 0.2, %v5197_v13  ;;  %v5704_v25 = vadd.f32 %v5582_v8, %v5267_v5  ;;  %v7588_v7 = vadd.f32 %v5049_v46, %v10634_v38  ;;  %v10638_v5 = vld [vmem:[#allocation4_spill] sm:$0xff] }
 0x4c6   : > { %5742 = vst.msk [vmem:[%s10133_s14 + $0x78] sm:$0xff] %vm5726_vm9, %v5705_v55  ;;  %v5200_v56 = vadd.f32 %v7587_v36, %v10112_v18  ;;  %v5270_v3 = vmax.f32 %v5198_v24, %v5234_v30  ;;  %v5612_v30 = vadd.f32 %v10119_v44, %v10079_v15  ;;  %v5627_v15 = vadd.f32 %v10081_v1, %v10119_v44 }
 0x4c7   : > { %5741 = vst.msk [vmem:[%s10133_s14 + $0x70] sm:$0xff] %vm5726_vm9, %v5704_v25  ;;  %v5199_v50 = vadd.f32 %v7588_v7, %v10112_v18  ;;  %v5269_v47 = vmax.f32 %v5197_v13, %v5233_v43  ;;  %v7489_v26 = vpop.f32.mrb[20].mxu0  ;;  %v10639_v25 = vld [vmem:[#allocation6_spill] sm:$0xff] }
 0x4c8   : > { %v5236_v45 = vmul.f32 0.2, %v5200_v56  ;;  %v5707_v63 = vadd.f32 %v5597_v33, %v5270_v3  ;;  %v7589_v22 = vadd.f32 %v7489_v26, %v10635_v35  ;;  %v5059_v23 = vpop.f32.mrb[21].mxu0 }
 0x4c9   : > { %v5235_v52 = vmul.f32 0.2, %v5199_v50  ;;  %v5706_v60 = vadd.f32 %v5592_v31, %v5269_v47  ;;  %v7590_v40 = vadd.f32 %v5059_v23, %v10636_v42 }
 0x4ca   : > { %5744 = vst.msk [vmem:[%s10133_s14 + $0x88] sm:$0xff] %vm5726_vm9, %v5707_v63  ;;  %v5202_v16 = vadd.f32 %v7589_v22, %v10112_v18  ;;  %v5272_v57 = vmax.f32 %v5200_v56, %v5236_v45 }
 0x4cb   : > { %5743 = vst.msk [vmem:[%s10133_s14 + $0x80] sm:$0xff] %vm5726_vm9, %v5706_v60  ;;  %v5201_v34 = vadd.f32 %v7590_v40, %v10112_v18  ;;  %v5271_v54 = vmax.f32 %v5199_v50, %v5235_v52  ;;  %v7492_v41 = vpop.f32.mrb[22].mxu0  ;;  %v5622_v50 = vadd.f32 %v10119_v44, %v10083_v61  ;;  %v5637_v61 = vadd.f32 %v10085_v28, %v10119_v44  ;;  %v10640_v60 = vld [vmem:[#allocation10_spill] sm:$0xff] }
 0x4cc   : > { %v5238_v6 = vmul.f32 0.2, %v5202_v16  ;;  %v5709_v59 = vadd.f32 %v5607_v29, %v5272_v57  ;;  %v7591_v8 = vadd.f32 %v7492_v41, %v10637_v27  ;;  %v5069_v24 = vpop.f32.mrb[23].mxu0  ;;  %v5632_v40 = vadd.f32 %v10119_v44, %v10087_v53 }
 0x4cd   : > { %v5237_v12 = vmul.f32 0.2, %v5201_v34  ;;  %v5708_v13 = vadd.f32 %v5602_v37, %v5271_v54  ;;  %v7592_v19 = vadd.f32 %v5069_v24, %v10638_v5  ;;  %v5647_v53 = vadd.f32 %v10089_v14, %v10119_v44 }
 0x4ce   : > { %5746 = vst.msk [vmem:[%s10133_s14 + $0x98] sm:$0xff] %vm5726_vm9, %v5709_v59  ;;  %v5204_v55 = vadd.f32 %v7591_v8, %v10112_v18  ;;  %v5274_v17 = vmax.f32 %v5202_v16, %v5238_v6  ;;  %v5642_v24 = vadd.f32 %v10119_v44, %v10091_v39  ;;  %v5657_v39 = vadd.f32 %v10093_v2, %v10119_v44 }
 0x4cf   : > { %5745 = vst.msk [vmem:[%s10133_s14 + $0x90] sm:$0xff] %vm5726_vm9, %v5708_v13  ;;  %v5203_v36 = vadd.f32 %v7592_v19, %v10112_v18  ;;  %v5273_v46 = vmax.f32 %v5201_v34, %v5237_v12  ;;  %v7495_v48 = vpop.f32.mrb[24].mxu0 }
 0x4d0   : > { %v5240_v33 = vmul.f32 0.2, %v5204_v55  ;;  %v5711_v43 = vadd.f32 %v5617_v21, %v5274_v17  ;;  %v7593_v38 = vadd.f32 %v7495_v48, %v10639_v25  ;;  %v5079_v7 = vpop.f32.mrb[25].mxu0 }
 0x4d1   : > { %v5239_v31 = vmul.f32 0.2, %v5203_v36  ;;  %v5710_v56 = vadd.f32 %v5612_v30, %v5273_v46  ;;  %v7594_v3 = vadd.f32 %v5079_v7, %v9679_v10  ;;  %v5652_v46 = vadd.f32 %v10119_v44, %v10095_v62 }
 0x4d2   : > { %5748 = vst.msk [vmem:[%s10133_s14 + $0xa8] sm:$0xff] %vm5726_vm9, %v5711_v43  ;;  %v5206_v47 = vadd.f32 %v7593_v38, %v10112_v18  ;;  %v5276_v26 = vmax.f32 %v5204_v55, %v5240_v33  ;;  %v5667_v62 = vadd.f32 %v10097_v20, %v10119_v44 }
 0x4d3   : > { %5747 = vst.msk [vmem:[%s10133_s14 + $0xa0] sm:$0xff] %vm5726_vm9, %v5710_v56  ;;  %v5205_v45 = vadd.f32 %v7594_v3, %v10112_v18  ;;  %v5275_v63 = vmax.f32 %v5203_v36, %v5239_v31  ;;  %v7498_v1 = vpop.f32.mrb[26].mxu0  ;;  %v5662_v3 = vadd.f32 %v10119_v44, %v10099_v32  ;;  %v10642_v32 = vld [vmem:[#allocation22_spill] sm:$0xff] }
 0x4d4   : > { %v5242_v35 = vmul.f32 0.2, %v5206_v47  ;;  %v5713_v22 = vadd.f32 %v5627_v15, %v5276_v26  ;;  %v7595_v10 = vadd.f32 %v7498_v1, %v9686_v9  ;;  %v5089_v23 = vpop.f32.mrb[27].mxu0  ;;  %v10641_v1 = vld [vmem:[#allocation14_spill] sm:$0xff] }
 0x4d5   : > { %v5241_v29 = vmul.f32 0.2, %v5205_v45  ;;  %v5712_v52 = vadd.f32 %v5622_v50, %v5275_v63  ;;  %v7596_v42 = vadd.f32 %v5089_v23, %v10640_v60 }
 0x4d6   : > { %5750 = vst.msk [vmem:[%s10133_s14 + $0xb8] sm:$0xff] %vm5726_vm9, %v5713_v22  ;;  %v5208_v37 = vadd.f32 %v7595_v10, %v10112_v18  ;;  %v5278_v16 = vmax.f32 %v5206_v47, %v5242_v35  ;;  %v5677_v22 = vadd.f32 %v10642_v32, %v10119_v44 }
 0x4d7   : > { %5749 = vst.msk [vmem:[%s10133_s14 + $0xb0] sm:$0xff] %vm5726_vm9, %v5712_v52  ;;  %v5207_v9 = vadd.f32 %v7596_v42, %v10112_v18  ;;  %v5277_v57 = vmax.f32 %v5205_v45, %v5241_v29  ;;  %v7501_v28 = vpop.f32.mrb[28].mxu0  ;;  %v10644_v52 = vld [vmem:[#allocation26_spill] sm:$0xff] }
 0x4d8   : > { %v5244_v34 = vmul.f32 0.2, %v5208_v37  ;;  %v5715_v54 = vadd.f32 %v5637_v61, %v5278_v16  ;;  %v7597_v41 = vadd.f32 %v7501_v28, %v9700_v11  ;;  %v5099_v6 = vpop.f32.mrb[29].mxu0  ;;  %v10643_v61 = vld [vmem:[#allocation18_spill] sm:$0xff]  ;;  %v5672_v60 = vadd.f32 %v10119_v44, %v10644_v52 }
 0x4d9   : > { %v5243_v59 = vmul.f32 0.2, %v5207_v9  ;;  %v5714_v27 = vadd.f32 %v5632_v40, %v5277_v57  ;;  %v7598_v8 = vadd.f32 %v5099_v6, %v9703_v58  ;;  %v10645_v28 = vld [vmem:[#allocation30_spill] sm:$0xff]  ;;  %v10646_v6 = vld [vmem:[#allocation35_spill] sm:$0xff] }
 0x4da   : > { %5752 = vst.msk [vmem:[%s10133_s14 + $0xc8] sm:$0xff] %vm5726_vm9, %v5715_v54  ;;  %v5210_v21 = vadd.f32 %v7597_v41, %v10112_v18  ;;  %v5280_v12 = vmax.f32 %v5208_v37, %v5244_v34  ;;  %v5687_v34 = vadd.f32 %v10645_v28, %v10119_v44 }
 0x4db   : > { %5751 = vst.msk [vmem:[%s10133_s14 + $0xc0] sm:$0xff] %vm5726_vm9, %v5714_v27  ;;  %v5209_v11 = vadd.f32 %v7598_v8, %v10112_v18  ;;  %v5279_v13 = vmax.f32 %v5207_v9, %v5243_v59  ;;  %v7504_v14 = vpop.f32.mrb[30].mxu0 }
 0x4dc   : > { %v5246_v5 = vmul.f32 0.2, %v5210_v21  ;;  %v5717_v19 = vadd.f32 %v5647_v53, %v5280_v12  ;;  %v7599_v58 = vadd.f32 %v7504_v14, %v9714_v51  ;;  %v5109_v30 = vpop.f32.mrb[31].mxu0  ;;  %v5682_v53 = vadd.f32 %v10119_v44, %v10646_v6 }
 0x4dd   : > { %v5245_v55 = vmul.f32 0.2, %v5209_v11  ;;  %v5716_v17 = vadd.f32 %v5642_v24, %v5279_v13  ;;  %v7600_v36 = vadd.f32 %v5109_v30, %v9717_v49 }
 0x4de   : > { %5754 = vst.msk [vmem:[%s10133_s14 + $0xd8] sm:$0xff] %vm5726_vm9, %v5717_v19  ;;  %v5212_v48 = vadd.f32 %v7599_v58, %v10112_v18  ;;  %v5282_v33 = vmax.f32 %v5210_v21, %v5246_v5 }
 0x4df   : > { %5753 = vst.msk [vmem:[%s10133_s14 + $0xd0] sm:$0xff] %vm5726_vm9, %v5716_v17  ;;  %v5211_v51 = vadd.f32 %v7600_v36, %v10112_v18  ;;  %v5281_v43 = vmax.f32 %v5209_v11, %v5245_v55  ;;  %v7507_v2 = vpop.f32.mrb[32].mxu0 }
 0x4e0   : > { %v5248_v25 = vmul.f32 0.2, %v5212_v48  ;;  %v5719_v38 = vadd.f32 %v5657_v39, %v5282_v33  ;;  %v7601_v49 = vadd.f32 %v7507_v2, %v9728_v4  ;;  %v5119_v7 = vpop.f32.mrb[33].mxu0 }
 0x4e1   : > { %v5247_v15 = vmul.f32 0.2, %v5211_v51  ;;  %v5718_v31 = vadd.f32 %v5652_v46, %v5281_v43  ;;  %v7602_v56 = vadd.f32 %v5119_v7, %v9731_v0 }
 0x4e2   : > { %5756 = vst.msk [vmem:[%s10133_s14 + $0xe8] sm:$0xff] %vm5726_vm9, %v5719_v38  ;;  %v5214_v50 = vadd.f32 %v7601_v49, %v10112_v18  ;;  %v5284_v47 = vmax.f32 %v5212_v48, %v5248_v25 }
 0x4e3   : > { %5755 = vst.msk [vmem:[%s10133_s14 + $0xe0] sm:$0xff] %vm5726_vm9, %v5718_v31  ;;  %v5213_v4 = vadd.f32 %v7602_v56, %v10112_v18  ;;  %v5283_v26 = vmax.f32 %v5211_v51, %v5247_v15  ;;  %v7510_v20 = vpop.f32.mrb[34].mxu0 }
 0x4e4   : > { %v5250_v45 = vmul.f32 0.2, %v5214_v50  ;;  %v5721_v63 = vadd.f32 %v5667_v62, %v5284_v47  ;;  %v7603_v0 = vadd.f32 %v7510_v20, %v10641_v1  ;;  %v5129_v35 = vpop.f32.mrb[35].mxu0 }
 0x4e5   : > { %v5249_v10 = vmul.f32 0.2, %v5213_v4  ;;  %v5720_v23 = vadd.f32 %v5662_v3, %v5283_v26  ;;  %v7604_v29 = vadd.f32 %v5129_v35, %v10643_v61 }
 0x4e6   : > { %5758 = vst.msk [vmem:[%s10133_s14 + $0xf8] sm:$0xff] %vm5726_vm9, %v5721_v63  ;;  %v5216_v42 = vadd.f32 %v7603_v0, %v10112_v18  ;;  %v5286_v40 = vmax.f32 %v5214_v50, %v5250_v45 }
 0x4e7   : > { %5757 = vst.msk [vmem:[%s10133_s14 + $0xf0] sm:$0xff] %vm5726_vm9, %v5720_v23  ;;  %v5215_v37 = vadd.f32 %v7604_v29, %v10112_v18  ;;  %v5285_v16 = vmax.f32 %v5213_v4, %v5249_v10 }
 0x4e8   : > { %v5252_v9 = vmul.f32 0.2, %v5216_v42  ;;  %v5723_v57 = vadd.f32 %v5677_v22, %v5286_v40 }
 0x4e9   : > { %v5251_v54 = vmul.f32 0.2, %v5215_v37  ;;  %v5722_v41 = vadd.f32 %v5672_v60, %v5285_v16 }
 0x4ea   : > { %5760 = vst.msk [vmem:[%s10133_s14 + $0x108] sm:$0xff] %vm5726_vm9, %v5723_v57  ;;  %v5288_v59 = vmax.f32 %v5216_v42, %v5252_v9 }
 0x4eb   : > { %5759 = vst.msk [vmem:[%s10133_s14 + $0x100] sm:$0xff] %vm5726_vm9, %v5722_v41  ;;  %v5287_v27 = vmax.f32 %v5215_v37, %v5251_v54 }
 0x4ec   : > { %v5725_v8 = vadd.f32 %v5687_v34, %v5288_v59 }
 0x4ed   : > { %v5724_v24 = vadd.f32 %v5682_v53, %v5287_v27 }
 0x4ee   : > { %5762 = vst.msk [vmem:[%s10133_s14 + $0x118] sm:$0xff] %vm5726_vm9, %v5725_v8 }
 0x4ef   : > { %5761 = vst.msk [vmem:[%s10133_s14 + $0x110] sm:$0xff] %vm5726_vm9, %v5724_v24 }
 0x4f0 PF: > { %s20_s13 = sadd.s32 1, %s7916_s13  }
 0x4f1   : > { %p17_p4 = scmp.ge.s32.totalorder %s20_s13, 4  }
 0x4f3   :  { %19 = sbr.rel (!%p17_p4) target bundleno = 1 (0x1), region = 98 }

// kernel: down_forward.3
= control target key start
LH: loop header
LB: loop body
LE: loop exit
PB: predicated region body
PF: predicated region fallthrough
CT: control target
= control target key end

     0   :  { %s2356_s21 = smov 0   ;;  %s2993_s0 = inlined_call_operand.vmem [shape: bf16[2,112,128], index: 0, kind: input, shape index: {}]   ;;  %s2994_s1 = inlined_call_operand.vmem [shape: bf16[1152,32], index: 1, kind: input, shape index: {}]   ;;  %s2995_s2 = inlined_call_operand.vmem [shape: f32[1,32], index: 2, kind: input, shape index: {}]   ;;  %s2996_s3 = inlined_call_operand.vmem [shape: f32[1,32], index: 3, kind: input, shape index: {}]   ;;  %s2997_s4 = inlined_call_operand.vmem [shape: f32[1,32], index: 4, kind: input, shape index: {}]   ;;  %s2998_s5 = inlined_call_operand.vmem [shape: f32[80,1], index: 5, kind: input, shape index: {}]   ;;  %s2999_s6 = inlined_call_operand.vmem [shape: f32[2,80,32], index: 6, kind: output, shape index: {}]  }
   0x1 LB: > { %s1860_s22 = sadd.s32 4294967295, %s2316_s21   ;;  %p1864_p0 = scmp.ge.s32.totalorder %s2316_s21, 1  ;;  %s2316_s21 = sphi %s2356_s21, %s16_s21  }
   0x2   : > { %p212_p1 = scmp.lt.s32.totalorder %s2316_s21, 3 }
   0x4   : > { %p213_p2 = pnand %p1864_p0, %p212_p1 }
   0x5   : > { %v2222_v0 = vld [vmem:[%s2994_s1 + $0x40] sm:$0xff] (!%p213_p2)   ;;  %v2226_v4 = vld [vmem:[%s2994_s1 + $0x48] sm:$0xff] (!%p213_p2)   ;;  %v2230_v8 = vld [vmem:[%s2994_s1 + $0x50] sm:$0xff] (!%p213_p2)   ;;  %v2318_v13 = vmov (!%p213_p2), 0   ;;  %p242_p3 = scmp.lt.s32.totalorder (!%p213_p2), %s1860_s22, 1  ;;  %vm351_vm0 = vcmask (!%p213_p2), 1046528  }
   0x6   : > { %216 = sbr.rel (%p213_p2) target bundleno = 447 (0x1bf), region = 44  ;;  %v2223_v1 = vld [vmem:[%s2994_s1 + $0xc0] sm:$0xff] (!%p213_p2)   ;;  %1958 = vmatprep.subr.bf16.mxu0 (!%p213_p2), %v2222_v0  ;;  %v2227_v5 = vld [vmem:[%s2994_s1 + $0xc8] sm:$0xff] (!%p213_p2)   ;;  %v2231_v9 = vld [vmem:[%s2994_s1 + $0xd0] sm:$0xff] (!%p213_p2)   ;;  %2220 = vset.pattern.permute.xlu0 (!%p213_p2), %v2318_v13  ;;  %vm290_vm1 = vsmask.f32 (!%p213_p2), 7424 }
   0x7   : > { %v2224_v2 = vld [vmem:[%s2994_s1] sm:$0xff] (!%p213_p2)   ;;  %2004 = vmatprep.subr.bf16.mxu1 (!%p213_p2), %v2223_v1  ;;  %v2228_v6 = vld [vmem:[%s2994_s1 + $0x8] sm:$0xff] (!%p213_p2)   ;;  %v2232_v10 = vld [vmem:[%s2994_s1 + $0x10] sm:$0xff] (!%p213_p2)   ;;  %2221 = vset.pattern.permute.xlu1 (!%p213_p2), %v2318_v13  ;;  %vm470_vm2 = vcmask (!%p213_p2), 1045504   ;;  %vm517_vm3 = vsmask.f32 (!%p213_p2), 5376 }
   0x8   : > { %v2225_v3 = vld [vmem:[%s2994_s1 + $0x80] sm:$0xff] (!%p213_p2)   ;;  %1959 = vmatpush3.bf16.msra.mxu0 (!%p213_p2), %v2224_v2  ;;  %v2229_v7 = vld [vmem:[%s2994_s1 + $0x88] sm:$0xff] (!%p213_p2)   ;;  %v2233_v11 = vld [vmem:[%s2994_s1 + $0x90] sm:$0xff] (!%p213_p2)   ;;  %vm406_vm4 = vsmask.f32 (!%p213_p2), 6400  ;;  %vm561_vm5 = vcmask (!%p213_p2), 1044480  }
   0x9   : > { %2005 = vmatpush3.bf16.msra.mxu1 (!%p213_p2), %v2225_v3  ;;  %1960 = vmatprep.subr.bf16.mxu0 (!%p213_p2), %v2226_v4  ;;  %v2234_v12 = vld [vmem:[%s2994_s1 + $0x58] sm:$0xff] (!%p213_p2)   ;;  %v2238_v17 = vld [vmem:[%s2994_s1 + $0x60] sm:$0xff] (!%p213_p2)   ;;  %v2242_v21 = vld [vmem:[%s2994_s1 + $0x68] sm:$0xff] (!%p213_p2)   ;;  %vm2320_vm6 = vmmov (!%p213_p2), 0   ;;  %vm1646_vm7 = vcmask (!%p213_p2), 261120  }
   0xa   : > { %2006 = vmatprep.subr.bf16.mxu1 (!%p213_p2), %v2227_v5  ;;  %v2235_v14 = vld [vmem:[%s2994_s1 + $0xd8] sm:$0xff] (!%p213_p2)   ;;  %v2239_v18 = vld [vmem:[%s2994_s1 + $0xe0] sm:$0xff] (!%p213_p2)   ;;  %v2243_v22 = vld [vmem:[%s2994_s1 + $0xe8] sm:$0xff] (!%p213_p2)  }
   0xb   : > { %v2236_v15 = vld [vmem:[%s2994_s1 + $0x18] sm:$0xff] (!%p213_p2)   ;;  %v2240_v19 = vld [vmem:[%s2994_s1 + $0x20] sm:$0xff] (!%p213_p2)   ;;  %v2244_v23 = vld [vmem:[%s2994_s1 + $0x28] sm:$0xff] (!%p213_p2)  }
   0xc   : > { %1961 = vmatpush3.bf16.msra.mxu0 (!%p213_p2), %v2228_v6  ;;  %v2237_v16 = vld [vmem:[%s2994_s1 + $0x98] sm:$0xff] (!%p213_p2)   ;;  %v2241_v20 = vld [vmem:[%s2994_s1 + $0xa0] sm:$0xff] (!%p213_p2)   ;;  %v2245_v24 = vld [vmem:[%s2994_s1 + $0xa8] sm:$0xff] (!%p213_p2)  }
   0xd   : > { %2007 = vmatpush3.bf16.msra.mxu1 %v2229_v7  ;;  %1962 = vmatprep.subr.bf16.mxu0 %v2230_v8  ;;  %s3001_s22 = smov (!%p242_p3, %s1860_s22), 1  ;;  %v2246_v25 = vld [vmem:[%s2994_s1 + $0x70] sm:$0xff]   ;;  %v2250_v29 = vld [vmem:[%s2994_s1 + $0x78] sm:$0xff]   ;;  %v2259_v47 = vld [vmem:[%s2994_s1 + $0x140] sm:$0xff]  }
   0xe   : > { %2008 = vmatprep.subr.bf16.mxu1 %v2231_v9  ;;  %v2247_v26 = vld [vmem:[%s2994_s1 + $0xf0] sm:$0xff]   ;;  %s2207_s7 = smul.u32 56, %s3001_s22  ;;  %v2251_v30 = vld [vmem:[%s2994_s1 + $0xf8] sm:$0xff]   ;;  %v2260_v56 = vld [vmem:[%s2994_s1 + $0x100] sm:$0xff]  }
   0xf   : > { %v2248_v27 = vld [vmem:[%s2994_s1 + $0x30] sm:$0xff]   ;;  %v2252_v31 = vld [vmem:[%s2994_s1 + $0x38] sm:$0xff]   ;;  %v2261_v58 = vld [vmem:[%s2994_s1 + $0x148] sm:$0xff]   ;;  %s2208_s24 = smul.u32 80, %s3001_s22 }
  0x10   : > { %1963 = vmatpush3.bf16.msra.mxu0 %v2232_v10  ;;  %v2249_v28 = vld [vmem:[%s2994_s1 + $0xb0] sm:$0xff]   ;;  %s2464_s18 = scalar_lea.vmem %s2993_s0, %s2207_s7  ;;  %v2253_v32 = vld [vmem:[%s2994_s1 + $0xb8] sm:$0xff]   ;;  %v2265_v5 = vld [vmem:[%s2994_s1 + $0x1c0] sm:$0xff]  }
  0x11   : > { %2009 = vmatpush3.bf16.msra.mxu1 %v2233_v11  ;;  %1964 = vmatprep.subr.bf16.mxu0 %v2234_v12  ;;  %v253_v33 = vld [vmem:[%s2464_s18] sm:$0xf]  ;;  %v254_v34 = vld [vmem:[%s2464_s18 + $0x4] sm:$0xf]  ;;  %v255_v35 = vld [vmem:[%s2464_s18 + $0x8] sm:$0xf]  ;;  %s251_s22 = scalar_lea.vmem %s2999_s6, %s2208_s24 }
  0x12   : > { %2010 = vmatprep.subr.bf16.mxu1 %v2235_v14  ;;  %v256_v36 = vld [vmem:[%s2464_s18 + $0xc] sm:$0xf]  ;;  %v1867_v37 = vcombine.low %v253_v33, %v254_v34  ;;  %v257_v38 = vld [vmem:[%s2464_s18 + $0x10] sm:$0xf]  ;;  %v2477_v39 = vcombine.low %v254_v34, %v255_v35  ;;  %v258_v41 = vld [vmem:[%s2464_s18 + $0x14] sm:$0xf] }
  0x13   : > { %v2479_v40 = vcombine.low %v255_v35, %v256_v36  ;;  %v2482_v42 = vcombine.low %v256_v36, %v257_v38  ;;  %v2484_v45 = vcombine.low %v257_v38, %v258_v41  ;;  %v259_v61 = vld [vmem:[%s2464_s18 + $0x18] sm:$0xf]  ;;  %v260_v63 = vld [vmem:[%s2464_s18 + $0x1c] sm:$0xf]  ;;  %v2266_v7 = vld [vmem:[%s2994_s1 + $0x180] sm:$0xff]  }
  0x14   : > { %1965 = vmatpush3.bf16.msra.mxu0 %v2236_v15  ;;  %v292_v43 = vshrl.u32 %v1867_v37, 16  ;;  %v294_v44 = vshll.u32 %v1867_v37, 16  ;;  %v385_v46 = vrot.slane %v2477_v39, 1  ;;  %v352_v50 = vrot.slane %v1867_v37, 1  ;;  %v2262_v8 = vld [vmem:[%s2994_s1 + $0x108] sm:$0xff]   ;;  %v2267_v12 = vld [vmem:[%s2994_s1 + $0x150] sm:$0xff]  }
  0x15   : > { %2011 = vmatpush3.bf16.msra.mxu1 %v2237_v16  ;;  %1966 = vmatprep.subr.bf16.mxu0 %v2238_v17  ;;  %v299_v48 = vshll.u32 %v2479_v40, 16  ;;  %v386_v49 = vrot.slane %v2482_v42, 1  ;;  %v353_v51 = vrot.slane %v2479_v40, 1  ;;  %v303_v59 = vshrl.u32 %v2479_v40, 16  ;;  %v2269_v15 = vld [vmem:[%s2994_s1 + $0x1c8] sm:$0xff]   ;;  %v2274_v33 = vld [vmem:[%s2994_s1 + $0x118] sm:$0xff]  }
  0x16   : > { %2012 = vmatprep.subr.bf16.mxu1 %v2239_v18  ;;  %v296_v52 = vrot.slane %v294_v44, 1  ;;  %v307_v60 = vshll.u32 %v2484_v45, 16  ;;  %v355_v62 = vrot.slane %v2484_v45, 1  ;;  %v2508_v0 = vcombine.low %v258_v41, %v259_v61  ;;  %v2270_v17 = vld [vmem:[%s2994_s1 + $0x188] sm:$0xff]   ;;  %v2278_v34 = vld [vmem:[%s2994_s1 + $0x1d8] sm:$0xff]  }
  0x17   : > { %v301_v53 = vrot.slane %v299_v48, 1  ;;  %v387_v54 = vsel %vm351_vm0, %v385_v46, %v386_v49  ;;  %v354_v55 = vsel %vm351_vm0, %v352_v50, %v353_v51  ;;  %v2515_v4 = vcombine.low %v259_v61, %v260_v63  ;;  %v2280_v44 = vld [vmem:[%s2994_s1 + $0x198] sm:$0xff]   ;;  %v2282_v50 = vld [vmem:[%s2994_s1 + $0x1e0] sm:$0xff]  }
  0x18   : > { %1967 = vmatpush3.bf16.msra.mxu0 %v2240_v19  ;;  %v297_v57 = vor.u32 %v296_v52, %v292_v43  ;;  %1316 = vmatprep.mubr.bf16.mxu1 %v387_v54  ;;  %v309_v3 = vrot.slane %v307_v60, 1  ;;  %v388_v6 = vrot.slane %v2508_v0, 1  ;;  %v311_v10 = vshrl.u32 %v2484_v45, 16  ;;  %v261_v19 = vld [vmem:[%s2464_s18 + $0x20] sm:$0xf]  ;;  %v2283_v54 = vld [vmem:[%s2994_s1 + $0x168] sm:$0xff]  }
  0x19   : > { %2013 = vmatpush3.bf16.msra.mxu1 %v2241_v20  ;;  %1968 = vmatprep.subr.bf16.mxu0 %v2242_v21  ;;  %v305_v2 = vor.u32 %v303_v59, %v301_v53  ;;  %v315_v13 = vshll.u32 %v2515_v4, 16  ;;  %v356_v14 = vsel %vm351_vm0, %v353_v51, %v355_v62  ;;  %v262_v20 = vld [vmem:[%s2464_s18 + $0x24] sm:$0xf]  ;;  %v2268_v21 = vld [vmem:[%s2994_s1 + $0x110] sm:$0xff]   ;;  %v471_v35 = vrot.slane %v2477_v39, 2 }
  0x1a   : > { %2014 = vmatprep.subr.bf16.mxu1 %v2243_v22  ;;  %v302_v1 = vsel %vm290_vm1, %v297_v57, %v301_v53  ;;  %v389_v11 = vsel %vm351_vm0, %v386_v49, %v388_v6  ;;  %v313_v16 = vor.u32 %v311_v10, %v309_v3  ;;  %v2550_v22 = vcombine.low %v261_v19, %v262_v20  ;;  %v2279_v43 = vld [vmem:[%s2994_s1 + $0x120] sm:$0xff]  }
  0x1b   : > { %1243 = vmatprep.mubr.bf16.mxu0 %v302_v1  ;;  %v310_v9 = vsel %vm290_vm1, %v305_v2, %v309_v3  ;;  %v317_v18 = vrot.slane %v315_v13, 1  ;;  %v2284_v57 = vld [vmem:[%s2994_s1 + $0x1a0] sm:$0xff]   ;;  %v2287_v2 = vld [vmem:[%s2994_s1 + $0x1a8] sm:$0xff]  }
  0x1c   : > { %1969 = vmatpush3.bf16.msra.mxu0 %v2244_v23  ;;  %v2552_v23 = vcombine.low %v260_v63, %v261_v19  ;;  %v359_v46 = vrot.slane %v2550_v22, 1  ;;  %v327_v52 = vshrl.u32 %v2550_v22, 16  ;;  %v519_v63 = vrot.slane %v299_v48, 3  ;;  %v2636_v48 = vld [vmem:[%s2464_s18 + $0x2c] sm:$0xf] }
  0x1d   : > { %2015 = vmatpush3.bf16.msra.mxu1 %v2245_v24  ;;  %1970 = vmatprep.subr.bf16.mxu0 %v2246_v25  ;;  %v357_v24 = vrot.slane %v2515_v4, 1  ;;  %v2273_v25 = vld [vmem:[%s2994_s1 + $0x158] sm:$0xff]  }
  0x1e   : > { %2016 = vmatprep.subr.bf16.mxu1 %v2247_v26  ;;  %v319_v26 = vshrl.u32 %v2515_v4, 16 }
  0x1f   : > { %v358_v36 = vsel %vm351_vm0, %v355_v62, %v357_v24  ;;  %v2286_v62 = vld [vmem:[%s2994_s1 + $0x1e8] sm:$0xff]   ;;  %v360_v1 = vsel %vm351_vm0, %v357_v24, %v359_v46  ;;  %v411_v24 = vshll.u32 %v2477_v39, 16 }
  0x20   : > { %1971 = vmatpush3.bf16.msra.mxu0 %v2248_v27  ;;  %v318_v27 = vsel %vm290_vm1, %v313_v16, %v317_v18  ;;  %v321_v38 = vor.u32 %v319_v26, %v317_v18  ;;  %v2294_v16 = vld [vmem:[%s2994_s1 + $0x1b0] sm:$0xff]  }
  0x21   : > { %2017 = vmatpush3.bf16.msra.mxu1 %v2249_v28  ;;  %1972 = vmatprep.subr.bf16.mxu0 %v2250_v29  ;;  %v390_v28 = vrot.slane %v2552_v23, 1  ;;  %v2275_v29 = vld [vmem:[%s2994_s1 + $0x1d0] sm:$0xff]  }
  0x22   : > { %2018 = vmatprep.subr.bf16.mxu1 %v2251_v30  ;;  %v2276_v30 = vld [vmem:[%s2994_s1 + $0x190] sm:$0xff]  }
  0x24   : > { %1973 = vmatpush3.bf16.msra.mxu0 %v2252_v31  ;;  %v323_v31 = vshll.u32 %v2550_v22, 16 }
  0x25   : > { %2019 = vmatpush3.bf16.msra.mxu1 %v2253_v32  ;;  %2050 = vmatprep.subr.bf16.mxu0 %v2259_v47  ;;  %v391_v32 = vsel %vm351_vm0, %v388_v6, %v390_v28  ;;  %v2593_v47 = vld [vmem:[%s2464_s18 + $0x28] sm:$0xf]  ;;  %v2288_v6 = vld [vmem:[%s2994_s1 + $0x170] sm:$0xff]  }
  0x26   : > { %2096 = vmatprep.subr.bf16.mxu1 %v2265_v5  ;;  %v325_v41 = vrot.slane %v323_v31, 1  ;;  %v2596_v49 = vcombine.low %v262_v20, %v2593_v47  ;;  %v1872_v51 = vcombine.low %v2593_v47, %v2593_v47 }
  0x27   : > { %1244 = vmatmul.mubr.bf16.vlgmr.msra.gmra.mrb[0].mxu0 %v1867_v37  ;;  %v2277_v37 = vld [vmem:[%s2994_s1 + $0x160] sm:$0xff]  }
  0x28   : > { %1317 = vmatmul.mubr.bf16.vlgmr.msra.gmra.mrb[0].mxu1 %v354_v55  ;;  %2051 = vmatpush3.bf16.msra.mxu0 %v2260_v56  ;;  %v326_v53 = vsel %vm290_vm1, %v321_v38, %v325_v41  ;;  %v518_v55 = vrot.slane %v303_v59, 2  ;;  %v392_v56 = vrot.slane %v2596_v49, 1  ;;  %v331_v61 = vshll.u32 %v1872_v51, 16 }
  0x29   : > { %1251 = vmatprep.mubr.bf16.mxu0 %v310_v9  ;;  %2052 = vmatprep.subr.bf16.mxu0 %v2261_v58  ;;  %v2285_v58 = vld [vmem:[%s2994_s1 + $0x128] sm:$0xff]   ;;  %v329_v3 = vor.u32 %v327_v52, %v325_v41  ;;  %v2292_v9 = vld [vmem:[%s2994_s1 + $0x130] sm:$0xff]  }
  0x2a   : > { %1324 = vmatprep.mubr.bf16.mxu1 %v389_v11  ;;  %2097 = vmatpush3.bf16.msra.mxu1 %v2266_v7  ;;  %v393_v59 = vsel %vm351_vm0, %v390_v28, %v392_v56  ;;  %v333_v5 = vrot.slane %v331_v61, 1  ;;  %v521_v7 = vrot.slane %v311_v10, 2  ;;  %v522_v11 = vrot.slane %v307_v60, 3  ;;  %v2295_v60 = vld [vmem:[%s2994_s1 + $0x178] sm:$0xff]  }
  0x2b   : > { %2098 = vmatprep.subr.bf16.mxu1 %v2269_v15  ;;  %v520_v18 = vor.u32 %v519_v63, %v518_v55  ;;  %v474_v55 = vrot.slane %v2508_v0, 2 }
  0x2c   : > { %2053 = vmatpush3.bf16.msra.mxu0 %v2262_v8  ;;  %v2642_v8 = vcombine.low %v2636_v48, %v2636_v48  ;;  %v334_v10 = vsel %vm290_vm1, %v329_v3, %v333_v5  ;;  %v523_v19 = vor.u32 %v522_v11, %v521_v7  ;;  %v1576_v3 = vld [vmem:[%s2998_s5] sm:$0xff]  ;;  %v1578_v7 = vld [vmem:[%s2998_s5 + $0x10] sm:$0xff] }
  0x2d   : > { %2054 = vmatprep.subr.bf16.mxu0 %v2267_v12  ;;  %v361_v12 = vrot.slane %v1872_v51, 1  ;;  %v2301_v11 = vld [vmem:[%s2994_s1 + $0x210] sm:$0xff]   ;;  %1588 = vperm.xlu0 %2220, %v1576_v3  }
  0x2e   : > { %2099 = vmatpush3.bf16.msra.mxu1 %v2270_v17  ;;  %v394_v15 = vrot.slane %v2642_v8, 1  ;;  %v472_v17 = vrot.slane %v2482_v42, 2  ;;  %1598 = vperm.xlu1 %2221, %v1578_v7  }
  0x2f   : > { %1252 = vmatmul.mubr.bf16.gmra.mrb[4].mxu0 %v2479_v40  ;;  %2100 = vmatprep.subr.bf16.mxu1 %v2275_v29  ;;  %v362_v28 = vsel %vm351_vm0, %v359_v46, %v361_v12  ;;  %v2296_v29 = vld [vmem:[%s2994_s1 + $0x138] sm:$0xff]   ;;  %v525_v46 = vrot.slane %v319_v26, 2  ;;  %v428_v26 = vshll.u32 %v2508_v0, 16  ;;  %v476_v12 = vrot.slane %v2552_v23, 2 }
  0x30   : > { %1325 = vmatmul.mubr.bf16.gmra.mrb[4].mxu1 %v356_v14  ;;  %2055 = vmatpush3.bf16.msra.mxu0 %v2268_v21  ;;  %v2293_v14 = vld [vmem:[%s2994_s1 + $0x1f0] sm:$0xff]   ;;  %v395_v20 = vsel %vm351_vm0, %v392_v56, %v394_v15  ;;  %v408_v21 = vshrl.u32 %v2477_v39, 16  ;;  %v529_v56 = vrot.slane %v327_v52, 2  ;;  %v475_v52 = vsel %vm470_vm2, %v472_v17, %v474_v55 }
  0x31   : > { %1259 = vmatprep.mubr.bf16.mxu0 %v318_v27  ;;  %1332 = vmatprep.mubr.bf16.mxu1 %v391_v32  ;;  %v416_v27 = vshrl.u32 %v2482_v42, 16  ;;  %v524_v32 = vsel %vm517_vm3, %v520_v18, %v523_v19  ;;  %v430_v63 = vrot.slane %v428_v26, 2  ;;  %v1577_v18 = vld [vmem:[%s2998_s5 + $0x8] sm:$0xff] }
  0x32   : > { %2056 = vmatprep.subr.bf16.mxu0 %v2273_v25  ;;  %2101 = vmatpush3.bf16.msra.mxu1 %v2276_v30  ;;  %v2297_v25 = vld [vmem:[%s2994_s1 + $0x1f8] sm:$0xff]  }
  0x33   : > { %2102 = vmatprep.subr.bf16.mxu1 %v2278_v34  ;;  %v2298_v30 = vld [vmem:[%s2994_s1 + $0x1b8] sm:$0xff]   ;;  %v410_v34 = vrot.slane %v408_v21, 1  ;;  %v418_v38 = vrot.slane %v416_v27, 1  ;;  %1593 = vperm.xlu0 %2220, %v1577_v18  }
  0x34   : > { %2057 = vmatpush3.bf16.msra.mxu0 %v2274_v33  ;;  %v419_v33 = vshll.u32 %v2482_v42, 16  ;;  %v526_v42 = vrot.slane %v315_v13, 3  ;;  %v2299_v13 = vld [vmem:[%s2994_s1 + $0x200] sm:$0xff]  }
  0x35   : > { %2058 = vmatprep.subr.bf16.mxu0 %v2277_v37  ;;  %v473_v37 = vsel %vm470_vm2, %v471_v35, %v472_v17  ;;  %v563_v17 = vrot.slane %v2484_v45, 3 }
  0x36   : > { %2103 = vmatpush3.bf16.msra.mxu1 %v2280_v44  ;;  %v421_v41 = vrot.slane %v419_v33, 2  ;;  %v497_v44 = vrot.slane %v2484_v45, 2  ;;  %v527_v39 = vor.u32 %v526_v42, %v525_v46  ;;  %v1580_v33 = vld [vmem:[%s2998_s5 + $0x20] sm:$0xff] }
  0x37   : > { %1260 = vmatmul.mubr.bf16.gmra.mrb[8].mxu0 %v2484_v45  ;;  %2104 = vmatprep.subr.bf16.mxu1 %v2282_v50  ;;  %v2319_v50 = vmov 0.0   ;;  %v501_v45 = vrot.slane %v2550_v22, 2 }
  0x38   : > { %1333 = vmatmul.mubr.bf16.gmra.mrb[8].mxu1 %v358_v36  ;;  %2059 = vmatpush3.bf16.msra.mxu0 %v2279_v43  ;;  %v413_v36 = vrot.slane %v411_v24, 2  ;;  %v496_v43 = vrot.slane %v2479_v40, 2  ;;  %v422_v51 = vor.u32 %v421_v41, %v418_v38  ;;  %v528_v61 = vsel %vm517_vm3, %v523_v19, %v527_v39 }
  0x39   : > { %1267 = vmatprep.mubr.bf16.mxu0 %v326_v53  ;;  %1340 = vmatprep.mubr.bf16.mxu1 %v393_v59  ;;  %v425_v53 = vshrl.u32 %v2508_v0, 16  ;;  %v2300_v0 = vld [vmem:[%s2994_s1 + $0x208] sm:$0xff]   ;;  %v565_v24 = vrot.slane %v2515_v4, 3  ;;  %v478_v41 = vrot.slane %v2596_v49, 2 }
  0x3a   : > { %2060 = vmatprep.subr.bf16.mxu0 %v2283_v54  ;;  %2105 = vmatpush3.bf16.msra.mxu1 %v2284_v57  ;;  %v414_v35 = vor.u32 %v413_v36, %v410_v34  ;;  %v498_v54 = vsel %vm470_vm2, %v496_v43, %v497_v44  ;;  %v530_v57 = vrot.slane %v323_v31, 3  ;;  %v499_v31 = vrot.slane %v2515_v4, 2  ;;  %v2303_v43 = vld [vmem:[%s2994_s1 + $0x220] sm:$0xff]  }
  0x3b   : > { %2106 = vmatprep.subr.bf16.mxu1 %v2286_v62  ;;  %v427_v62 = vrot.slane %v425_v53, 1  ;;  %v443_v36 = vshrl.u32 %v2596_v49, 16  ;;  %1608 = vperm.xlu0 %2220, %v1580_v33   ;;  %v479_v53 = vsel %vm470_vm2, %v476_v12, %v478_v41 }
  0x3c   : > { %2061 = vmatpush3.bf16.msra.mxu0 %v2285_v58  ;;  %v2705_v58 = vcombine.low %v2593_v47, %v2636_v48  ;;  %v423_v59 = vsel %vm406_vm4, %v414_v35, %v422_v51  ;;  %v437_v48 = vshll.u32 %v2552_v23, 16  ;;  %v502_v38 = vsel %vm470_vm2, %v499_v31, %v501_v45 }
  0x3d   : > { %2062 = vmatprep.subr.bf16.mxu0 %v2288_v6  ;;  %v431_v5 = vor.u32 %v430_v63, %v427_v62  ;;  %v434_v6 = vshrl.u32 %v2552_v23, 16  ;;  %v480_v63 = vrot.slane %v2642_v8, 2 }
  0x3e   : > { %2107 = vmatpush3.bf16.msra.mxu1 %v2287_v2  ;;  %v534_v47 = vshrl.u32 %v2705_v58, 16  ;;  %v537_v2 = vshll.u32 %v2705_v58, 16  ;;  %v503_v26 = vrot.slane %v2705_v58, 2 }
  0x3f   : > { %1268 = vmatmul.mubr.bf16.gmra.mrb[12].mxu0 %v2515_v4  ;;  %2108 = vmatprep.subr.bf16.mxu1 %v2293_v14  ;;  %v432_v23 = vsel %vm406_vm4, %v422_v51, %v431_v5  ;;  %v436_v19 = vrot.slane %v434_v6, 1  ;;  %v1585_v6 = vld [vmem:[%s2998_s5 + $0x48] sm:$0xff] }
  0x40   : > { %1341 = vmatmul.mubr.bf16.gmra.mrb[12].mxu1 %v360_v1  ;;  %1275 = vmatprep.mubr.bf16.mxu0 %v334_v10  ;;  %v531_v1 = vor.u32 %v530_v57, %v529_v56  ;;  %v536_v10 = vrot.slane %v534_v47, 2  ;;  %v539_v15 = vrot.slane %v537_v2, 3  ;;  %v1583_v56 = vld [vmem:[%s2998_s5 + $0x38] sm:$0xff]  ;;  %v504_v62 = vsel %vm470_vm2, %v501_v45, %v503_v26 }
  0x41   : > { %1348 = vmatprep.mubr.bf16.mxu1 %v395_v20  ;;  %2063 = vmatpush3.bf16.msra.mxu0 %v2292_v9  ;;  %v500_v9 = vsel %vm470_vm2, %v497_v44, %v499_v31  ;;  %v439_v20 = vrot.slane %v437_v48, 2  ;;  %v1584_v31 = vld [vmem:[%s2998_s5 + $0x40] sm:$0xff]  ;;  %v481_v2 = vsel %vm470_vm2, %v478_v41, %v480_v63 }
  0x42   : > { %2109 = vmatpush3.bf16.msra.mxu1 %v2294_v16  ;;  %2064 = vmatprep.subr.bf16.mxu0 %v2295_v60  ;;  %v532_v14 = vsel %vm517_vm3, %v527_v39, %v531_v1  ;;  %v2734_v16 = vld [vmem:[%s2464_s18 + $0x30] ss:$0 sps:$4 sm:$0xff]   ;;  %v562_v60 = vrot.slane %v2479_v40, 3  ;;  %v477_v40 = vsel %vm470_vm2, %v474_v55, %v476_v12  ;;  %v540_v27 = vor.u32 %v539_v15, %v536_v10  ;;  %v1581_v39 = vld [vmem:[%s2998_s5 + $0x28] sm:$0xff] }
  0x43   : > { %2110 = vmatprep.subr.bf16.mxu1 %v2297_v25  ;;  %v2302_v25 = vld [vmem:[%s2994_s1 + $0x218] sm:$0xff]   ;;  %v440_v34 = vor.u32 %v439_v20, %v436_v19  ;;  %v1582_v55 = vld [vmem:[%s2998_s5 + $0x30] sm:$0xff]  ;;  %v505_v3 = vrot.slane %v2734_v16, 2  ;;  %v569_v12 = vrot.slane %v2705_v58, 3  ;;  %v571_v10 = vrot.slane %v2734_v16, 3 }
  0x44   : > { %v2743_v21 = vsel %vm561_vm5, %v562_v60, %v563_v17  ;;  %v541_v44 = vsel %vm517_vm3, %v531_v1, %v540_v27  ;;  %1618 = vperm.xlu0 %2220, %v1582_v55   ;;  %v2838_v19 = vld [vmem:[%s2995_s2] ss:$0 sm:$0xff] }
  0x45   : > { %2065 = vmatpush3.bf16.msra.mxu0 %v2296_v29  ;;  %v546_v29 = vshll.u32 %v2734_v16, 16  ;;  %v441_v35 = vsel %vm406_vm4, %v431_v5, %v440_v34  ;;  %v2307_v5 = vld [vmem:[%s2994_s1 + $0x238] sm:$0xff]   ;;  %v506_v7 = vsel %vm470_vm2, %v503_v26, %v505_v3  ;;  %v572_v15 = vsel %vm561_vm5, %v569_v12, %v571_v10 }
  0x46   : > { %2111 = vmatpush3.bf16.msra.mxu1 %v2298_v30  ;;  %2155 = vmatprep.subr.bf16.mxu0 %v2319_v50  ;;  %v1579_v30 = vld [vmem:[%s2998_s5 + $0x18] sm:$0xff] }
  0x47   : > { %1276 = vmatmul.mubr.bf16.gmra.mrb[16].mxu0 %v2550_v22  ;;  %2191 = vmatprep.subr.bf16.mxu1 %v2319_v50  ;;  %v548_v42 = vrot.slane %v546_v29, 3 }
  0x48   : > { %1349 = vmatmul.mubr.bf16.gmra.mrb[16].mxu1 %v362_v28  ;;  %1389 = vmatprep.mubr.bf16.mxu0 %v473_v37  ;;  %v543_v28 = vshrl.u32 %v2734_v16, 16  ;;  %v446_v37 = vshll.u32 %v2596_v49, 16  ;;  %v445_v49 = vrot.slane %v443_v36, 1 }
  0x49   : > { %1462 = vmatprep.mubr.bf16.mxu1 %v524_v32  ;;  %v2761_v32 = vsel %vm561_vm5, %v563_v17, %v565_v24  ;;  %1603 = vperm.xlu1 %2221, %v1579_v30  }
  0x4a   : > { %v545_v46 = vrot.slane %v543_v28, 2  ;;  %v448_v51 = vrot.slane %v446_v37, 2  ;;  %1628 = vperm.xlu0 %2220, %v1584_v31  }
  0x4c   : > { %v449_v57 = vor.u32 %v448_v51, %v445_v49 }
  0x4d   : > { %1613 = vperm.xlu1 %2221, %v1581_v39  }
  0x4e   : > { %v450_v1 = vsel %vm406_vm4, %v440_v34, %v449_v57 }
  0x4f   : > { %1390 = vmatmul.mubr.bf16.vlgmr.msra.gmra.mrb[20].mxu0 %v423_v59  ;;  %v455_v59 = vshll.u32 %v2642_v8, 16 }
  0x50   : > { %1463 = vmatmul.mubr.bf16.vlgmr.msra.gmra.mrb[20].mxu1 %v498_v54  ;;  %2156 = vmatpush3.bf16.msra.mxu0 %v2299_v13  ;;  %v2304_v54 = vld [vmem:[%s2994_s1 + $0x228] sm:$0xff]  }
  0x51   : > { %1470 = vmatprep.mubr.bf16.mxu1 %v528_v61  ;;  %2199 = vmatpush3.bf16.msra.mxu1 %v2299_v13  ;;  %v549_v13 = vor.u32 %v548_v42, %v545_v46  ;;  %v452_v61 = vshrl.u32 %v2642_v8, 16  ;;  %v457_v47 = vrot.slane %v455_v59, 2 }
  0x52   : > { %2192 = vmatprep.subr.bf16.mxu1 %v2319_v50  ;;  %1397 = vmatprep.mubr.bf16.mxu0 %v475_v52  ;;  %v2306_v52 = vld [vmem:[%s2994_s1 + $0x230] sm:$0xff]  }
  0x53   : > { %2157 = vmatprep.subr.bf16.mxu0 %v2319_v50  ;;  %1623 = vperm.xlu1 %2221, %v1583_v56   ;;  %v454_v8 = vrot.slane %v452_v61, 1 }
  0x54   : > { %2158 = vmatpush3.bf16.msra.mxu0 %v2300_v0 }
  0x55   : > { %2200 = vmatpush3.bf16.msra.mxu1 %v2300_v0  ;;  %2159 = vmatprep.subr.bf16.mxu0 %v2319_v50  ;;  %v550_v0 = vsel %vm517_vm3, %v540_v27, %v549_v13  ;;  %v458_v48 = vor.u32 %v457_v47, %v454_v8 }
  0x56   : > { %2193 = vmatprep.subr.bf16.mxu1 %v2319_v50 }
  0x57   : > { %1398 = vmatmul.mubr.bf16.gmra.mrb[24].mxu0 %v432_v23  ;;  %1633 = vperm.xlu1 %2221, %v1585_v6  }
  0x58   : > { %1471 = vmatmul.mubr.bf16.gmra.mrb[24].mxu1 %v500_v9  ;;  %2160 = vmatpush3.bf16.msra.mxu0 %v2301_v11  ;;  %v459_v9 = vsel %vm406_vm4, %v449_v57, %v458_v48 }
  0x59   : > { %1478 = vmatprep.mubr.bf16.mxu1 %v532_v14  ;;  %2201 = vmatpush3.bf16.msra.mxu1 %v2301_v11  ;;  %v567_v11 = vrot.slane %v2550_v22, 3 }
  0x5a   : > { %2194 = vmatprep.subr.bf16.mxu1 %v2319_v50  ;;  %1405 = vmatprep.mubr.bf16.mxu0 %v477_v40 }
  0x5b   : > { %2161 = vmatprep.subr.bf16.mxu0 %v2319_v50  ;;  %v570_v14 = vsel %vm561_vm5, %v567_v11, %v569_v12  ;;  %v568_v22 = vsel %vm561_vm5, %v565_v24, %v567_v11 }
  0x5c   : > { %2162 = vmatpush3.bf16.msra.mxu0 %v2302_v25 }
  0x5d   : > { %2202 = vmatpush3.bf16.msra.mxu1 %v2302_v25  ;;  %2163 = vmatprep.subr.bf16.mxu0 %v2319_v50 }
  0x5e   : > { %2195 = vmatprep.subr.bf16.mxu1 %v2319_v50 }
  0x5f   : > { %1406 = vmatmul.mubr.bf16.gmra.mrb[28].mxu0 %v441_v35 }
  0x60   : > { %1479 = vmatmul.mubr.bf16.gmra.mrb[28].mxu1 %v502_v38  ;;  %2164 = vmatpush3.bf16.msra.mxu0 %v2303_v43 }
  0x61   : > { %1486 = vmatprep.mubr.bf16.mxu1 %v541_v44  ;;  %2203 = vmatpush3.bf16.msra.mxu1 %v2303_v43 }
  0x62   : > { %2196 = vmatprep.subr.bf16.mxu1 %v2319_v50  ;;  %1413 = vmatprep.mubr.bf16.mxu0 %v479_v53 }
  0x63   : > { %2165 = vmatprep.subr.bf16.mxu0 %v2319_v50 }
  0x64   : > { %2166 = vmatpush3.bf16.msra.mxu0 %v2304_v54 }
  0x65   : > { %2204 = vmatpush3.bf16.msra.mxu1 %v2304_v54  ;;  %2167 = vmatprep.subr.bf16.mxu0 %v2319_v50 }
  0x66   : > { %2197 = vmatprep.subr.bf16.mxu1 %v2319_v50 }
  0x67   : > { %1414 = vmatmul.mubr.bf16.gmra.mrb[32].mxu0 %v450_v1 }
  0x68   : > { %1487 = vmatmul.mubr.bf16.gmra.mrb[32].mxu1 %v504_v62  ;;  %1421 = vmatprep.mubr.bf16.mxu0 %v481_v2 }
  0x69   : > { %1494 = vmatprep.mubr.bf16.mxu1 %v550_v0  ;;  %2205 = vmatpush3.bf16.msra.mxu1 %v2306_v52 }
  0x6a   : > { %2198 = vmatprep.subr.bf16.mxu1 %v2319_v50  ;;  %2168 = vmatpush3.bf16.msra.mxu0 %v2306_v52 }
  0x6b   : > { %2169 = vmatprep.subr.bf16.mxu0 %v2319_v50 }
  0x6d   : > { %2206 = vmatpush3.bf16.msra.mxu1 %v2307_v5 }
  0x6e   : > { %2170 = vmatpush3.bf16.msra.mxu0 %v2307_v5 }
  0x6f   : > { %1422 = vmatmul.mubr.bf16.gmra.mrb[36].mxu0 %v459_v9 }
  0x70   : > { %1495 = vmatmul.mubr.bf16.gmra.mrb[36].mxu1 %v506_v7  ;;  %2171 = vmatprep.mubr.msk.bf16.mxu0 %vm2320_vm6, %v2319_v50 }
  0x71   : > { %2183 = vmatprep.mubr.msk.bf16.mxu1 %vm2320_vm6, %v2319_v50 }
  0x77   : > { %2172 = vmatmul.mubr.bf16.vlgmr.msra.gmra.mrb[40].mxu0 %v2743_v21 }
  0x78   : > { %2184 = vmatmul.mubr.bf16.vlgmr.msra.gmra.mrb[40].mxu1 %v570_v14  ;;  %2175 = vmatprep.mubr.msk.bf16.mxu0 %vm2320_vm6, %v2319_v50 }
  0x79   : > { %2187 = vmatprep.mubr.msk.bf16.mxu1 %vm2320_vm6, %v2319_v50 }
  0x7f   : > { %2176 = vmatmul.mubr.bf16.gmra.mrb[44].mxu0 %v2761_v32 }
  0x80   : > { %2188 = vmatmul.mubr.bf16.gmra.mrb[44].mxu1 %v572_v15  ;;  %2179 = vmatprep.mubr.msk.bf16.mxu0 %vm2320_vm6, %v2319_v50 }
  0x87   : > { %2180 = vmatmul.mubr.bf16.gmra.mrb[48].mxu0 %v568_v22 }
  0xfa   : > { %v1974_v18 = vpop.f32.mrb[0].mxu0 }
  0xfb   : > { %v2020_v58 = vpop.f32.mrb[0].mxu1  ;;  %v1975_v20 = vpop.f32.mrb[1].mxu0 }
  0xfc   : > { %v2021_v60 = vpop.f32.mrb[1].mxu1  ;;  %v1976_v40 = vadd.f32 %v1975_v20, %v1974_v18  ;;  %v1977_v50 = vpop.f32.mrb[2].mxu0 }
  0xfd   : > { %v2022_v17 = vadd.f32 %v2021_v60, %v2020_v58  ;;  %v2023_v16 = vpop.f32.mrb[2].mxu1  ;;  %v1978_v45 = vpop.f32.mrb[3].mxu0 }
  0xfe   : > { %v2024_v23 = vpop.f32.mrb[3].mxu1  ;;  %v1246_v4 = vadd.f32 %v1976_v40, %v2838_v19  ;;  %v1979_v24 = vadd.f32 %v1978_v45, %v1977_v50 }
  0xff   : > { %v2025_v21 = vadd.f32 %v2024_v23, %v2023_v16 }
 0x100   : > { %v1249_v27 = vadd.f32 %v1979_v24, %v2838_v19  ;;  %v2842_v28 = vadd.f32 %v2022_v17, %v1246_v4 }
 0x102   : > { %v2844_v33 = vadd.f32 %v2025_v21, %v1249_v27  ;;  %v1980_v34 = vpop.f32.mrb[4].mxu0 }
 0x103   : > { %v2026_v25 = vpop.f32.mrb[4].mxu1  ;;  %v1981_v37 = vpop.f32.mrb[5].mxu0 }
 0x104   : > { %v2027_v29 = vpop.f32.mrb[5].mxu1  ;;  %v1982_v41 = vadd.f32 %v1981_v37, %v1980_v34  ;;  %v1983_v43 = vpop.f32.mrb[6].mxu0 }
 0x105   : > { %v2028_v30 = vadd.f32 %v2027_v29, %v2026_v25  ;;  %v2029_v32 = vpop.f32.mrb[6].mxu1  ;;  %v1984_v44 = vpop.f32.mrb[7].mxu0 }
 0x106   : > { %v2030_v36 = vpop.f32.mrb[7].mxu1  ;;  %v1254_v46 = vadd.f32 %v1982_v41, %v2838_v19  ;;  %v1985_v42 = vadd.f32 %v1984_v44, %v1983_v43 }
 0x107   : > { %v2031_v38 = vadd.f32 %v2030_v36, %v2029_v32 }
 0x108   : > { %v1257_v35 = vadd.f32 %v1985_v42, %v2838_v19  ;;  %v2848_v49 = vadd.f32 %v2028_v30, %v1254_v46 }
 0x10a   : > { %v2850_v54 = vadd.f32 %v2031_v38, %v1257_v35  ;;  %v1986_v13 = vpop.f32.mrb[8].mxu0 }
 0x10b   : > { %v2032_v39 = vpop.f32.mrb[8].mxu1  ;;  %v1987_v56 = vpop.f32.mrb[9].mxu0 }
 0x10c   : > { %v2033_v51 = vpop.f32.mrb[9].mxu1  ;;  %v1988_v61 = vadd.f32 %v1987_v56, %v1986_v13  ;;  %v1989_v59 = vpop.f32.mrb[10].mxu0 }
 0x10d   : > { %v2034_v53 = vadd.f32 %v2033_v51, %v2032_v39  ;;  %v2035_v26 = vpop.f32.mrb[10].mxu1  ;;  %v1990_v62 = vpop.f32.mrb[11].mxu0 }
 0x10e   : > { %v2036_v55 = vpop.f32.mrb[11].mxu1  ;;  %v1262_v63 = vadd.f32 %v1988_v61, %v2838_v19  ;;  %v1991_v0 = vadd.f32 %v1990_v62, %v1989_v59 }
 0x10f   : > { %v2037_v57 = vadd.f32 %v2036_v55, %v2035_v26 }
 0x110   : > { %v1265_v31 = vadd.f32 %v1991_v0, %v2838_v19  ;;  %v2854_v1 = vadd.f32 %v2034_v53, %v1262_v63 }
 0x112   : > { %v2856_v3 = vadd.f32 %v2037_v57, %v1265_v31  ;;  %v1992_v5 = vpop.f32.mrb[12].mxu0 }
 0x113   : > { %v2038_v52 = vpop.f32.mrb[12].mxu1  ;;  %v1993_v48 = vpop.f32.mrb[13].mxu0 }
 0x114   : > { %v2039_v8 = vpop.f32.mrb[13].mxu1  ;;  %v1994_v9 = vadd.f32 %v1993_v48, %v1992_v5  ;;  %v1995_v11 = vpop.f32.mrb[14].mxu0 }
 0x115   : > { %v2040_v47 = vadd.f32 %v2039_v8, %v2038_v52  ;;  %v2041_v2 = vpop.f32.mrb[14].mxu1  ;;  %v1996_v12 = vpop.f32.mrb[15].mxu0 }
 0x116   : > { %v2042_v6 = vpop.f32.mrb[15].mxu1  ;;  %v1270_v14 = vadd.f32 %v1994_v9, %v2838_v19  ;;  %v1997_v10 = vadd.f32 %v1996_v12, %v1995_v11 }
 0x117   : > { %v2043_v7 = vadd.f32 %v2042_v6, %v2041_v2 }
 0x118   : > { %v1273_v22 = vadd.f32 %v1997_v10, %v2838_v19  ;;  %v2860_v58 = vadd.f32 %v2040_v47, %v1270_v14 }
 0x11a   : > { %v2862_v18 = vadd.f32 %v2043_v7, %v1273_v22  ;;  %v1998_v23 = vpop.f32.mrb[16].mxu0 }
 0x11b   : > { %v2044_v15 = vpop.f32.mrb[16].mxu1  ;;  %v1999_v21 = vpop.f32.mrb[17].mxu0 }
 0x11c   : > { %v2045_v60 = vpop.f32.mrb[17].mxu1  ;;  %v2000_v50 = vadd.f32 %v1999_v21, %v1998_v23  ;;  %v2001_v45 = vpop.f32.mrb[18].mxu0 }
 0x11d   : > { %v2046_v17 = vadd.f32 %v2045_v60, %v2044_v15  ;;  %v2047_v16 = vpop.f32.mrb[18].mxu1  ;;  %v2002_v4 = vpop.f32.mrb[19].mxu0 }
 0x11e   : > { %v2048_v20 = vpop.f32.mrb[19].mxu1  ;;  %v1278_v24 = vadd.f32 %v2000_v50, %v2838_v19  ;;  %v2003_v25 = vadd.f32 %v2002_v4, %v2001_v45 }
 0x11f   : > { %v2049_v40 = vadd.f32 %v2048_v20, %v2047_v16 }
 0x120   : > { %v1281_v29 = vadd.f32 %v2003_v25, %v2838_v19  ;;  %v2866_v30 = vadd.f32 %v2046_v17, %v1278_v24 }
 0x122   : > { %v2868_v37 = vadd.f32 %v2049_v40, %v1281_v29  ;;  %v2066_v38 = vpop.f32.mrb[20].mxu0 }
 0x123   : > { %v2112_v27 = vpop.f32.mrb[20].mxu1  ;;  %v2067_v43 = vpop.f32.mrb[21].mxu0 }
 0x124   : > { %v2113_v32 = vpop.f32.mrb[21].mxu1  ;;  %v2068_v46 = vadd.f32 %v2067_v43, %v2066_v38  ;;  %v2069_v42 = vpop.f32.mrb[22].mxu0 }
 0x125   : > { %v2114_v34 = vadd.f32 %v2113_v32, %v2112_v27  ;;  %v2115_v36 = vpop.f32.mrb[22].mxu1  ;;  %v2070_v39 = vpop.f32.mrb[23].mxu0 }
 0x126   : > { %v2116_v41 = vpop.f32.mrb[23].mxu1  ;;  %v1392_v35 = vadd.f32 %v2068_v46, %v2842_v28  ;;  %v2071_v51 = vadd.f32 %v2070_v39, %v2069_v42 }
 0x127   : > { %v2117_v44 = vadd.f32 %v2116_v41, %v2115_v36 }
 0x128   : > { %v1395_v19 = vadd.f32 %v2071_v51, %v2844_v33  ;;  %v2872_v13 = vadd.f32 %v2114_v34, %v1392_v35 }
 0x12a   : > { %v2072_v57 = vpop.f32.mrb[24].mxu0  ;;  %v2874_v59 = vadd.f32 %v2117_v44, %v1395_v19 }
 0x12b   : > { %v2118_v53 = vpop.f32.mrb[24].mxu1  ;;  %v2073_v62 = vpop.f32.mrb[25].mxu0 }
 0x12c   : > { %v2119_v26 = vpop.f32.mrb[25].mxu1  ;;  %v2074_v0 = vadd.f32 %v2073_v62, %v2072_v57  ;;  %v2075_v52 = vpop.f32.mrb[26].mxu0 }
 0x12d   : > { %v2120_v55 = vadd.f32 %v2119_v26, %v2118_v53  ;;  %v2121_v56 = vpop.f32.mrb[26].mxu1  ;;  %v2076_v31 = vpop.f32.mrb[27].mxu0 }
 0x12e   : > { %v2122_v61 = vpop.f32.mrb[27].mxu1  ;;  %v1400_v28 = vadd.f32 %v2074_v0, %v2848_v49  ;;  %v2077_v8 = vadd.f32 %v2076_v31, %v2075_v52 }
 0x12f   : > { %v2123_v63 = vadd.f32 %v2122_v61, %v2121_v56  ;;  %v2891_v56 = vpop.permute.xlu0 %1588 }
 0x130   : > { %v1403_v33 = vadd.f32 %v2077_v8, %v2850_v54  ;;  %v2878_v5 = vadd.f32 %v2120_v55, %v1400_v28  ;;  %v2898_v8 = vpop.permute.xlu1 %1598 }
 0x132   : > { %v2078_v7 = vpop.f32.mrb[28].mxu0  ;;  %v2880_v11 = vadd.f32 %v2123_v63, %v1403_v33 }
 0x133   : > { %v2124_v47 = vpop.f32.mrb[28].mxu1  ;;  %v2079_v12 = vpop.f32.mrb[29].mxu0 }
 0x134   : > { %v2125_v2 = vpop.f32.mrb[29].mxu1  ;;  %v2080_v10 = vadd.f32 %v2079_v12, %v2078_v7  ;;  %v2081_v15 = vpop.f32.mrb[30].mxu0 }
 0x135   : > { %v2126_v6 = vadd.f32 %v2125_v2, %v2124_v47  ;;  %v2127_v48 = vpop.f32.mrb[30].mxu1  ;;  %v2082_v22 = vpop.f32.mrb[31].mxu0 }
 0x136   : > { %v2128_v9 = vpop.f32.mrb[31].mxu1  ;;  %v1408_v49 = vadd.f32 %v2080_v10, %v2854_v1  ;;  %v2083_v60 = vadd.f32 %v2082_v22, %v2081_v15 }
 0x137   : > { %v2129_v14 = vadd.f32 %v2128_v9, %v2127_v48  ;;  %v2908_v48 = vpop.permute.xlu0 %1593 }
 0x138   : > { %v1411_v54 = vadd.f32 %v2083_v60, %v2856_v3  ;;  %v2884_v23 = vadd.f32 %v2126_v6, %v1408_v49 }
 0x13a   : > { %v2084_v40 = vpop.f32.mrb[32].mxu0  ;;  %v2886_v45 = vadd.f32 %v2129_v14, %v1411_v54  ;;  %v2914_v14 = vpop.permute.xlu1 %1603 }
 0x13b   : > { %v2130_v17 = vpop.f32.mrb[32].mxu1  ;;  %v2085_v4 = vpop.f32.mrb[33].mxu0 }
 0x13c   : > { %v2131_v16 = vpop.f32.mrb[33].mxu1  ;;  %v2086_v25 = vadd.f32 %v2085_v4, %v2084_v40  ;;  %v2087_v27 = vpop.f32.mrb[34].mxu0 }
 0x13d   : > { %v2132_v20 = vadd.f32 %v2131_v16, %v2130_v17  ;;  %v2133_v21 = vpop.f32.mrb[34].mxu1  ;;  %v2088_v29 = vpop.f32.mrb[35].mxu0 }
 0x13e   : > { %v2134_v50 = vpop.f32.mrb[35].mxu1  ;;  %v1416_v1 = vadd.f32 %v2086_v25, %v2860_v58  ;;  %v2089_v32 = vadd.f32 %v2088_v29, %v2087_v27  ;;  %v2921_v4 = vpop.permute.xlu0 %1608 }
 0x13f   : > { %v2135_v24 = vadd.f32 %v2134_v50, %v2133_v21  ;;  %v2925_v27 = vpop.permute.xlu1 %1613 }
 0x140   : > { %v1419_v3 = vadd.f32 %v2089_v32, %v2862_v18  ;;  %v1489_v38 = vadd.f32 %v2132_v20, %v1416_v1 }
 0x142   : > { %v2090_v44 = vpop.f32.mrb[36].mxu0  ;;  %v1492_v42 = vadd.f32 %v2135_v24, %v1419_v3 }
 0x143   : > { %v2136_v34 = vpop.f32.mrb[36].mxu1  ;;  %v2091_v39 = vpop.f32.mrb[37].mxu0 }
 0x144   : > { %v2137_v36 = vpop.f32.mrb[37].mxu1  ;;  %v2092_v51 = vadd.f32 %v2091_v39, %v2090_v44  ;;  %v2093_v53 = vpop.f32.mrb[38].mxu0 }
 0x145   : > { %v2138_v41 = vadd.f32 %v2137_v36, %v2136_v34  ;;  %v2139_v43 = vpop.f32.mrb[38].mxu1  ;;  %v2094_v19 = vpop.f32.mrb[39].mxu0 }
 0x146   : > { %v2140_v46 = vpop.f32.mrb[39].mxu1  ;;  %v1424_v26 = vadd.f32 %v2092_v51, %v2866_v30  ;;  %v2095_v55 = vadd.f32 %v2094_v19, %v2093_v53  ;;  %v2929_v36 = vpop.permute.xlu0 %1618 }
 0x147   : > { %v2141_v35 = vadd.f32 %v2140_v46, %v2139_v43  ;;  %v2933_v44 = vpop.permute.xlu1 %1623 }
 0x148   : > { %v1427_v18 = vadd.f32 %v2095_v55, %v2868_v37  ;;  %v1497_v62 = vadd.f32 %v2138_v41, %v1424_v26 }
 0x14a   : > { %v1537_v0 = vpop.f32.mrb[40].mxu0  ;;  %v1500_v28 = vadd.f32 %v2141_v35, %v1427_v18  ;;  %v1629_v53 = vpop.permute.xlu0 %1628 }
 0x14b   : > { %v1561_v58 = vpop.f32.mrb[40].mxu1  ;;  %v2901_v30 = vadd.f32 %v1537_v0, %v2872_v13  ;;  %v2173_v47 = vpop.f32.mrb[41].mxu0 }
 0x14c   : > { %v2894_v57 = vadd.f32 %v1561_v58, %v1489_v38  ;;  %v2185_v61 = vpop.f32.mrb[41].mxu1  ;;  %v1540_v33 = vpop.f32.mrb[42].mxu0 }
 0x14d   : > { %v1564_v63 = vpop.f32.mrb[42].mxu1  ;;  %v1636_v37 = vmul.f32 %v2891_v56, %v2901_v30  ;;  %v2906_v2 = vadd.f32 %v1540_v33, %v2874_v59  ;;  %v2174_v6 = vpop.f32.mrb[43].mxu0 }
 0x14e   : > { %v2896_v52 = vadd.f32 %v1564_v63, %v1492_v42  ;;  %v2186_v31 = vpop.f32.mrb[43].mxu1  ;;  %v1642_v46 = vmul.f32 %v2929_v36, %v2894_v57  ;;  %v1634_v19 = vpop.permute.xlu1 %1633 }
 0x14f   : > { %v1637_v7 = vmul.f32 %v2908_v48, %v2906_v2  ;;  %v1647_v10 = vsel %vm1646_vm7, %v1636_v37, 0.0 }
 0x151   : > { %v1648_v15 = vsel %vm1646_vm7, %v1637_v7, 0.0 }
 0x152   : > { %v1649_v59 = vadd.f32 %v1648_v15, %v1647_v10  ;;  %v1545_v49 = vpop.f32.mrb[44].mxu0 }
 0x153   : > { %v1569_v9 = vpop.f32.mrb[44].mxu1  ;;  %v1546_v54 = vadd.f32 %v1545_v49, %v2878_v5  ;;  %v2177_v16 = vpop.f32.mrb[45].mxu0 }
 0x154   : > { %v2912_v12 = vadd.f32 %v1569_v9, %v1497_v62  ;;  %v2189_v13 = vpop.f32.mrb[45].mxu1  ;;  %v1548_v20 = vpop.f32.mrb[46].mxu0 }
 0x155   : > { %v1572_v22 = vpop.f32.mrb[46].mxu1  ;;  %v1638_v21 = vmul.f32 %v2898_v8, %v1546_v54  ;;  %v1549_v40 = vadd.f32 %v1548_v20, %v2880_v11  ;;  %v2178_v50 = vpop.f32.mrb[47].mxu0 }
 0x156   : > { %v1573_v60 = vadd.f32 %v1572_v22, %v1500_v28  ;;  %v2190_v17 = vpop.f32.mrb[47].mxu1  ;;  %v1644_v55 = vmul.f32 %v1629_v53, %v2912_v12 }
 0x157   : > { %v1650_v24 = vsel %vm1646_vm7, %v1638_v21, 0.0  ;;  %v1639_v25 = vmul.f32 %v2914_v14, %v1549_v40 }
 0x158   : > { %v1651_v29 = vadd.f32 %v1650_v24, %v1649_v59  ;;  %v1645_v61 = vmul.f32 %v1634_v19, %v1573_v60  ;;  %v1662_v63 = vsel %vm1646_vm7, %v1644_v55, 0.0 }
 0x159   : > { %v1652_v1 = vsel %vm1646_vm7, %v1639_v25, 0.0 }
 0x15a   : > { %v1653_v32 = vadd.f32 %v1652_v1, %v1651_v29  ;;  %v1553_v5 = vpop.f32.mrb[48].mxu0  ;;  %v1664_v31 = vsel %vm1646_vm7, %v1645_v61, 0.0 }
 0x15b   : > { %v1554_v34 = vadd.f32 %v1553_v5, %v2884_v23  ;;  %v2181_v3 = vpop.f32.mrb[49].mxu0  ;;  %v1643_v23 = vmul.f32 %v2933_v44, %v2896_v52 }
 0x15c   : > { %v1556_v11 = vpop.f32.mrb[50].mxu0 }
 0x15d   : > { %v1640_v38 = vmul.f32 %v2921_v4, %v1554_v34  ;;  %v1557_v41 = vadd.f32 %v1556_v11, %v2886_v45  ;;  %v2182_v43 = vpop.f32.mrb[51].mxu0  ;;  %v1658_v45 = vsel %vm1646_vm7, %v1642_v46, 0.0  ;;  %v1660_v18 = vsel %vm1646_vm7, %v1643_v23, 0.0 }
 0x15f   : > { %v1654_v42 = vsel %vm1646_vm7, %v1640_v38, 0.0  ;;  %v1641_v39 = vmul.f32 %v2925_v27, %v1557_v41 }
 0x160   : > { %v1655_v35 = vadd.f32 %v1654_v42, %v1653_v32 }
 0x161   : > { %v1656_v51 = vsel %vm1646_vm7, %v1641_v39, 0.0 }
 0x162   : > { %v1657_v26 = vadd.f32 %v1656_v51, %v1655_v35 }
 0x164   : > { %v1659_v58 = vadd.f32 %v1658_v45, %v1657_v26 }
 0x166   : > { %v1661_v62 = vadd.f32 %v1660_v18, %v1659_v58 }
 0x168   : > { %v1663_v0 = vadd.f32 %v1662_v63, %v1661_v62 }
 0x16a   : > { %v1665_v28 = vadd.f32 %v1664_v31, %v1663_v0 }
 0x16c   : > { %v1666_v47 = vrot.slane %v1665_v28, 4 }
 0x16e   : > { %v1667_v33 = vadd.f32 %v1666_v47, %v1665_v28 }
 0x170   : > { %v1668_v37 = vrot.slane %v1667_v33, 2 }
 0x172   : > { %v1669_v6 = vadd.f32 %v1668_v37, %v1667_v33 }
 0x174   : > { %v1670_v7 = vrot.slane %v1669_v6, 1 }
 0x176   : > { %v1671_v9 = vadd.f32 %v1670_v7, %v1669_v6 }
 0x178   : > { %v1672_v13 = vmul.f32 0.015625, %v1671_v9 }
 0x17a   : > { %v1673_v10 = vsub.f32 %v2901_v30, %v1672_v13  ;;  %v1674_v15 = vsub.f32 %v2906_v2, %v1672_v13  ;;  %v1675_v22 = vsub.f32 %v1546_v54, %v1672_v13  ;;  %v1676_v59 = vsub.f32 %v1549_v40, %v1672_v13 }
 0x17b   : > { %v1677_v49 = vsub.f32 %v1554_v34, %v1672_v13  ;;  %v1678_v17 = vsub.f32 %v1557_v41, %v1672_v13  ;;  %v1679_v16 = vsub.f32 %v2894_v57, %v1672_v13  ;;  %v1680_v20 = vsub.f32 %v2896_v52, %v1672_v13 }
 0x17c   : > { %v1681_v21 = vsub.f32 %v2912_v12, %v1672_v13  ;;  %v1682_v50 = vsub.f32 %v1573_v60, %v1672_v13  ;;  %v1683_v24 = vmul.f32 %v1673_v10, %v1673_v10  ;;  %v1684_v25 = vmul.f32 %v1674_v15, %v1674_v15 }
 0x17d   : > { %v1685_v29 = vmul.f32 %v1675_v22, %v1675_v22  ;;  %v1686_v1 = vmul.f32 %v1676_v59, %v1676_v59  ;;  %v1687_v32 = vmul.f32 %v1677_v49, %v1677_v49  ;;  %v1688_v40 = vmul.f32 %v1678_v17, %v1678_v17 }
 0x17e   : > { %v1693_v30 = vmul.f32 %v1683_v24, %v2891_v56  ;;  %v1694_v2 = vmul.f32 %v1684_v25, %v2908_v48  ;;  %v1689_v60 = vmul.f32 %v1679_v16, %v1679_v16  ;;  %v1690_v38 = vmul.f32 %v1680_v20, %v1680_v20 }
 0x17f   : > { %v1695_v54 = vmul.f32 %v1685_v29, %v2898_v8  ;;  %v1696_v5 = vmul.f32 %v1686_v1, %v2914_v14  ;;  %v1697_v34 = vmul.f32 %v1687_v32, %v2921_v4  ;;  %v1698_v56 = vmul.f32 %v1688_v40, %v2925_v27 }
 0x180   : > { %v1703_v57 = vsel %vm1646_vm7, %v1693_v30, 0.0  ;;  %v1704_v52 = vsel %vm1646_vm7, %v1694_v2, 0.0  ;;  %v1691_v41 = vmul.f32 %v1681_v21, %v1681_v21  ;;  %v1699_v14 = vmul.f32 %v1689_v60, %v2929_v36 }
 0x181   : > { %v1705_v12 = vadd.f32 %v1704_v52, %v1703_v57  ;;  %v1706_v3 = vsel %vm1646_vm7, %v1695_v54, 0.0  ;;  %v1708_v48 = vsel %vm1646_vm7, %v1696_v5, 0.0  ;;  %v1710_v43 = vsel %vm1646_vm7, %v1697_v34, 0.0  ;;  %v1955_v54 = vld [vmem:[%s2997_s4] ss:$0 sm:$0xff] }
 0x182   : > { %v1692_v42 = vmul.f32 %v1682_v50, %v1682_v50  ;;  %v1700_v39 = vmul.f32 %v1690_v38, %v2933_v44  ;;  %v1712_v4 = vsel %vm1646_vm7, %v1698_v56, 0.0  ;;  %v1701_v23 = vmul.f32 %v1691_v41, %v1629_v53 }
 0x183   : > { %v1707_v11 = vadd.f32 %v1706_v3, %v1705_v12  ;;  %v1714_v51 = vsel %vm1646_vm7, %v1699_v14, 0.0 }
 0x184   : > { %v1702_v27 = vmul.f32 %v1692_v42, %v1634_v19  ;;  %v1716_v45 = vsel %vm1646_vm7, %v1700_v39, 0.0  ;;  %v1718_v58 = vsel %vm1646_vm7, %v1701_v23, 0.0  ;;  %v1954_v19 = vld [vmem:[%s2996_s3] ss:$0 sm:$0xff] }
 0x185   : > { %v1709_v8 = vadd.f32 %v1708_v48, %v1707_v11 }
 0x186   : > { %v1720_v18 = vsel %vm1646_vm7, %v1702_v27, 0.0 }
 0x187   : > { %v1711_v46 = vadd.f32 %v1710_v43, %v1709_v8 }
 0x189   : > { %v1713_v35 = vadd.f32 %v1712_v4, %v1711_v46 }
 0x18b   : > { %v1715_v26 = vadd.f32 %v1714_v51, %v1713_v35 }
 0x18d   : > { %v1717_v55 = vadd.f32 %v1716_v45, %v1715_v26 }
 0x18f   : > { %v1719_v36 = vadd.f32 %v1718_v58, %v1717_v55 }
 0x191   : > { %v1721_v61 = vadd.f32 %v1720_v18, %v1719_v36 }
 0x193   : > { %v1722_v62 = vrot.slane %v1721_v61, 4 }
 0x195   : > { %v1723_v63 = vadd.f32 %v1722_v62, %v1721_v61 }
 0x197   : > { %v1724_v44 = vrot.slane %v1723_v63, 2 }
 0x199   : > { %v1725_v0 = vadd.f32 %v1724_v44, %v1723_v63 }
 0x19b   : > { %v1726_v31 = vrot.slane %v1725_v0, 1 }
 0x19d   : > { %v1727_v28 = vadd.f32 %v1726_v31, %v1725_v0 }
 0x19f   : > { %v1728_v53 = vmul.f32 0.015625, %v1727_v28 }
 0x1a1   : > { %v1729_v47 = vadd.f32 1e-05, %v1728_v53 }
 0x1a3   : > { %2308 = vrsqrt.f32 %v1729_v47 }
 0x1ad   : > { %v2309_v33 = vpop.eup %2308 }
 0x1ae   : > { %v1731_v37 = vmul.f32 %v2309_v33, %v1673_v10  ;;  %v1732_v6 = vmul.f32 %v2309_v33, %v1674_v15  ;;  %v1733_v7 = vmul.f32 %v2309_v33, %v1675_v22  ;;  %v1734_v9 = vmul.f32 %v2309_v33, %v1676_v59 }
 0x1af   : > { %v1735_v13 = vmul.f32 %v2309_v33, %v1677_v49  ;;  %v1736_v24 = vmul.f32 %v2309_v33, %v1678_v17  ;;  %v1737_v25 = vmul.f32 %v2309_v33, %v1679_v16  ;;  %v1738_v29 = vmul.f32 %v2309_v33, %v1680_v20 }
 0x1b0   : > { %v1739_v1 = vmul.f32 %v2309_v33, %v1681_v21  ;;  %v1740_v32 = vmul.f32 %v2309_v33, %v1682_v50  ;;  %v1748_v30 = vmul.f32 %v1954_v19, %v1731_v37  ;;  %v1749_v2 = vmul.f32 %v1954_v19, %v1732_v6 }
 0x1b1   : > { %v1750_v40 = vmul.f32 %v1954_v19, %v1733_v7  ;;  %v1751_v5 = vmul.f32 %v1954_v19, %v1734_v9  ;;  %v1752_v57 = vmul.f32 %v1954_v19, %v1735_v13  ;;  %v1753_v10 = vmul.f32 %v1954_v19, %v1736_v24 }
 0x1b2   : > { %v1754_v15 = vmul.f32 %v1954_v19, %v1737_v25  ;;  %v1755_v22 = vmul.f32 %v1954_v19, %v1738_v29  ;;  %v1756_v59 = vmul.f32 %v1954_v19, %v1739_v1  ;;  %v1757_v49 = vmul.f32 %v1954_v19, %v1740_v32 }
 0x1b3   : > { %v1765_v17 = vadd.f32 %v1955_v54, %v1748_v30  ;;  %v1766_v16 = vadd.f32 %v1955_v54, %v1749_v2  ;;  %v1767_v20 = vadd.f32 %v1955_v54, %v1750_v40  ;;  %v1768_v21 = vadd.f32 %v1955_v54, %v1751_v5 }
 0x1b4   : > { %v1769_v50 = vadd.f32 %v1955_v54, %v1752_v57  ;;  %v1770_v52 = vadd.f32 %v1955_v54, %v1753_v10  ;;  %v1771_v12 = vadd.f32 %v1955_v54, %v1754_v15  ;;  %v1772_v60 = vadd.f32 %v1955_v54, %v1755_v22 }
 0x1b5   : > { %v1773_v34 = vadd.f32 %v1955_v54, %v1756_v59  ;;  %v1774_v3 = vadd.f32 %v1955_v54, %v1757_v49  ;;  %v1775_v11 = vmul.f32 0.2, %v1765_v17  ;;  %v1776_v38 = vmul.f32 0.2, %v1766_v16 }
 0x1b6   : > { %v1777_v56 = vmul.f32 0.2, %v1767_v20  ;;  %v1778_v48 = vmul.f32 0.2, %v1768_v21  ;;  %v1779_v8 = vmul.f32 0.2, %v1769_v50 }
 0x1b7   : > { %v1780_v41 = vmul.f32 0.2, %v1770_v52  ;;  %v1781_v14 = vmul.f32 0.2, %v1771_v12  ;;  %v1782_v43 = vmul.f32 0.2, %v1772_v60  ;;  %v1785_v46 = vmax.f32 %v1765_v17, %v1775_v11 }
 0x1b8   : > { %v1783_v42 = vmul.f32 0.2, %v1773_v34  ;;  %v1784_v39 = vmul.f32 0.2, %v1774_v3  ;;  %v1786_v4 = vmax.f32 %v1766_v16, %v1776_v38  ;;  %v1787_v35 = vmax.f32 %v1767_v20, %v1777_v56 }
 0x1b9   : > { %v1788_v23 = vmax.f32 %v1768_v21, %v1778_v48  ;;  %v1789_v51 = vmax.f32 %v1769_v50, %v1779_v8  ;;  %v1790_v26 = vmax.f32 %v1770_v52, %v1780_v41  ;;  %v1791_v27 = vmax.f32 %v1771_v12, %v1781_v14  ;;  %1795 = vst.msk [vmem:[%s251_s22] sm:$0xff] %vm1646_vm7, %v1785_v46 }
 0x1ba   : > { %v1792_v45 = vmax.f32 %v1772_v60, %v1782_v43  ;;  %v1793_v55 = vmax.f32 %v1773_v34, %v1783_v42  ;;  %v1794_v58 = vmax.f32 %v1774_v3, %v1784_v39  ;;  %1796 = vst.msk [vmem:[%s251_s22 + $0x8] sm:$0xff] %vm1646_vm7, %v1786_v4  ;;  %1797 = vst.msk [vmem:[%s251_s22 + $0x10] sm:$0xff] %vm1646_vm7, %v1787_v35 }
 0x1bb   : > { %1798 = vst.msk [vmem:[%s251_s22 + $0x18] sm:$0xff] %vm1646_vm7, %v1788_v23  ;;  %1799 = vst.msk [vmem:[%s251_s22 + $0x20] sm:$0xff] %vm1646_vm7, %v1789_v51 }
 0x1bc   : > { %1800 = vst.msk [vmem:[%s251_s22 + $0x28] sm:$0xff] %vm1646_vm7, %v1790_v26  ;;  %1801 = vst.msk [vmem:[%s251_s22 + $0x30] sm:$0xff] %vm1646_vm7, %v1791_v27 }
 0x1bd   : > { %1802 = vst.msk [vmem:[%s251_s22 + $0x38] sm:$0xff] %vm1646_vm7, %v1792_v45  ;;  %1803 = vst.msk [vmem:[%s251_s22 + $0x40] sm:$0xff] %vm1646_vm7, %v1793_v55 }
 0x1be   : > { %1804 = vst.msk [vmem:[%s251_s22 + $0x48] sm:$0xff] %vm1646_vm7, %v1794_v58 }
 0x1bf PF: > { %s16_s21 = sadd.s32 1, %s2316_s21  }
 0x1c0   : > { %p13_p4 = scmp.ge.s32.totalorder %s16_s21, 4  }
 0x1c2   :  { %15 = sbr.rel (!%p13_p4) target bundleno = 1 (0x1), region = 74 }

</bundles_post_ra>
